<compile_context>
chip_gen: v7x
topology: tpu7x:2x2x1
jax: 0.10.0
libtpu: 0.0.40
codegen_flags: <defaults>
</compile_context>

<pallas_src>
import functools
import math

import jax
import jax.numpy as jnp
from jax import lax
from jax.experimental import pallas as pl
from jax.experimental.pallas import tpu as pltpu

_INV_SQRT2 = 1.0 / math.sqrt(2.0)


def _round_up(a, b):
    return (a + b - 1) // b * b


# --------------------------------------------------------------------------- #
# Kernel
# --------------------------------------------------------------------------- #
def ffn_kernel(x_ref, w1_ref, b1_ref, w2_ref, b2_ref, g_ref, o_ref):
    """Grid: (M // tm, H // tk); axis 1 (k) is the hidden-dim reduction axis."""
    k = pl.program_id(1)
    nk = pl.num_programs(1)

    # Linear 1 (full-C contraction, tk-column slice): bf16 MXU operands, f32 acc.
    h = jnp.dot(x_ref[...], w1_ref[...],
                preferred_element_type=jnp.float32) + b1_ref[...]

    # Exact (erf-based) GELU in f32 — matches torch.nn.GELU() default.
    h = 0.5 * h * (1.0 + lax.erf(h * _INV_SQRT2))

    # Linear 2 partial product for this k slice.
    part = jnp.dot(h.astype(jnp.bfloat16), w2_ref[...],
                   preferred_element_type=jnp.float32)

    # Accumulate directly into the f32, VMEM-resident output block (its block index
    # is constant across k) — no separate accumulator scratch needed.
    @pl.when(k == 0)
    def _first():
        o_ref[...] = part

    @pl.when(k > 0)
    def _accumulate():
        o_ref[...] += part

    @pl.when(k == nk - 1)
    def _finalize():
        y = o_ref[...] + b2_ref[...]
        # Dropout: eval-mode identity.
        # LayerNorm over last dim, eps=1e-5, weight-only affine (bias=False).
        # Single-pass statistics: var = E[y^2] - mu^2.
        mu = jnp.mean(y, axis=-1, keepdims=True)
        ms = jnp.mean(y * y, axis=-1, keepdims=True)
        var = ms - mu * mu
        o_ref[...] = ((y - mu) * lax.rsqrt(var + 1e-5) * g_ref[...]).astype(o_ref.dtype)


# --------------------------------------------------------------------------- #
# Hardware / feature probes
# --------------------------------------------------------------------------- #
def _tpu_config():
    """Returns (vmem_capacity_bytes, is_v5, num_tensorcores)."""
    kind = ""
    try:
        kind = jax.devices()[0].device_kind.lower()
    except Exception:  # no devices visible at trace time; use conservative defaults
        pass
    vmem_cap = 128 << 20
    try:
        vmem_cap = int(pltpu.get_tpu_info().vmem_capacity_bytes)
    except Exception:  # narrow capability probe: query unavailable on this build
        if "v7" in kind:
            vmem_cap = 64 << 20
    is_v5 = "v5" in kind
    num_tc = 2 if ("v7" in kind or vmem_cap <= (64 << 20)) else 1
    return vmem_cap, is_v5, num_tc


@functools.lru_cache(maxsize=None)
def _pipeline_mode_supported():
    """Narrow feature check: does this build support BlockSpec pipeline_mode=pl.Buffered(n)
    end-to-end (construction + lowering)?  Probed on a tiny copy kernel, not the real one."""
    if not hasattr(pl, "Buffered"):
        return False

    def _probe(x_ref, o_ref):
        o_ref[...] = x_ref[...]

    try:
        spec = pl.BlockSpec((8, 128), lambda i: (i, 0), pipeline_mode=pl.Buffered(1))
        fn = pl.pallas_call(
            _probe,
            out_shape=jax.ShapeDtypeStruct((8, 128), jnp.float32),
            grid=(1,),
            in_specs=[spec],
            out_specs=pl.BlockSpec((8, 128), lambda i: (i, 0)),
        )
        jax.jit(fn).lower(jax.ShapeDtypeStruct((8, 128), jnp.float32)).compile()
        return True
    except Exception:  # feature probe only — simply disable Buffered()
        return False


# --------------------------------------------------------------------------- #
# Wrapper
# --------------------------------------------------------------------------- #
def feedforward_pallas(x, w1, b1, w2, b2, gamma, *, tm=None, tk=None):
    """x: (B, T, C) f32. Weights: w1 (C, 4C), b1 (4C,), w2 (4C, C), b2 (C,), gamma (C,)."""
    B, T, C = x.shape
    H = w1.shape[1]
    M = B * T

    vmem_cap, is_v5, num_tc = _tpu_config()
    small_vmem = vmem_cap <= (64 << 20)          # v7x-class part
    has_buffered = _pipeline_mode_supported()

    # ---- row tile (tm): target per-generation compute-bound roofline ----------
    if tm is None:
        tm = 256 if is_v5 else 512               # v5e crossover ~240 flop/B; v6e/v7x ~620-650
    tm_eff = min(tm, _round_up(M, 16))
    if num_tc > 1 and M >= 256:
        # ensure the "parallel" M axis spans both v7x TensorCores
        tm_eff = min(tm_eff, _round_up(-(-M // num_tc), 128))
    tm_eff = max(16, _round_up(tm_eff, 16))
    M_pad = _round_up(M, tm_eff)
    grid_m = M_pad // tm_eff

    # ---- hidden tile (tk): keep weights resident when they fit, else block K --
    resident_thresh = (16 << 20) if small_vmem else (40 << 20)
    if tk is None:
        tk = H if (2 * C * H * 2) <= resident_thresh else (512 if small_vmem else 1024)
    if tk >= H:
        tk, H_pad = H, H
    else:
        tk = max(128, _round_up(tk, 128))
        H_pad = _round_up(H, tk)                 # zero-pad H so tk always divides it
    nk = H_pad // tk

    # ---- operand preparation (bf16 MXU operands; f32 math inside the kernel) --
    f32 = jnp.float32
    x2 = x.reshape(M, C).astype(jnp.bfloat16)
    if M_pad != M:
        x2 = jnp.pad(x2, ((0, M_pad - M), (0, 0)))

    w1b = w1.astype(jnp.bfloat16)
    w2b = w2.astype(jnp.bfloat16)
    b1f = b1.astype(f32)
    if H_pad != H:
        # Exact zero-padding of the hidden dim: padded b1=0 -> gelu(0)=0, and the
        # padded rows of w2 are zero, so the extra columns contribute nothing.
        w1b = jnp.pad(w1b, ((0, 0), (0, H_pad - H)))
        w2b = jnp.pad(w2b, ((0, H_pad - H), (0, 0)))
        b1f = jnp.pad(b1f, ((0, H_pad - H),))
    # Blocked-contiguous layout so each k block of w1 is one contiguous DMA.
    w1blk = w1b.reshape(C, nk, tk).transpose(1, 0, 2)        # (nk, C, tk)
    b1_2 = b1f.reshape(1, H_pad)
    b2_2 = b2.reshape(1, C).astype(f32)
    g_2 = gamma.reshape(1, C).astype(f32)

    # ---- pipelining depth per operand ------------------------------------------
    def buf(n):
        return {"pipeline_mode": pl.Buffered(n)} if has_buffered else {}

    inv_kw = buf(1)                               # b2 / gamma: never change across the grid
    if nk == 1:
        w_kw = buf(1)                             # whole weights grid-invariant & resident
    elif is_v5:
        w_kw = buf(3)                             # deep-buffer streamed weights (128 MiB VMEM)
    else:
        w_kw = {}                                 # default double-buffering

    # ---- VMEM budget (explicit scoped limit, per-generation cap) ---------------
    nbuf_w = 1 if (nk == 1 and has_buffered) else (3 if (is_v5 and nk > 1 and has_buffered) else 2)
    w_block_bytes = 2 * C * tk * 2 + tk * 4       # w1 + w2 blocks (bf16) + b1 slice (f32)
    est = (nbuf_w * w_block_bytes
           + 2 * tm_eff * C * 2                   # x tile (bf16, double-buffered)
           + 2 * tm_eff * C * 4                   # out tile / f32 accumulator (double-buffered)
           + 3 * tm_eff * tk * 4                  # GELU intermediate + bf16 copy headroom
           + 4 * C * 4)
    cap = (48 << 20) if small_vmem else (100 << 20)
    vmem_limit = max(32 << 20, min(int(est * 1.25) + (4 << 20), cap))

    # ---- advisory cost estimate (accounts for weight re-streaming) -------------
    weight_bytes = 2 * C * H_pad * 2 + H_pad * 4
    cost = pl.CostEstimate(
        flops=4 * M_pad * C * H_pad,
        transcendentals=M_pad * H_pad,
        bytes_accessed=(M_pad * C * 2 + M_pad * C * 4
                        + (1 if nk == 1 else grid_m) * weight_bytes
                        + 2 * C * 4),
    )

    out = pl.pallas_call(
        ffn_kernel,
        out_shape=jax.ShapeDtypeStruct((M_pad, C), jnp.float32),
        grid_spec=pltpu.PrefetchScalarGridSpec(
            num_scalar_prefetch=0,
            grid=(grid_m, nk),
            in_specs=[
                pl.BlockSpec((tm_eff, C), lambda i, k: (i, 0)),              # x rows (bf16)
                pl.BlockSpec((None, C, tk), lambda i, k: (k, 0, 0), **w_kw),  # w1 block (bf16)
                pl.BlockSpec((1, tk), lambda i, k: (0, k), **w_kw),          # b1 slice (f32)
                pl.BlockSpec((tk, C), lambda i, k: (k, 0), **w_kw),          # w2 block (bf16)
                pl.BlockSpec((1, C), lambda i, k: (0, 0), **inv_kw),         # b2 (f32)
                pl.BlockSpec((1, C), lambda i, k: (0, 0), **inv_kw),         # LN weight (f32)
            ],
            out_specs=pl.BlockSpec((tm_eff, C), lambda i, k: (i, 0)),
        ),
        compiler_params=pltpu.CompilerParams(
            dimension_semantics=("parallel", "arbitrary"),
            vmem_limit_bytes=vmem_limit,
        ),
        cost_estimate=cost,
    )(x2, w1blk, b1_2, w2b, b2_2, g_2)

    return out[:M].reshape(B, T, C).astype(x.dtype)


# --------------------------------------------------------------------------- #
# Pure-JAX reference (mirrors the kernel's bf16 operand rounding)
# --------------------------------------------------------------------------- #
def feedforward_ref(x, w1, b1, w2, b2, gamma):
    f32 = jnp.float32
    xb = x.astype(jnp.bfloat16).astype(f32)
    w1b = w1.astype(jnp.bfloat16).astype(f32)
    w2b = w2.astype(jnp.bfloat16).astype(f32)
    h = jnp.dot(xb, w1b, precision=lax.Precision.HIGHEST) + b1
    h = 0.5 * h * (1.0 + lax.erf(h * _INV_SQRT2))
    h = h.astype(jnp.bfloat16).astype(f32)
    y = jnp.dot(h, w2b, precision=lax.Precision.HIGHEST) + b2
    mu = jnp.mean(y, axis=-1, keepdims=True)
    var = jnp.mean((y - mu) ** 2, axis=-1, keepdims=True)
    return (y - mu) / jnp.sqrt(var + 1e-5) * gamma


if __name__ == "__main__":
    # Small shapes consistent with the module: batch=2, seq=8, n_embd=384.
    B, T, C = 2, 8, 384
    H = 4 * C

    key = jax.random.PRNGKey(0)
    kx, kw1, kw2 = jax.random.split(key, 3)

    x = jax.random.normal(kx, (B, T, C), dtype=jnp.float32)

    # Deterministic init mirroring _init_weights: Linear weights ~ N(0, 0.01), biases zero.
    # PyTorch Linear stores weight as (out, in); generate in that convention, then transpose.
    w1_t = 0.01 * jax.random.normal(kw1, (H, C), dtype=jnp.float32)   # Linear(C, 4C).weight
    w2_t = 0.01 * jax.random.normal(kw2, (C, H), dtype=jnp.float32)   # Linear(4C, C).weight
    w1 = w1_t.T   # (C, H)
    w2 = w2_t.T   # (H, C)
    b1 = jnp.zeros((H,), dtype=jnp.float32)
    b2 = jnp.zeros((C,), dtype=jnp.float32)
    gamma = jnp.ones((C,), dtype=jnp.float32)  # LayerNorm weight (bias=False)

    out = feedforward_pallas(x, w1, b1, w2, b2, gamma)
    out = jax.block_until_ready(out)

    ref = feedforward_ref(x, w1, b1, w2, b2, gamma)
    assert out.shape == (B, T, C)
    assert jnp.allclose(out, ref, atol=2e-3, rtol=2e-3), "mismatch vs reference"

    print("KERNEL_OK")
</pallas_src>

<mosaic_0001>
module attributes {stable_mosaic.version = 11 : i64} {
  func.func @ffn_kernel(%arg0: i32, %arg1: i32, %arg2: memref<16x384xbf16, #tpu.memory_space<vmem>>, %arg3: memref<1x384x1536xbf16, #tpu.memory_space<vmem>>, %arg4: memref<1x1536xf32, #tpu.memory_space<vmem>>, %arg5: memref<1536x384xbf16, #tpu.memory_space<vmem>>, %arg6: memref<1x384xf32, #tpu.memory_space<vmem>>, %arg7: memref<1x384xf32, #tpu.memory_space<vmem>>, %arg8: memref<16x384xf32, #tpu.memory_space<vmem>>) attributes {dimension_semantics = [#tpu.dimension_semantics<parallel>, #tpu.dimension_semantics<arbitrary>], iteration_bounds = array<i64: 1, 1>, scalar_prefetch = 0 : i64, scratch_operands = 0 : i64, tpu.core_type = #tpu.core_type<tc>, window_params = [{transform_indices = @transform_0, window_bounds = array<i64: 16, 384>}, {transform_indices = @transform_1, window_bounds = array<i64: 1, 384, 1536>}, {transform_indices = @transform_2, window_bounds = array<i64: 1, 1536>}, {transform_indices = @transform_3, window_bounds = array<i64: 1536, 384>}, {pipeline_mode = #tpu.pipeline_mode<synchronous>, transform_indices = @transform_4, window_bounds = array<i64: 1, 384>}, {pipeline_mode = #tpu.pipeline_mode<synchronous>, transform_indices = @transform_5, window_bounds = array<i64: 1, 384>}, {transform_indices = @transform_6, window_bounds = array<i64: 16, 384>}]} {
    %c0 = arith.constant 0 : index
    %c0_0 = arith.constant 0 : index
    %0 = vector.load %arg2[%c0, %c0_0] : memref<16x384xbf16, #tpu.memory_space<vmem>>, vector<16x384xbf16>
    %c0_1 = arith.constant 0 : index
    %c0_2 = arith.constant 0 : index
    %c0_3 = arith.constant 0 : index
    %1 = vector.load %arg3[%c0_1, %c0_2, %c0_3] : memref<1x384x1536xbf16, #tpu.memory_space<vmem>>, vector<1x384x1536xbf16>
    %2 = vector.shape_cast %1 : vector<1x384x1536xbf16> to vector<384x1536xbf16>
    %cst = arith.constant dense<0.000000e+00> : vector<16x1536xf32>
    %3 = tpu.matmul %0, %2, %cst {dimension_numbers = #tpu.dot_dimension_numbers<[1], [0], [0], [1], [0, 0, 1, 1], [], []>} : vector<16x384xbf16>, vector<384x1536xbf16>, vector<16x1536xf32> -> vector<16x1536xf32>
    %c0_4 = arith.constant 0 : index
    %c0_5 = arith.constant 0 : index
    %4 = vector.load %arg4[%c0_4, %c0_5] : memref<1x1536xf32, #tpu.memory_space<vmem>>, vector<1x1536xf32>
    %5 = vector.broadcast %4 : vector<1x1536xf32> to vector<16x1536xf32>
    %6 = arith.addf %3, %5 : vector<16x1536xf32>
    %cst_6 = arith.constant 5.000000e-01 : f32
    %7 = vector.broadcast %cst_6 : f32 to vector<16x1536xf32>
    %8 = arith.mulf %7, %6 : vector<16x1536xf32>
    %cst_7 = arith.constant 0.707106769 : f32
    %9 = vector.broadcast %cst_7 : f32 to vector<16x1536xf32>
    %10 = arith.mulf %6, %9 : vector<16x1536xf32>
    %11 = math.erf %10 : vector<16x1536xf32>
    %cst_8 = arith.constant 1.000000e+00 : f32
    %12 = vector.broadcast %cst_8 : f32 to vector<16x1536xf32>
    %13 = arith.addf %12, %11 : vector<16x1536xf32>
    %14 = arith.mulf %8, %13 : vector<16x1536xf32>
    %15 = arith.truncf %14 : vector<16x1536xf32> to vector<16x1536xbf16>
    %c0_9 = arith.constant 0 : index
    %c0_10 = arith.constant 0 : index
    %16 = vector.load %arg5[%c0_9, %c0_10] : memref<1536x384xbf16, #tpu.memory_space<vmem>>, vector<1536x384xbf16>
    %cst_11 = arith.constant dense<0.000000e+00> : vector<16x384xf32>
    %17 = tpu.matmul %15, %16, %cst_11 {dimension_numbers = #tpu.dot_dimension_numbers<[1], [0], [0], [1], [0, 0, 1, 1], [], []>} : vector<16x1536xbf16>, vector<1536x384xbf16>, vector<16x384xf32> -> vector<16x384xf32>
    %c0_i32 = arith.constant 0 : i32
    %18 = arith.cmpi eq, %arg1, %c0_i32 : i32
    %19 = arith.extui %18 : i1 to i32
    %c0_i32_12 = arith.constant 0 : i32
    %20 = arith.cmpi ne, %19, %c0_i32_12 : i32
    scf.if %20 {
      %c0_17 = arith.constant 0 : index
      %c0_18 = arith.constant 0 : index
      %27 = vector.load %arg8[%c0_17, %c0_18] : memref<16x384xf32, #tpu.memory_space<vmem>>, vector<16x384xf32>
      tpu.vector_store %arg8[%c0_17, %c0_18], %17 {strides = array<i32>} : memref<16x384xf32, #tpu.memory_space<vmem>>, vector<16x384xf32>,
    } else {
    }
    %c0_i32_13 = arith.constant 0 : i32
    %21 = arith.cmpi sgt, %arg1, %c0_i32_13 : i32
    %22 = arith.extui %21 : i1 to i32
    %c0_i32_14 = arith.constant 0 : i32
    %23 = arith.cmpi ne, %22, %c0_i32_14 : i32
    scf.if %23 {
      %c0_17 = arith.constant 0 : index
      %c0_18 = arith.constant 0 : index
      %27 = vector.load %arg8[%c0_17, %c0_18] : memref<16x384xf32, #tpu.memory_space<vmem>>, vector<16x384xf32>
      %28 = arith.addf %27, %17 : vector<16x384xf32>
      %c0_19 = arith.constant 0 : index
      %c0_20 = arith.constant 0 : index
      %29 = vector.load %arg8[%c0_19, %c0_20] : memref<16x384xf32, #tpu.memory_space<vmem>>, vector<16x384xf32>
      tpu.vector_store %arg8[%c0_19, %c0_20], %28 {strides = array<i32>} : memref<16x384xf32, #tpu.memory_space<vmem>>, vector<16x384xf32>,
    } else {
    }
    %c0_i32_15 = arith.constant 0 : i32
    %24 = arith.cmpi eq, %arg1, %c0_i32_15 : i32
    %25 = arith.extui %24 : i1 to i32
    %c0_i32_16 = arith.constant 0 : i32
    %26 = arith.cmpi ne, %25, %c0_i32_16 : i32
    scf.if %26 {
      %c0_17 = arith.constant 0 : index
      %c0_18 = arith.constant 0 : index
      %27 = vector.load %arg8[%c0_17, %c0_18] : memref<16x384xf32, #tpu.memory_space<vmem>>, vector<16x384xf32>
      %c0_19 = arith.constant 0 : index
      %c0_20 = arith.constant 0 : index
      %28 = vector.load %arg6[%c0_19, %c0_20] : memref<1x384xf32, #tpu.memory_space<vmem>>, vector<1x384xf32>
      %29 = vector.broadcast %28 : vector<1x384xf32> to vector<16x384xf32>
      %30 = arith.addf %27, %29 : vector<16x384xf32>
      %cst_21 = arith.constant dense<0.000000e+00> : vector<16xf32>
      %31 = vector.multi_reduction <add>, %30, %cst_21 [1] : vector<16x384xf32> to vector<16xf32>
      %32 = vector.shape_cast %31 : vector<16xf32> to vector<16x1xf32>
      %cst_22 = arith.constant 3.840000e+02 : f32
      %33 = vector.broadcast %cst_22 : f32 to vector<16x1xf32>
      %34 = arith.divf %32, %33 : vector<16x1xf32>
      %35 = arith.mulf %30, %30 : vector<16x384xf32>
      %cst_23 = arith.constant dense<0.000000e+00> : vector<16xf32>
      %36 = vector.multi_reduction <add>, %35, %cst_23 [1] : vector<16x384xf32> to vector<16xf32>
      %37 = vector.shape_cast %36 : vector<16xf32> to vector<16x1xf32>
      %cst_24 = arith.constant 3.840000e+02 : f32
      %38 = vector.broadcast %cst_24 : f32 to vector<16x1xf32>
      %39 = arith.divf %37, %38 : vector<16x1xf32>
      %40 = arith.mulf %34, %34 : vector<16x1xf32>
      %41 = arith.subf %39, %40 : vector<16x1xf32>
      %42 = vector.broadcast %34 : vector<16x1xf32> to vector<16x384xf32>
      %43 = arith.subf %30, %42 : vector<16x384xf32>
      %cst_25 = arith.constant 9.99999974E-6 : f32
      %44 = vector.broadcast %cst_25 : f32 to vector<16x1xf32>
      %45 = arith.addf %41, %44 : vector<16x1xf32>
      %46 = math.rsqrt %45 : vector<16x1xf32>
      %47 = vector.broadcast %46 : vector<16x1xf32> to vector<16x384xf32>
      %48 = arith.mulf %43, %47 : vector<16x384xf32>
      %c0_26 = arith.constant 0 : index
      %c0_27 = arith.constant 0 : index
      %49 = vector.load %arg7[%c0_26, %c0_27] : memref<1x384xf32, #tpu.memory_space<vmem>>, vector<1x384xf32>
      %50 = vector.broadcast %49 : vector<1x384xf32> to vector<16x384xf32>
      %51 = arith.mulf %48, %50 : vector<16x384xf32>
      %c0_28 = arith.constant 0 : index
      %c0_29 = arith.constant 0 : index
      %52 = vector.load %arg8[%c0_28, %c0_29] : memref<16x384xf32, #tpu.memory_space<vmem>>, vector<16x384xf32>
      tpu.vector_store %arg8[%c0_28, %c0_29], %51 {strides = array<i32>} : memref<16x384xf32, #tpu.memory_space<vmem>>, vector<16x384xf32>,
    } else {
    }
    return
  }
  func.func @transform_0(%arg0: i32, %arg1: i32) -> (i32, i32) {
    %c0_i32 = arith.constant 0 : i32
    %c0_i32_0 = arith.constant 0 : i32
    return %arg0, %c0_i32 : i32, i32
  }
  func.func @transform_1(%arg0: i32, %arg1: i32) -> (i32, i32, i32) {
    %c0_i32 = arith.constant 0 : i32
    %c0_i32_0 = arith.constant 0 : i32
    %c0_i32_1 = arith.constant 0 : i32
    return %arg1, %c0_i32, %c0_i32_0 : i32, i32, i32
  }
  func.func @transform_2(%arg0: i32, %arg1: i32) -> (i32, i32) {
    %c0_i32 = arith.constant 0 : i32
    %c0_i32_0 = arith.constant 0 : i32
    return %c0_i32, %arg1 : i32, i32
  }
  func.func @transform_3(%arg0: i32, %arg1: i32) -> (i32, i32) {
    %c0_i32 = arith.constant 0 : i32
    %c0_i32_0 = arith.constant 0 : i32
    return %arg1, %c0_i32 : i32, i32
  }
  func.func @transform_4(%arg0: i32, %arg1: i32) -> (i32, i32) {
    %c0_i32 = arith.constant 0 : i32
    %c0_i32_0 = arith.constant 0 : i32
    %c0_i32_1 = arith.constant 0 : i32
    return %c0_i32, %c0_i32_0 : i32, i32
  }
  func.func @transform_5(%arg0: i32, %arg1: i32) -> (i32, i32) {
    %c0_i32 = arith.constant 0 : i32
    %c0_i32_0 = arith.constant 0 : i32
    %c0_i32_1 = arith.constant 0 : i32
    return %c0_i32, %c0_i32_0 : i32, i32
  }
  func.func @transform_6(%arg0: i32, %arg1: i32) -> (i32, i32) {
    %c0_i32 = arith.constant 0 : i32
    %c0_i32_0 = arith.constant 0 : i32
    return %arg0, %c0_i32 : i32, i32
  }
}

</mosaic_0001>

<bundles_post_ra>
// kernel: tpu_custom_call.1
= control target key start
LH: loop header
LB: loop body
LE: loop exit
PB: predicated region body
PF: predicated region fallthrough
CT: control target
= control target key end

     0   :  { %11 = vsyncpa [#allocation3], 0  ;;  %s7229_s0 = inlined_call_operand.hbm [shape: bf16[16,384], index: 0, kind: input, shape index: {}]   ;;  %s7230_s1 = inlined_call_operand.hbm [shape: bf16[1,384,1536], index: 1, kind: input, shape index: {}]   ;;  %s7231_s2 = inlined_call_operand.hbm [shape: f32[1,1536], index: 2, kind: input, shape index: {}]   ;;  %s7232_s3 = inlined_call_operand.hbm [shape: bf16[1536,384], index: 3, kind: input, shape index: {}]   ;;  %s7233_s4 = inlined_call_operand.hbm [shape: f32[1,384], index: 4, kind: input, shape index: {}]   ;;  %s7234_s5 = inlined_call_operand.hbm [shape: f32[1,384], index: 5, kind: input, shape index: {}]   ;;  %s7235_s6 = inlined_call_operand.hbm [shape: f32[16,384], index: 6, kind: output, shape index: {}]  }
   0x1   :  { %12 = vsyncpa [#allocation6], 0 }
   0x2   :  { %13 = vsyncpa [#allocation9], 0 }
   0x3   :  { %14 = vsyncpa [#allocation12], 0 }
   0x4   :  { %15 = vsyncpa [#allocation4], 0  ;;  %s6978_s21 = smov [#allocation5]   ;;  %s6814_s25 = scalar_lea.hbm %s7230_s1, 36864 }
   0x5   :  { %s33_s22 = sshll.u32 %s6978_s21, 4  ;;  %p6815_p0 = scmp.ne.s32.totalorder %s7230_s1, %s6814_s25  ;;  %s34_s22 = int_to_ptr.vmem [resolvable:$true] %s33_s22 }
   0x6   :  { %p6818_p1 = scmp.lt.u32.totalorder %s6814_s25, %s7230_s1 }
   0x8   :  { %p6820_p2 = pnand %p6818_p1, %p6815_p0 }
   0xa   :  { %6823 = shalt.err (!%p6820_p2)
}
   0xb   :  { %s6824_s30 = scalar_lea.vmem %s34_s22, 36864  ;;  %p6829_p4 = scmp.lt.s32.totalorder %s34_s22, %s34_s22 }
   0xc   :  { %p6825_p3 = scmp.ne.s32.totalorder %s34_s22, %s6824_s30  ;;  %p6830_p5 = scmp.lt.s32.totalorder %s6824_s30, %s6824_s30 }
   0xe   :  { %p6831_p6 = por %p6830_p5, %p6829_p4 }
  0x10   :  { %p6832_p7 = pnand %p6831_p6, %p6825_p3 }
  0x12   :  { %6835 = shalt.err (!%p6832_p7)
}
  0x13   :  { %s6979_s7 = smov 768   ;;  %s6980_s8 = smov 48  }
  0x14   :  { %39 = dma.hbm_to_vmem [thread:$0]  %s7230_s1, 36864, %s34_s22, [#allocation6], %s6979_s7, %s6979_s7, %s6980_s8  }
  0x15   :  { %s6981_s11 = smov [#allocation8]   ;;  %s6982_s13 = smov [#allocation2]  }
  0x16   :  { %s55_s12 = sshll.u32 %s6981_s11, 4  ;;  %s21_s14 = sshll.u32 %s6982_s13, 4  ;;  %s56_s12 = int_to_ptr.vmem [resolvable:$true] %s55_s12  ;;  %s22_s14 = int_to_ptr.vmem [resolvable:$true] %s21_s14 }
  0x17   :  { %s6836_s17 = scalar_lea.hbm %s7232_s3, 36864 }
  0x18   :  { %p6837_p8 = scmp.ne.s32.totalorder %s7232_s3, %s6836_s17  ;;  %p6840_p9 = scmp.lt.u32.totalorder %s6836_s17, %s7232_s3 }
  0x1a   :  { %p6842_p10 = pnand %p6840_p9, %p6837_p8 }
  0x1c   :  { %6845 = shalt.err (!%p6842_p10)
}
  0x1d   :  { %s6846_s1 = scalar_lea.vmem %s56_s12, 36864  ;;  %p6851_p12 = scmp.lt.s32.totalorder %s56_s12, %s56_s12 }
  0x1e   :  { %p6847_p11 = scmp.ne.s32.totalorder %s56_s12, %s6846_s1  ;;  %p6852_p13 = scmp.lt.s32.totalorder %s6846_s1, %s6846_s1 }
  0x20   :  { %p6853_p0 = por %p6852_p13, %p6851_p12 }
  0x22   :  { %p6854_p1 = pnand %p6853_p0, %p6847_p11 }
  0x24   :  { %6857 = shalt.err (!%p6854_p1)
}
  0x25   :  { %s6983_s22 = smov 192   ;;  %s6984_s23 = smov 12  }
  0x26   :  { %61 = dma.hbm_to_vmem [thread:$0]  %s7232_s3, 36864, %s56_s12, [#allocation9], %s6983_s22, %s6983_s22, %s6984_s23  }
  0x27   :  { %s6858_s28 = scalar_lea.hbm %s7229_s0, 384 }
  0x28   :  { %p6859_p2 = scmp.ne.s32.totalorder %s7229_s0, %s6858_s28  ;;  %p6862_p3 = scmp.lt.u32.totalorder %s6858_s28, %s7229_s0 }
  0x2a   :  { %p6864_p4 = pnand %p6862_p3, %p6859_p2 }
  0x2c   :  { %6867 = shalt.err (!%p6864_p4)
}
  0x2d   :  { %s6868_s9 = scalar_lea.vmem %s22_s14, 384  ;;  %p6873_p6 = scmp.lt.s32.totalorder %s22_s14, %s22_s14 }
  0x2e   :  { %p6869_p5 = scmp.ne.s32.totalorder %s22_s14, %s6868_s9  ;;  %p6874_p7 = scmp.lt.s32.totalorder %s6868_s9, %s6868_s9 }
  0x30   :  { %p6875_p8 = por %p6874_p7, %p6873_p6 }
  0x32   :  { %p6876_p9 = pnand %p6875_p8, %p6869_p5 }
  0x34   :  { %6879 = shalt.err (!%p6876_p9)
}
  0x35   :  { %27 = dma.hbm_to_vmem [thread:$0]  %s7229_s0, 384, %s22_s14, [#allocation3], %s6983_s22, %s6983_s22, %s6984_s23  }
  0x36   :  { %s6985_s11 = smov [#allocation7]   ;;  %s6986_s13 = smov [#allocation10]  }
  0x37   :  { %s46_s12 = sshll.u32 %s6985_s11, 4  ;;  %s68_s15 = sshll.u32 %s6986_s13, 4  ;;  %s47_s12 = int_to_ptr.vmem [resolvable:$true] %s46_s12  ;;  %s69_s15 = int_to_ptr.vmem [resolvable:$true] %s68_s15 }
  0x38   :  { %s6880_s18 = scalar_lea.hbm %s7231_s2, 192 }
  0x39   :  { %p6881_p10 = scmp.ne.s32.totalorder %s7231_s2, %s6880_s18  ;;  %p6884_p11 = scmp.lt.u32.totalorder %s6880_s18, %s7231_s2 }
  0x3b   :  { %p6886_p12 = pnand %p6884_p11, %p6881_p10 }
  0x3d   :  { %6889 = shalt.err (!%p6886_p12)
}
  0x3e   :  { %s6890_s0 = scalar_lea.vmem %s47_s12, 192  ;;  %p6895_p0 = scmp.lt.s32.totalorder %s47_s12, %s47_s12 }
  0x3f   :  { %p6891_p13 = scmp.ne.s32.totalorder %s47_s12, %s6890_s0  ;;  %p6896_p1 = scmp.lt.s32.totalorder %s6890_s0, %s6890_s0 }
  0x41   :  { %p6897_p2 = por %p6896_p1, %p6895_p0 }
  0x43   :  { %p6898_p3 = pnand %p6897_p2, %p6891_p13 }
  0x45   :  { %6901 = shalt.err (!%p6898_p3)
}
  0x46   :  { %49 = dma.hbm_to_vmem [thread:$0]  %s7231_s2, 192, %s47_s12, [#allocation6]  }
  0x47   :  { %s6902_s25 = scalar_lea.hbm %s7233_s4, 48 }
  0x48   :  { %p6903_p4 = scmp.ne.s32.totalorder %s7233_s4, %s6902_s25  ;;  %p6906_p5 = scmp.lt.u32.totalorder %s6902_s25, %s7233_s4 }
  0x4a   :  { %p6908_p6 = pnand %p6906_p5, %p6903_p4 }
  0x4c   :  { %6911 = shalt.err (!%p6908_p6)
}
  0x4d   :  { %s6912_s30 = scalar_lea.vmem %s69_s15, 48  ;;  %s6916_s7 = scalar_lea.vmem %s69_s15, 64 }
  0x4e   :  { %p6913_p7 = scmp.ne.s32.totalorder %s69_s15, %s6912_s30  ;;  %p6917_p8 = scmp.lt.s32.totalorder %s69_s15, %s69_s15 }
  0x4f   :  { %p6918_p9 = scmp.lt.s32.totalorder %s6916_s7, %s6912_s30 }
  0x51   :  { %p6919_p10 = por %p6918_p9, %p6917_p8 }
  0x53   :  { %p6920_p11 = pnand %p6919_p10, %p6913_p7 }
  0x55   :  { %6923 = shalt.err (!%p6920_p11)
}
  0x56   :  { %71 = dma.hbm_to_vmem [thread:$0]  %s7233_s4, 48, %s69_s15, [#allocation9]  }
  0x57   :  { %s6987_s9 = smov [#allocation11]   ;;  %s6924_s12 = scalar_lea.hbm %s7234_s5, 48 }
  0x58   :  { %s78_s3 = sshll.u32 %s6987_s9, 4  ;;  %p6925_p12 = scmp.ne.s32.totalorder %s7234_s5, %s6924_s12  ;;  %s79_s3 = int_to_ptr.vmem [resolvable:$true] %s78_s3 }
  0x59   :  { %p6928_p13 = scmp.lt.u32.totalorder %s6924_s12, %s7234_s5 }
  0x5b   :  { %p6930_p0 = pnand %p6928_p13, %p6925_p12 }
  0x5d   :  { %6933 = shalt.err (!%p6930_p0)
}
  0x5e   :  { %s6934_s19 = scalar_lea.vmem %s79_s3, 48  ;;  %s6938_s4 = scalar_lea.vmem %s79_s3, 64 }
  0x5f   :  { %p6935_p1 = scmp.ne.s32.totalorder %s79_s3, %s6934_s19  ;;  %p6939_p2 = scmp.lt.s32.totalorder %s79_s3, %s79_s3 }
  0x60   :  { %p6940_p3 = scmp.lt.s32.totalorder %s6938_s4, %s6934_s19 }
  0x62   :  { %p6941_p4 = por %p6940_p3, %p6939_p2 }
  0x64   :  { %p6942_p5 = pnand %p6941_p4, %p6935_p1 }
  0x66   :  { %6945 = shalt.err (!%p6942_p5)
}
  0x67   :  { %81 = dma.hbm_to_vmem [thread:$0]  %s7234_s5, 48, %s79_s3, [#allocation12]  }
  0x68   :  { %6968 = dma.done.wait [#allocation3], 384  }
  0x69   :  { %6969 = vsyncadd [#allocation3], 4294966912 }
  0x6a   :  { %6970 = dma.done.wait [#allocation6], 37056  }
  0x6b   :  { %6971 = vsyncadd [#allocation6], 4294930240 }
  0x6c   :  { %6972 = dma.done.wait [#allocation9], 36912  }
  0x6d   :  { %6973 = vsyncadd [#allocation9], 4294930384 }
  0x6e   :  { %6974 = dma.done.wait [#allocation12], 48  }
  0x6f   :  { %6975 = vsyncadd [#allocation12], 4294967248  ;;  %v5938_v0 = vld [vmem:[#allocation5 + $0x4] ss:$48 sps:$4 sm:$0xff]   ;;  %v5940_v1 = vld [vmem:[#allocation5] ss:$48 sps:$4 sm:$0xff]  }
  0x70   :  { %1913 = vmatprep.subr.bf16.mxu1 %v5938_v0  ;;  %v5941_v2 = vld [vmem:[#allocation5 + $0x64] ss:$48 sps:$4 sm:$0xff]   ;;  %v5943_v3 = vld [vmem:[#allocation5 + $0x60] ss:$48 sps:$4 sm:$0xff]   ;;  %v7099_v16 = vld [vmem:[#allocation2 + $0x4] ss:$12 sps:$4 sm:$0xff]  }
  0x71   :  { %1914 = vmatpush1.bf16.msra.mxu1 %v5940_v1  ;;  %v5944_v4 = vld [vmem:[#allocation5 + $0xc4] ss:$48 sps:$4 sm:$0xff]   ;;  %v5946_v5 = vld [vmem:[#allocation5 + $0xc0] ss:$48 sps:$4 sm:$0xff]   ;;  %1945 = vmatprep.mubr.bf16.mxu1 %v7099_v16  ;;  %v6988_v63 = vmov 0   ;;  %s6989_s5 = smov [#allocation13]  }
  0x72   :  { %1915 = vmatprep.subr.bf16.mxu1 %v5941_v2  ;;  %v5947_v6 = vld [vmem:[#allocation5 + $0x124] ss:$48 sps:$4 sm:$0xff]   ;;  %v5949_v7 = vld [vmem:[#allocation5 + $0x120] ss:$48 sps:$4 sm:$0xff]   ;;  %2117 = vmatprep.mubr.bf16.mxu0 %v7099_v16  ;;  %s5130_s21 = sshll.u32 %s6989_s5, 4  ;;  %s5131_s21 = int_to_ptr.vmem [resolvable:$true] %s5130_s21 }
  0x73   :  { %v5950_v8 = vld [vmem:[#allocation5 + $0x184] ss:$48 sps:$4 sm:$0xff]   ;;  %v5952_v9 = vld [vmem:[#allocation5 + $0x180] ss:$48 sps:$4 sm:$0xff]   ;;  %s6946_s1 = scalar_lea.vmem %s5131_s21, 768  ;;  %p6951_p7 = scmp.lt.s32.totalorder %s5131_s21, %s5131_s21 }
  0x74   :  { %v5953_v10 = vld [vmem:[#allocation5 + $0x1e4] ss:$48 sps:$4 sm:$0xff]   ;;  %v5955_v11 = vld [vmem:[#allocation5 + $0x1e0] ss:$48 sps:$4 sm:$0xff]   ;;  %p6947_p6 = scmp.ne.s32.totalorder %s5131_s21, %s6946_s1  ;;  %p6952_p8 = scmp.lt.s32.totalorder %s6946_s1, %s6946_s1 }
  0x75   :  { %1916 = vmatpush1.bf16.msra.mxu1 %v5943_v3  ;;  %v5956_v12 = vld [vmem:[#allocation5 + $0x244] ss:$48 sps:$4 sm:$0xff]   ;;  %v5958_v13 = vld [vmem:[#allocation5 + $0x240] ss:$48 sps:$4 sm:$0xff]  }
  0x76   :  { %1917 = vmatprep.subr.bf16.mxu1 %v5944_v4  ;;  %v5986_v14 = vld [vmem:[#allocation5 + $0x14] ss:$48 sps:$4 sm:$0xff]   ;;  %v5988_v15 = vld [vmem:[#allocation5 + $0x10] ss:$48 sps:$4 sm:$0xff]   ;;  %p6953_p9 = por %p6952_p8, %p6951_p7 }
  0x77   :  { %v5959_v17 = vld [vmem:[#allocation5 + $0x2a4] ss:$48 sps:$4 sm:$0xff]   ;;  %2085 = vmatprep.subr.bf16.mxu0 %v5986_v14  ;;  %v5997_v19 = vld [vmem:[#allocation5 + $0x70] ss:$48 sps:$4 sm:$0xff]  }
  0x78   :  { %2086 = vmatpush1.bf16.msra.mxu0 %v5988_v15  ;;  %v5995_v18 = vld [vmem:[#allocation5 + $0x74] ss:$48 sps:$4 sm:$0xff]   ;;  %v5961_v20 = vld [vmem:[#allocation5 + $0x2a0] ss:$48 sps:$4 sm:$0xff]   ;;  %p6954_p10 = pnand %p6953_p9, %p6947_p6 }
  0x79   :  { %1918 = vmatpush1.bf16.msra.mxu1 %v5946_v5  ;;  %v5962_v21 = vld [vmem:[#allocation5 + $0x304] ss:$48 sps:$4 sm:$0xff]   ;;  %2087 = vmatprep.subr.bf16.mxu0 %v5995_v18  ;;  %v6003_v23 = vld [vmem:[#allocation5 + $0xd0] ss:$48 sps:$4 sm:$0xff]  }
  0x7a   :  { %1919 = vmatprep.subr.bf16.mxu1 %v5947_v6  ;;  %v6001_v22 = vld [vmem:[#allocation5 + $0xd4] ss:$48 sps:$4 sm:$0xff]   ;;  %v5964_v24 = vld [vmem:[#allocation5 + $0x300] ss:$48 sps:$4 sm:$0xff]  }
  0x7b   :  { %v6007_v25 = vld [vmem:[#allocation5 + $0x134] ss:$48 sps:$4 sm:$0xff]   ;;  %v6009_v27 = vld [vmem:[#allocation5 + $0x130] ss:$48 sps:$4 sm:$0xff]  }
  0x7c   :  { %2088 = vmatpush1.bf16.msra.mxu0 %v5997_v19  ;;  %v5965_v26 = vld [vmem:[#allocation5 + $0x364] ss:$48 sps:$4 sm:$0xff]   ;;  %v5967_v29 = vld [vmem:[#allocation5 + $0x360] ss:$48 sps:$4 sm:$0xff]  }
  0x7d   :  { %1920 = vmatpush1.bf16.msra.mxu1 %v5949_v7  ;;  %2089 = vmatprep.subr.bf16.mxu0 %v6001_v22  ;;  %v6013_v28 = vld [vmem:[#allocation5 + $0x194] ss:$48 sps:$4 sm:$0xff]   ;;  %v6015_v31 = vld [vmem:[#allocation5 + $0x190] ss:$48 sps:$4 sm:$0xff]  }
  0x7e   :  { %1921 = vmatprep.subr.bf16.mxu1 %v5950_v8  ;;  %v5968_v30 = vld [vmem:[#allocation5 + $0x3c4] ss:$48 sps:$4 sm:$0xff]   ;;  %v5970_v33 = vld [vmem:[#allocation5 + $0x3c0] ss:$48 sps:$4 sm:$0xff]  }
  0x7f   :  { %v6019_v32 = vld [vmem:[#allocation5 + $0x1f4] ss:$48 sps:$4 sm:$0xff]   ;;  %v6021_v35 = vld [vmem:[#allocation5 + $0x1f0] ss:$48 sps:$4 sm:$0xff]  }
  0x80   :  { %2090 = vmatpush1.bf16.msra.mxu0 %v6003_v23  ;;  %v5971_v34 = vld [vmem:[#allocation5 + $0x424] ss:$48 sps:$4 sm:$0xff]   ;;  %v5973_v37 = vld [vmem:[#allocation5 + $0x420] ss:$48 sps:$4 sm:$0xff]  }
  0x81   :  { %1922 = vmatpush1.bf16.msra.mxu1 %v5952_v9  ;;  %2091 = vmatprep.subr.bf16.mxu0 %v6007_v25  ;;  %v6025_v36 = vld [vmem:[#allocation5 + $0x254] ss:$48 sps:$4 sm:$0xff]   ;;  %v6027_v39 = vld [vmem:[#allocation5 + $0x250] ss:$48 sps:$4 sm:$0xff]  }
  0x82   :  { %1923 = vmatprep.subr.bf16.mxu1 %v5953_v10  ;;  %v5974_v38 = vld [vmem:[#allocation5 + $0x484] ss:$48 sps:$4 sm:$0xff]   ;;  %v5976_v41 = vld [vmem:[#allocation5 + $0x480] ss:$48 sps:$4 sm:$0xff]  }
  0x83   :  { %v6031_v40 = vld [vmem:[#allocation5 + $0x2b4] ss:$48 sps:$4 sm:$0xff]   ;;  %v6033_v43 = vld [vmem:[#allocation5 + $0x2b0] ss:$48 sps:$4 sm:$0xff]  }
  0x84   :  { %2092 = vmatpush1.bf16.msra.mxu0 %v6009_v27  ;;  %v5977_v42 = vld [vmem:[#allocation5 + $0x4e4] ss:$48 sps:$4 sm:$0xff]   ;;  %v5979_v45 = vld [vmem:[#allocation5 + $0x4e0] ss:$48 sps:$4 sm:$0xff]  }
  0x85   :  { %1924 = vmatpush1.bf16.msra.mxu1 %v5955_v11  ;;  %2093 = vmatprep.subr.bf16.mxu0 %v6013_v28  ;;  %v6037_v44 = vld [vmem:[#allocation5 + $0x314] ss:$48 sps:$4 sm:$0xff]   ;;  %v6039_v47 = vld [vmem:[#allocation5 + $0x310] ss:$48 sps:$4 sm:$0xff]  }
  0x86   :  { %1925 = vmatprep.subr.bf16.mxu1 %v5956_v12  ;;  %v5980_v46 = vld [vmem:[#allocation5 + $0x544] ss:$48 sps:$4 sm:$0xff]   ;;  %v5982_v49 = vld [vmem:[#allocation5 + $0x540] ss:$48 sps:$4 sm:$0xff]  }
  0x87   :  { %v6044_v48 = vld [vmem:[#allocation5 + $0x374] ss:$48 sps:$4 sm:$0xff]   ;;  %v6046_v51 = vld [vmem:[#allocation5 + $0x370] ss:$48 sps:$4 sm:$0xff]  }
  0x88   :  { %2094 = vmatpush1.bf16.msra.mxu0 %v6015_v31  ;;  %v5983_v50 = vld [vmem:[#allocation5 + $0x5a4] ss:$48 sps:$4 sm:$0xff]   ;;  %v5985_v53 = vld [vmem:[#allocation5 + $0x5a0] ss:$48 sps:$4 sm:$0xff]  }
  0x89   :  { %1926 = vmatpush1.bf16.msra.mxu1 %v5958_v13  ;;  %2095 = vmatprep.subr.bf16.mxu0 %v6019_v32  ;;  %v6050_v52 = vld [vmem:[#allocation5 + $0x3d4] ss:$48 sps:$4 sm:$0xff]   ;;  %v6052_v56 = vld [vmem:[#allocation5 + $0x3d0] ss:$48 sps:$4 sm:$0xff]  }
  0x8a   :  { %1927 = vmatprep.subr.bf16.mxu1 %v5959_v17  ;;  %v5993_v54 = vld [vmem:[#allocation5 + $0x604] ss:$48 sps:$4 sm:$0xff]   ;;  %v5991_v58 = vld [vmem:[#allocation5 + $0x600] ss:$48 sps:$4 sm:$0xff]  }
  0x8b   :  { %v7103_v55 = vld [vmem:[#allocation2] ss:$12 sps:$4 sm:$0xff]   ;;  %v6058_v60 = vld [vmem:[#allocation5 + $0x430] ss:$48 sps:$4 sm:$0xff]  }
  0x8c   :  { %2096 = vmatpush1.bf16.msra.mxu0 %v6021_v35  ;;  %v6056_v57 = vld [vmem:[#allocation5 + $0x434] ss:$48 sps:$4 sm:$0xff]   ;;  %v5998_v62 = vld [vmem:[#allocation5 + $0x660] ss:$48 sps:$4 sm:$0xff]  }
  0x8d   :  { %1928 = vmatpush1.bf16.msra.mxu1 %v5961_v20  ;;  %2097 = vmatprep.subr.bf16.mxu0 %v6025_v36  ;;  %v6000_v59 = vld [vmem:[#allocation5 + $0x664] ss:$48 sps:$4 sm:$0xff]   ;;  %v6064_v1 = vld [vmem:[#allocation5 + $0x490] ss:$48 sps:$4 sm:$0xff]  }
  0x8e   :  { %1929 = vmatprep.subr.bf16.mxu1 %v5962_v21  ;;  %v6062_v61 = vld [vmem:[#allocation5 + $0x494] ss:$48 sps:$4 sm:$0xff]   ;;  %v6004_v3 = vld [vmem:[#allocation5 + $0x6c0] ss:$48 sps:$4 sm:$0xff]  }
  0x8f   :  { %v6006_v0 = vld [vmem:[#allocation5 + $0x6c4] ss:$48 sps:$4 sm:$0xff]   ;;  %v6070_v5 = vld [vmem:[#allocation5 + $0x4f0] ss:$48 sps:$4 sm:$0xff]  }
  0x90   :  { %2098 = vmatpush1.bf16.msra.mxu0 %v6027_v39  ;;  %v6068_v2 = vld [vmem:[#allocation5 + $0x4f4] ss:$48 sps:$4 sm:$0xff]   ;;  %v6010_v7 = vld [vmem:[#allocation5 + $0x720] ss:$48 sps:$4 sm:$0xff]  }
  0x91   :  { %1930 = vmatpush1.bf16.msra.mxu1 %v5964_v24  ;;  %2099 = vmatprep.subr.bf16.mxu0 %v6031_v40  ;;  %v6012_v4 = vld [vmem:[#allocation5 + $0x724] ss:$48 sps:$4 sm:$0xff]   ;;  %v6076_v9 = vld [vmem:[#allocation5 + $0x550] ss:$48 sps:$4 sm:$0xff]  }
  0x92   :  { %1931 = vmatprep.subr.bf16.mxu1 %v5965_v26  ;;  %v6074_v6 = vld [vmem:[#allocation5 + $0x554] ss:$48 sps:$4 sm:$0xff]   ;;  %v6016_v11 = vld [vmem:[#allocation5 + $0x780] ss:$48 sps:$4 sm:$0xff]   ;;  %v6043_v26 = vld [vmem:[#allocation5 + $0xc] ss:$48 sps:$4 sm:$0xff]  }
  0x93   :  { %v6018_v8 = vld [vmem:[#allocation5 + $0x784] ss:$48 sps:$4 sm:$0xff]   ;;  %v6082_v13 = vld [vmem:[#allocation5 + $0x5b0] ss:$48 sps:$4 sm:$0xff]  }
  0x94   :  { %2100 = vmatpush1.bf16.msra.mxu0 %v6033_v43  ;;  %v6080_v10 = vld [vmem:[#allocation5 + $0x5b4] ss:$48 sps:$4 sm:$0xff]   ;;  %v6022_v15 = vld [vmem:[#allocation5 + $0x7e0] ss:$48 sps:$4 sm:$0xff]  }
  0x95   :  { %1932 = vmatpush1.bf16.msra.mxu1 %v5967_v29  ;;  %2101 = vmatprep.subr.bf16.mxu0 %v6037_v44  ;;  %v6024_v12 = vld [vmem:[#allocation5 + $0x7e4] ss:$48 sps:$4 sm:$0xff]   ;;  %v6086_v18 = vld [vmem:[#allocation5 + $0x610] ss:$48 sps:$4 sm:$0xff]   ;;  %v6041_v29 = vld [vmem:[#allocation5 + $0x8] ss:$48 sps:$4 sm:$0xff]  }
  0x96   :  { %1933 = vmatprep.subr.bf16.mxu1 %v5968_v30  ;;  %v6088_v14 = vld [vmem:[#allocation5 + $0x614] ss:$48 sps:$4 sm:$0xff]   ;;  %v6028_v20 = vld [vmem:[#allocation5 + $0x840] ss:$48 sps:$4 sm:$0xff]   ;;  %v6049_v30 = vld [vmem:[#allocation5 + $0x6c] ss:$48 sps:$4 sm:$0xff]  }
  0x97   :  { %v6030_v17 = vld [vmem:[#allocation5 + $0x844] ss:$48 sps:$4 sm:$0xff]   ;;  %v6092_v22 = vld [vmem:[#allocation5 + $0x670] ss:$48 sps:$4 sm:$0xff]  }
  0x98   :  { %2102 = vmatpush1.bf16.msra.mxu0 %v6039_v47  ;;  %v6094_v19 = vld [vmem:[#allocation5 + $0x674] ss:$48 sps:$4 sm:$0xff]   ;;  %v6034_v24 = vld [vmem:[#allocation5 + $0x8a0] ss:$48 sps:$4 sm:$0xff]  }
  0x99   :  { %1934 = vmatpush1.bf16.msra.mxu1 %v5970_v33  ;;  %2103 = vmatprep.subr.bf16.mxu0 %v6044_v48  ;;  %v6036_v21 = vld [vmem:[#allocation5 + $0x8a4] ss:$48 sps:$4 sm:$0xff]   ;;  %v7109_v25 = vld [vmem:[#allocation2 + $0x8] ss:$12 sps:$4 sm:$0xff]   ;;  %v6047_v33 = vld [vmem:[#allocation5 + $0x68] ss:$48 sps:$4 sm:$0xff]  }
  0x9a   :  { %1935 = vmatprep.subr.bf16.mxu1 %v5971_v34  ;;  %v6100_v23 = vld [vmem:[#allocation5 + $0x6d4] ss:$48 sps:$4 sm:$0xff]   ;;  %v6098_v27 = vld [vmem:[#allocation5 + $0x6d0] ss:$48 sps:$4 sm:$0xff]   ;;  %v6055_v34 = vld [vmem:[#allocation5 + $0xcc] ss:$48 sps:$4 sm:$0xff]  }
  0x9b   :  { %v6106_v28 = vld [vmem:[#allocation5 + $0x734] ss:$48 sps:$4 sm:$0xff]   ;;  %v6104_v31 = vld [vmem:[#allocation5 + $0x730] ss:$48 sps:$4 sm:$0xff]  }
  0x9c   :  { %2104 = vmatpush1.bf16.msra.mxu0 %v6046_v51  ;;  %v6112_v32 = vld [vmem:[#allocation5 + $0x794] ss:$48 sps:$4 sm:$0xff]   ;;  %v6110_v35 = vld [vmem:[#allocation5 + $0x790] ss:$48 sps:$4 sm:$0xff]  }
  0x9d   :  { %1936 = vmatpush1.bf16.msra.mxu1 %v5973_v37  ;;  %2105 = vmatprep.subr.bf16.mxu0 %v6050_v52  ;;  %v6118_v36 = vld [vmem:[#allocation5 + $0x7f4] ss:$48 sps:$4 sm:$0xff]   ;;  %v6053_v37 = vld [vmem:[#allocation5 + $0xc8] ss:$48 sps:$4 sm:$0xff]   ;;  %v6116_v39 = vld [vmem:[#allocation5 + $0x7f0] ss:$48 sps:$4 sm:$0xff]  }
  0x9e   :  { %1937 = vmatprep.subr.bf16.mxu1 %v5974_v38  ;;  %v6061_v38 = vld [vmem:[#allocation5 + $0x12c] ss:$48 sps:$4 sm:$0xff]   ;;  %v6124_v40 = vld [vmem:[#allocation5 + $0x854] ss:$48 sps:$4 sm:$0xff]   ;;  %v6122_v43 = vld [vmem:[#allocation5 + $0x850] ss:$48 sps:$4 sm:$0xff]  }
  0x9f   :  { %v6130_v44 = vld [vmem:[#allocation5 + $0x8b4] ss:$48 sps:$4 sm:$0xff]   ;;  %v6128_v47 = vld [vmem:[#allocation5 + $0x8b0] ss:$48 sps:$4 sm:$0xff]  }
  0xa0   :  { %2106 = vmatpush1.bf16.msra.mxu0 %v6052_v56  ;;  %v6136_v48 = vld [vmem:[#allocation5 + $0x24] ss:$48 sps:$4 sm:$0xff]   ;;  %v6134_v51 = vld [vmem:[#allocation5 + $0x20] ss:$48 sps:$4 sm:$0xff]  }
  0xa1   :  { %1938 = vmatpush1.bf16.msra.mxu1 %v5976_v41  ;;  %2107 = vmatprep.subr.bf16.mxu0 %v6056_v57  ;;  %v6059_v41 = vld [vmem:[#allocation5 + $0x128] ss:$48 sps:$4 sm:$0xff]   ;;  %v6142_v52 = vld [vmem:[#allocation5 + $0x84] ss:$48 sps:$4 sm:$0xff]   ;;  %v6140_v56 = vld [vmem:[#allocation5 + $0x80] ss:$48 sps:$4 sm:$0xff]  }
  0xa2   :  { %1939 = vmatprep.subr.bf16.mxu1 %v5977_v42  ;;  %v6067_v42 = vld [vmem:[#allocation5 + $0x18c] ss:$48 sps:$4 sm:$0xff]   ;;  %v6148_v57 = vld [vmem:[#allocation5 + $0xe4] ss:$48 sps:$4 sm:$0xff]  }
  0xa4   :  { %2108 = vmatpush1.bf16.msra.mxu0 %v6058_v60  ;;  %v6146_v60 = vld [vmem:[#allocation5 + $0xe0] ss:$48 sps:$4 sm:$0xff]  }
  0xa5   :  { %1940 = vmatpush1.bf16.msra.mxu1 %v5979_v45  ;;  %2109 = vmatprep.subr.bf16.mxu0 %v6062_v61  ;;  %v6065_v45 = vld [vmem:[#allocation5 + $0x188] ss:$48 sps:$4 sm:$0xff]   ;;  %v6154_v61 = vld [vmem:[#allocation5 + $0x144] ss:$48 sps:$4 sm:$0xff]  }
  0xa6   :  { %1941 = vmatprep.subr.bf16.mxu1 %v5980_v46  ;;  %v6073_v46 = vld [vmem:[#allocation5 + $0x1ec] ss:$48 sps:$4 sm:$0xff]  }
  0xa8   :  { %2110 = vmatpush1.bf16.msra.mxu0 %v6064_v1  ;;  %v6152_v1 = vld [vmem:[#allocation5 + $0x140] ss:$48 sps:$4 sm:$0xff]  }
  0xa9   :  { %1942 = vmatpush1.bf16.msra.mxu1 %v5982_v49  ;;  %2111 = vmatprep.subr.bf16.mxu0 %v6068_v2  ;;  %v6071_v49 = vld [vmem:[#allocation5 + $0x1e8] ss:$48 sps:$4 sm:$0xff]   ;;  %v6160_v2 = vld [vmem:[#allocation5 + $0x1a4] ss:$48 sps:$4 sm:$0xff]  }
  0xaa   :  { %1943 = vmatprep.subr.bf16.mxu1 %v5983_v50  ;;  %v6079_v50 = vld [vmem:[#allocation5 + $0x24c] ss:$48 sps:$4 sm:$0xff]  }
  0xac   :  { %2112 = vmatpush1.bf16.msra.mxu0 %v6070_v5  ;;  %v6166_v5 = vld [vmem:[#allocation5 + $0x204] ss:$48 sps:$4 sm:$0xff]  }
  0xad   :  { %1944 = vmatpush1.bf16.msra.mxu1 %v5985_v53  ;;  %2113 = vmatprep.subr.bf16.mxu0 %v6074_v6  ;;  %v6077_v53 = vld [vmem:[#allocation5 + $0x248] ss:$48 sps:$4 sm:$0xff]  }
  0xae   :  { %1956 = vmatprep.subr.bf16.mxu1 %v5993_v54  ;;  %v6085_v54 = vld [vmem:[#allocation5 + $0x2ac] ss:$48 sps:$4 sm:$0xff]   ;;  %v6101_v6 = vld [vmem:[#allocation5 + $0x3c8] ss:$48 sps:$4 sm:$0xff]  }
  0xb0   :  { %1946 = vmatmul.mubr.bf16.vlgmr.msra.gmra.mrb[0].mxu1 %v7103_v55  ;;  %2114 = vmatpush1.bf16.msra.mxu0 %v6076_v9  ;;  %v6172_v9 = vld [vmem:[#allocation5 + $0x264] ss:$48 sps:$4 sm:$0xff]  }
  0xb1   :  { %1957 = vmatpush1.bf16.msra.mxu1 %v5991_v58  ;;  %1988 = vmatprep.mubr.bf16.mxu1 %v6988_v63  ;;  %v6083_v58 = vld [vmem:[#allocation5 + $0x2a8] ss:$48 sps:$4 sm:$0xff]  }
  0xb2   :  { %1958 = vmatprep.subr.bf16.mxu1 %v6000_v59  ;;  %2115 = vmatprep.subr.bf16.mxu0 %v6080_v10  ;;  %v6091_v59 = vld [vmem:[#allocation5 + $0x30c] ss:$48 sps:$4 sm:$0xff]   ;;  %v6107_v10 = vld [vmem:[#allocation5 + $0x428] ss:$48 sps:$4 sm:$0xff]  }
  0xb4   :  { %2116 = vmatpush1.bf16.msra.mxu0 %v6082_v13  ;;  %v6178_v13 = vld [vmem:[#allocation5 + $0x2c4] ss:$48 sps:$4 sm:$0xff]  }
  0xb5   :  { %1959 = vmatpush1.bf16.msra.mxu1 %v5998_v62  ;;  %2128 = vmatprep.subr.bf16.mxu0 %v6088_v14  ;;  %v6089_v62 = vld [vmem:[#allocation5 + $0x308] ss:$48 sps:$4 sm:$0xff]  }
  0xb6   :  { %1960 = vmatprep.subr.bf16.mxu1 %v6006_v0  ;;  %v6097_v0 = vld [vmem:[#allocation5 + $0x36c] ss:$48 sps:$4 sm:$0xff]   ;;  %v6113_v14 = vld [vmem:[#allocation5 + $0x488] ss:$48 sps:$4 sm:$0xff]  }
  0xb7   :  { %2118 = vmatmul.mubr.bf16.vlgmr.msra.gmra.mrb[0].mxu0 %v7103_v55 }
  0xb8   :  { %2129 = vmatpush1.bf16.msra.mxu0 %v6086_v18  ;;  %2160 = vmatprep.mubr.bf16.mxu0 %v6988_v63  ;;  %v6184_v18 = vld [vmem:[#allocation5 + $0x324] ss:$48 sps:$4 sm:$0xff]  }
  0xb9   :  { %1961 = vmatpush1.bf16.msra.mxu1 %v6004_v3  ;;  %2130 = vmatprep.subr.bf16.mxu0 %v6094_v19  ;;  %v6103_v3 = vld [vmem:[#allocation5 + $0x3cc] ss:$48 sps:$4 sm:$0xff]   ;;  %v6119_v19 = vld [vmem:[#allocation5 + $0x4e8] ss:$48 sps:$4 sm:$0xff]  }
  0xba   :  { %1962 = vmatprep.subr.bf16.mxu1 %v6012_v4  ;;  %v6158_v4 = vld [vmem:[#allocation5 + $0x1a0] ss:$48 sps:$4 sm:$0xff]  }
  0xbc   :  { %2131 = vmatpush1.bf16.msra.mxu0 %v6092_v22  ;;  %v6190_v22 = vld [vmem:[#allocation5 + $0x384] ss:$48 sps:$4 sm:$0xff]  }
  0xbd   :  { %1963 = vmatpush1.bf16.msra.mxu1 %v6010_v7  ;;  %2132 = vmatprep.subr.bf16.mxu0 %v6100_v23  ;;  %v6109_v7 = vld [vmem:[#allocation5 + $0x42c] ss:$48 sps:$4 sm:$0xff]   ;;  %v6125_v23 = vld [vmem:[#allocation5 + $0x548] ss:$48 sps:$4 sm:$0xff]  }
  0xbe   :  { %1964 = vmatprep.subr.bf16.mxu1 %v6018_v8  ;;  %v6164_v8 = vld [vmem:[#allocation5 + $0x200] ss:$48 sps:$4 sm:$0xff]  }
  0xc0   :  { %2133 = vmatpush1.bf16.msra.mxu0 %v6098_v27  ;;  %v6196_v27 = vld [vmem:[#allocation5 + $0x3e4] ss:$48 sps:$4 sm:$0xff]  }
  0xc1   :  { %1965 = vmatpush1.bf16.msra.mxu1 %v6016_v11  ;;  %2134 = vmatprep.subr.bf16.mxu0 %v6106_v28  ;;  %v6115_v11 = vld [vmem:[#allocation5 + $0x48c] ss:$48 sps:$4 sm:$0xff]   ;;  %v6131_v28 = vld [vmem:[#allocation5 + $0x5a8] ss:$48 sps:$4 sm:$0xff]  }
  0xc2   :  { %1966 = vmatprep.subr.bf16.mxu1 %v6024_v12  ;;  %v6170_v12 = vld [vmem:[#allocation5 + $0x260] ss:$48 sps:$4 sm:$0xff]  }
  0xc4   :  { %2135 = vmatpush1.bf16.msra.mxu0 %v6104_v31  ;;  %v6202_v31 = vld [vmem:[#allocation5 + $0x444] ss:$48 sps:$4 sm:$0xff]  }
  0xc5   :  { %1967 = vmatpush1.bf16.msra.mxu1 %v6022_v15  ;;  %2136 = vmatprep.subr.bf16.mxu0 %v6112_v32  ;;  %v6121_v15 = vld [vmem:[#allocation5 + $0x4ec] ss:$48 sps:$4 sm:$0xff]   ;;  %v6137_v32 = vld [vmem:[#allocation5 + $0x608] ss:$48 sps:$4 sm:$0xff]  }
  0xc6   :  { %1968 = vmatprep.subr.bf16.mxu1 %v6030_v17  ;;  %v6176_v17 = vld [vmem:[#allocation5 + $0x2c0] ss:$48 sps:$4 sm:$0xff]  }
  0xc8   :  { %2137 = vmatpush1.bf16.msra.mxu0 %v6110_v35  ;;  %v6208_v35 = vld [vmem:[#allocation5 + $0x4a4] ss:$48 sps:$4 sm:$0xff]  }
  0xc9   :  { %1969 = vmatpush1.bf16.msra.mxu1 %v6028_v20  ;;  %2138 = vmatprep.subr.bf16.mxu0 %v6118_v36  ;;  %v6127_v20 = vld [vmem:[#allocation5 + $0x54c] ss:$48 sps:$4 sm:$0xff]   ;;  %v6143_v36 = vld [vmem:[#allocation5 + $0x668] ss:$48 sps:$4 sm:$0xff]  }
  0xca   :  { %1970 = vmatprep.subr.bf16.mxu1 %v6036_v21  ;;  %v6182_v21 = vld [vmem:[#allocation5 + $0x320] ss:$48 sps:$4 sm:$0xff]  }
  0xcc   :  { %2139 = vmatpush1.bf16.msra.mxu0 %v6116_v39  ;;  %v6214_v39 = vld [vmem:[#allocation5 + $0x504] ss:$48 sps:$4 sm:$0xff]  }
  0xcd   :  { %1971 = vmatpush1.bf16.msra.mxu1 %v6034_v24  ;;  %2140 = vmatprep.subr.bf16.mxu0 %v6124_v40  ;;  %v6133_v24 = vld [vmem:[#allocation5 + $0x5ac] ss:$48 sps:$4 sm:$0xff]   ;;  %v6149_v40 = vld [vmem:[#allocation5 + $0x6c8] ss:$48 sps:$4 sm:$0xff]  }
  0xce   :  { %1999 = vmatprep.subr.bf16.mxu1 %v6043_v26  ;;  %v6188_v26 = vld [vmem:[#allocation5 + $0x380] ss:$48 sps:$4 sm:$0xff]  }
  0xd0   :  { %1989 = vmatmul.mubr.bf16.vlgmr.msra.gmra.mrb[0].mxu1 %v7109_v25  ;;  %2141 = vmatpush1.bf16.msra.mxu0 %v6122_v43  ;;  %v6220_v43 = vld [vmem:[#allocation5 + $0x564] ss:$48 sps:$4 sm:$0xff]  }
  0xd1   :  { %2000 = vmatpush1.bf16.msra.mxu1 %v6041_v29  ;;  %2031 = vmatprep.mubr.bf16.mxu1 %v7099_v16  ;;  %v6139_v29 = vld [vmem:[#allocation5 + $0x60c] ss:$48 sps:$4 sm:$0xff]  }
  0xd2   :  { %2001 = vmatprep.subr.bf16.mxu1 %v6049_v30  ;;  %2142 = vmatprep.subr.bf16.mxu0 %v6130_v44  ;;  %v6194_v30 = vld [vmem:[#allocation5 + $0x3e0] ss:$48 sps:$4 sm:$0xff]   ;;  %v6155_v44 = vld [vmem:[#allocation5 + $0x728] ss:$48 sps:$4 sm:$0xff]  }
  0xd4   :  { %2143 = vmatpush1.bf16.msra.mxu0 %v6128_v47  ;;  %v6226_v47 = vld [vmem:[#allocation5 + $0x5c4] ss:$48 sps:$4 sm:$0xff]  }
  0xd5   :  { %2002 = vmatpush1.bf16.msra.mxu1 %v6047_v33  ;;  %2257 = vmatprep.subr.bf16.mxu0 %v6136_v48  ;;  %v6145_v33 = vld [vmem:[#allocation5 + $0x66c] ss:$48 sps:$4 sm:$0xff]   ;;  %v6161_v48 = vld [vmem:[#allocation5 + $0x788] ss:$48 sps:$4 sm:$0xff]  }
  0xd6   :  { %2003 = vmatprep.subr.bf16.mxu1 %v6055_v34  ;;  %v6200_v34 = vld [vmem:[#allocation5 + $0x440] ss:$48 sps:$4 sm:$0xff]  }
  0xd7   :  { %2161 = vmatmul.mubr.bf16.vlgmr.msra.gmra.mrb[0].mxu0 %v7109_v25 }
  0xd8   :  { %2258 = vmatpush1.bf16.msra.mxu0 %v6134_v51  ;;  %2289 = vmatprep.mubr.bf16.mxu0 %v7099_v16  ;;  %v6095_v16 = vld [vmem:[#allocation5 + $0x368] ss:$48 sps:$4 sm:$0xff]   ;;  %v6232_v51 = vld [vmem:[#allocation5 + $0x624] ss:$48 sps:$4 sm:$0xff]  }
  0xd9   :  { %2004 = vmatpush1.bf16.msra.mxu1 %v6053_v37  ;;  %2259 = vmatprep.subr.bf16.mxu0 %v6142_v52  ;;  %v6151_v37 = vld [vmem:[#allocation5 + $0x6cc] ss:$48 sps:$4 sm:$0xff]   ;;  %v6167_v52 = vld [vmem:[#allocation5 + $0x7e8] ss:$48 sps:$4 sm:$0xff]  }
  0xda   :  { %2005 = vmatprep.subr.bf16.mxu1 %v6061_v38  ;;  %v6206_v38 = vld [vmem:[#allocation5 + $0x4a0] ss:$48 sps:$4 sm:$0xff]  }
  0xdc   :  { %2260 = vmatpush1.bf16.msra.mxu0 %v6140_v56  ;;  %v6238_v56 = vld [vmem:[#allocation5 + $0x684] ss:$48 sps:$4 sm:$0xff]  }
  0xdd   :  { %2006 = vmatpush1.bf16.msra.mxu1 %v6059_v41  ;;  %2261 = vmatprep.subr.bf16.mxu0 %v6148_v57  ;;  %v6157_v41 = vld [vmem:[#allocation5 + $0x72c] ss:$48 sps:$4 sm:$0xff]   ;;  %v6173_v57 = vld [vmem:[#allocation5 + $0x848] ss:$48 sps:$4 sm:$0xff]  }
  0xde   :  { %2007 = vmatprep.subr.bf16.mxu1 %v6067_v42  ;;  %v6212_v42 = vld [vmem:[#allocation5 + $0x500] ss:$48 sps:$4 sm:$0xff]  }
  0xe0   :  { %2262 = vmatpush1.bf16.msra.mxu0 %v6146_v60  ;;  %v6244_v60 = vld [vmem:[#allocation5 + $0x6e4] ss:$48 sps:$4 sm:$0xff]  }
  0xe1   :  { %2008 = vmatpush1.bf16.msra.mxu1 %v6065_v45  ;;  %2263 = vmatprep.subr.bf16.mxu0 %v6154_v61  ;;  %v6163_v45 = vld [vmem:[#allocation5 + $0x78c] ss:$48 sps:$4 sm:$0xff]   ;;  %v6179_v61 = vld [vmem:[#allocation5 + $0x8a8] ss:$48 sps:$4 sm:$0xff]  }
  0xe2   :  { %2009 = vmatprep.subr.bf16.mxu1 %v6073_v46  ;;  %v6218_v46 = vld [vmem:[#allocation5 + $0x560] ss:$48 sps:$4 sm:$0xff]  }
  0xe4   :  { %2264 = vmatpush1.bf16.msra.mxu0 %v6152_v1  ;;  %v6185_v1 = vld [vmem:[#allocation5 + $0x18] ss:$48 sps:$4 sm:$0xff]  }
  0xe5   :  { %2010 = vmatpush1.bf16.msra.mxu1 %v6071_v49  ;;  %2265 = vmatprep.subr.bf16.mxu0 %v6160_v2  ;;  %v6169_v49 = vld [vmem:[#allocation5 + $0x7ec] ss:$48 sps:$4 sm:$0xff]   ;;  %v6250_v2 = vld [vmem:[#allocation5 + $0x744] ss:$48 sps:$4 sm:$0xff]  }
  0xe6   :  { %2011 = vmatprep.subr.bf16.mxu1 %v6079_v50  ;;  %v6224_v50 = vld [vmem:[#allocation5 + $0x5c0] ss:$48 sps:$4 sm:$0xff]  }
  0xe8   :  { %2266 = vmatpush1.bf16.msra.mxu0 %v6158_v4  ;;  %v6256_v4 = vld [vmem:[#allocation5 + $0x7a4] ss:$48 sps:$4 sm:$0xff]  }
  0xe9   :  { %2012 = vmatpush1.bf16.msra.mxu1 %v6077_v53  ;;  %2267 = vmatprep.subr.bf16.mxu0 %v6166_v5  ;;  %v6175_v53 = vld [vmem:[#allocation5 + $0x84c] ss:$48 sps:$4 sm:$0xff]  }
  0xea   :  { %2013 = vmatprep.subr.bf16.mxu1 %v6085_v54  ;;  %v6230_v54 = vld [vmem:[#allocation5 + $0x620] ss:$48 sps:$4 sm:$0xff]   ;;  %v7120_v5 = vld [vmem:[#allocation2 + $0x4] ss:$12 sps:$4 sm:$0xff]  }
  0xec   :  { %2268 = vmatpush1.bf16.msra.mxu0 %v6164_v8  ;;  %v6262_v8 = vld [vmem:[#allocation5 + $0x804] ss:$48 sps:$4 sm:$0xff]  }
  0xed   :  { %2014 = vmatpush1.bf16.msra.mxu1 %v6083_v58  ;;  %2269 = vmatprep.subr.bf16.mxu0 %v6172_v9  ;;  %v6181_v58 = vld [vmem:[#allocation5 + $0x8ac] ss:$48 sps:$4 sm:$0xff]   ;;  %v6197_v9 = vld [vmem:[#allocation5 + $0xd8] ss:$48 sps:$4 sm:$0xff]  }
  0xee   :  { %2015 = vmatprep.subr.bf16.mxu1 %v6091_v59  ;;  %v6236_v59 = vld [vmem:[#allocation5 + $0x680] ss:$48 sps:$4 sm:$0xff]  }
  0xf0   :  { %2270 = vmatpush1.bf16.msra.mxu0 %v6170_v12  ;;  %v6260_v12 = vld [vmem:[#allocation5 + $0x800] ss:$48 sps:$4 sm:$0xff]  }
  0xf1   :  { %2016 = vmatpush1.bf16.msra.mxu1 %v6089_v62  ;;  %2271 = vmatprep.subr.bf16.mxu0 %v6178_v13  ;;  %v6187_v62 = vld [vmem:[#allocation5 + $0x1c] ss:$48 sps:$4 sm:$0xff]   ;;  %v6268_v13 = vld [vmem:[#allocation5 + $0x864] ss:$48 sps:$4 sm:$0xff]  }
  0xf2   :  { %2017 = vmatprep.subr.bf16.mxu1 %v6097_v0  ;;  %v6242_v0 = vld [vmem:[#allocation5 + $0x6e0] ss:$48 sps:$4 sm:$0xff]  }
  0xf4   :  { %2272 = vmatpush1.bf16.msra.mxu0 %v6176_v17  ;;  %v6274_v17 = vld [vmem:[#allocation5 + $0x8c4] ss:$48 sps:$4 sm:$0xff]  }
  0xf5   :  { %2018 = vmatpush1.bf16.msra.mxu1 %v6095_v16  ;;  %2273 = vmatprep.subr.bf16.mxu0 %v6184_v18  ;;  %v6193_v16 = vld [vmem:[#allocation5 + $0x7c] ss:$48 sps:$4 sm:$0xff]   ;;  %v6209_v18 = vld [vmem:[#allocation5 + $0x198] ss:$48 sps:$4 sm:$0xff]  }
  0xf6   :  { %2019 = vmatprep.subr.bf16.mxu1 %v6103_v3  ;;  %v6191_v3 = vld [vmem:[#allocation5 + $0x78] ss:$48 sps:$4 sm:$0xff]  }
  0xf8   :  { %2274 = vmatpush1.bf16.msra.mxu0 %v6182_v21  ;;  %v6292_v21 = vld [vmem:[#allocation8 + $0x4] ss:$12 sps:$4 sm:$0xff]  }
  0xf9   :  { %2020 = vmatpush1.bf16.msra.mxu1 %v6101_v6  ;;  %2275 = vmatprep.subr.bf16.mxu0 %v6190_v22  ;;  %v6199_v6 = vld [vmem:[#allocation5 + $0xdc] ss:$48 sps:$4 sm:$0xff]   ;;  %v6215_v22 = vld [vmem:[#allocation5 + $0x1f8] ss:$48 sps:$4 sm:$0xff]  }
  0xfa   :  { %2021 = vmatprep.subr.bf16.mxu1 %v6109_v7  ;;  %v6254_v7 = vld [vmem:[#allocation5 + $0x7a0] ss:$48 sps:$4 sm:$0xff]  }
  0xfc   :  { %2276 = vmatpush1.bf16.msra.mxu0 %v6188_v26  ;;  %v6298_v26 = vld [vmem:[#allocation8 + $0x1c] ss:$12 sps:$4 sm:$0xff]  }
  0xfd   :  { %2022 = vmatpush1.bf16.msra.mxu1 %v6107_v10  ;;  %2277 = vmatprep.subr.bf16.mxu0 %v6196_v27  ;;  %v6205_v10 = vld [vmem:[#allocation5 + $0x13c] ss:$48 sps:$4 sm:$0xff]   ;;  %v6221_v27 = vld [vmem:[#allocation5 + $0x258] ss:$48 sps:$4 sm:$0xff]  }
  0xfe   :  { %2023 = vmatprep.subr.bf16.mxu1 %v6115_v11  ;;  %v6203_v11 = vld [vmem:[#allocation5 + $0x138] ss:$48 sps:$4 sm:$0xff]  }
 0x100   :  { %2278 = vmatpush1.bf16.msra.mxu0 %v6194_v30  ;;  %v6304_v30 = vld [vmem:[#allocation8 + $0x34] ss:$12 sps:$4 sm:$0xff]  }
 0x101   :  { %2024 = vmatpush1.bf16.msra.mxu1 %v6113_v14  ;;  %2279 = vmatprep.subr.bf16.mxu0 %v6202_v31  ;;  %v6211_v14 = vld [vmem:[#allocation5 + $0x19c] ss:$48 sps:$4 sm:$0xff]   ;;  %v6227_v31 = vld [vmem:[#allocation5 + $0x2b8] ss:$48 sps:$4 sm:$0xff]  }
 0x102   :  { %2025 = vmatprep.subr.bf16.mxu1 %v6121_v15  ;;  %v6266_v15 = vld [vmem:[#allocation5 + $0x860] ss:$48 sps:$4 sm:$0xff]  }
 0x104   :  { %2280 = vmatpush1.bf16.msra.mxu0 %v6200_v34  ;;  %v6310_v34 = vld [vmem:[#allocation8 + $0x4c] ss:$12 sps:$4 sm:$0xff]  }
 0x105   :  { %2026 = vmatpush1.bf16.msra.mxu1 %v6119_v19  ;;  %2281 = vmatprep.subr.bf16.mxu0 %v6208_v35  ;;  %v6217_v19 = vld [vmem:[#allocation5 + $0x1fc] ss:$48 sps:$4 sm:$0xff]   ;;  %v6233_v35 = vld [vmem:[#allocation5 + $0x318] ss:$48 sps:$4 sm:$0xff]  }
 0x106   :  { %2027 = vmatprep.subr.bf16.mxu1 %v6127_v20  ;;  %v6272_v20 = vld [vmem:[#allocation5 + $0x8c0] ss:$48 sps:$4 sm:$0xff]  }
 0x108   :  { %2282 = vmatpush1.bf16.msra.mxu0 %v6206_v38  ;;  %v6316_v38 = vld [vmem:[#allocation8 + $0x64] ss:$12 sps:$4 sm:$0xff]  }
 0x109   :  { %2028 = vmatpush1.bf16.msra.mxu1 %v6125_v23  ;;  %2283 = vmatprep.subr.bf16.mxu0 %v6214_v39  ;;  %v6223_v23 = vld [vmem:[#allocation5 + $0x25c] ss:$48 sps:$4 sm:$0xff]   ;;  %v6239_v39 = vld [vmem:[#allocation5 + $0x378] ss:$48 sps:$4 sm:$0xff]  }
 0x10a   :  { %2029 = vmatprep.subr.bf16.mxu1 %v6133_v24  ;;  %v6290_v24 = vld [vmem:[#allocation8] ss:$12 sps:$4 sm:$0xff]  }
 0x10c   :  { %2284 = vmatpush1.bf16.msra.mxu0 %v6212_v42  ;;  %v6245_v42 = vld [vmem:[#allocation5 + $0x3d8] ss:$48 sps:$4 sm:$0xff]  }
 0x10d   :  { %2030 = vmatpush1.bf16.msra.mxu1 %v6131_v28  ;;  %2285 = vmatprep.subr.bf16.mxu0 %v6220_v43  ;;  %v6229_v28 = vld [vmem:[#allocation5 + $0x2bc] ss:$48 sps:$4 sm:$0xff]  }
 0x10e   :  { %2042 = vmatprep.subr.bf16.mxu1 %v6139_v29  ;;  %v6296_v29 = vld [vmem:[#allocation8 + $0x18] ss:$12 sps:$4 sm:$0xff]   ;;  %v6253_v43 = vld [vmem:[#allocation5 + $0x43c] ss:$48 sps:$4 sm:$0xff]  }
 0x110   :  { %2032 = vmatmul.mubr.bf16.vlgmr.msra.gmra.mrb[4].mxu1 %v7103_v55  ;;  %2286 = vmatpush1.bf16.msra.mxu0 %v6218_v46  ;;  %v6251_v46 = vld [vmem:[#allocation5 + $0x438] ss:$48 sps:$4 sm:$0xff]  }
 0x111   :  { %2043 = vmatpush1.bf16.msra.mxu1 %v6137_v32  ;;  %2074 = vmatprep.mubr.bf16.mxu1 %v6988_v63  ;;  %v6235_v32 = vld [vmem:[#allocation5 + $0x31c] ss:$48 sps:$4 sm:$0xff]  }
 0x112   :  { %2044 = vmatprep.subr.bf16.mxu1 %v6145_v33  ;;  %2287 = vmatprep.subr.bf16.mxu0 %v6226_v47  ;;  %v6302_v33 = vld [vmem:[#allocation8 + $0x30] ss:$12 sps:$4 sm:$0xff]  }
 0x113   :  { %v6259_v47 = vld [vmem:[#allocation5 + $0x49c] ss:$48 sps:$4 sm:$0xff]  }
 0x114   :  { %2288 = vmatpush1.bf16.msra.mxu0 %v6224_v50  ;;  %v6257_v50 = vld [vmem:[#allocation5 + $0x498] ss:$48 sps:$4 sm:$0xff]  }
 0x115   :  { %2045 = vmatpush1.bf16.msra.mxu1 %v6143_v36  ;;  %2300 = vmatprep.subr.bf16.mxu0 %v6232_v51  ;;  %v6241_v36 = vld [vmem:[#allocation5 + $0x37c] ss:$48 sps:$4 sm:$0xff]  }
 0x116   :  { %2046 = vmatprep.subr.bf16.mxu1 %v6151_v37  ;;  %v6308_v37 = vld [vmem:[#allocation8 + $0x48] ss:$12 sps:$4 sm:$0xff]   ;;  %v6265_v51 = vld [vmem:[#allocation5 + $0x4fc] ss:$48 sps:$4 sm:$0xff]  }
 0x117   :  { %2290 = vmatmul.mubr.bf16.vlgmr.msra.gmra.mrb[4].mxu0 %v7103_v55  ;;  %v6248_v55 = vld [vmem:[#allocation5 + $0x740] ss:$48 sps:$4 sm:$0xff]  }
 0x118   :  { %2301 = vmatpush1.bf16.msra.mxu0 %v6230_v54  ;;  %2332 = vmatprep.mubr.bf16.mxu0 %v6988_v63  ;;  %v6263_v54 = vld [vmem:[#allocation5 + $0x4f8] ss:$48 sps:$4 sm:$0xff]  }
 0x119   :  { %2047 = vmatpush1.bf16.msra.mxu1 %v6149_v40  ;;  %2302 = vmatprep.subr.bf16.mxu0 %v6238_v56  ;;  %v6314_v40 = vld [vmem:[#allocation8 + $0x60] ss:$12 sps:$4 sm:$0xff]  }
 0x11a   :  { %2048 = vmatprep.subr.bf16.mxu1 %v6157_v41  ;;  %v6322_v41 = vld [vmem:[#allocation8 + $0x7c] ss:$12 sps:$4 sm:$0xff]   ;;  %v6271_v56 = vld [vmem:[#allocation5 + $0x55c] ss:$48 sps:$4 sm:$0xff]  }
 0x11c   :  { %2303 = vmatpush1.bf16.msra.mxu0 %v6236_v59  ;;  %v6269_v59 = vld [vmem:[#allocation5 + $0x558] ss:$48 sps:$4 sm:$0xff]  }
 0x11d   :  { %2049 = vmatpush1.bf16.msra.mxu1 %v6155_v44  ;;  %2304 = vmatprep.subr.bf16.mxu0 %v6244_v60  ;;  %v6320_v44 = vld [vmem:[#allocation8 + $0x78] ss:$12 sps:$4 sm:$0xff]   ;;  %v6277_v60 = vld [vmem:[#allocation5 + $0x5bc] ss:$48 sps:$4 sm:$0xff]  }
 0x11e   :  { %2050 = vmatprep.subr.bf16.mxu1 %v6163_v45  ;;  %v6328_v45 = vld [vmem:[#allocation8 + $0x94] ss:$12 sps:$4 sm:$0xff]  }
 0x120   :  { %2305 = vmatpush1.bf16.msra.mxu0 %v6242_v0  ;;  %v6275_v0 = vld [vmem:[#allocation5 + $0x5b8] ss:$48 sps:$4 sm:$0xff]  }
 0x121   :  { %2051 = vmatpush1.bf16.msra.mxu1 %v6161_v48  ;;  %2306 = vmatprep.subr.bf16.mxu0 %v6250_v2  ;;  %v6326_v48 = vld [vmem:[#allocation8 + $0x90] ss:$12 sps:$4 sm:$0xff]  }
 0x122   :  { %2052 = vmatprep.subr.bf16.mxu1 %v6169_v49  ;;  %v6334_v49 = vld [vmem:[#allocation8 + $0xac] ss:$12 sps:$4 sm:$0xff]   ;;  %v6350_v2 = vld [vmem:[#allocation8 + $0xf0] ss:$12 sps:$4 sm:$0xff]  }
 0x124   :  { %2307 = vmatpush1.bf16.msra.mxu0 %v6248_v55  ;;  %v6283_v55 = vld [vmem:[#allocation5 + $0x67c] ss:$48 sps:$4 sm:$0xff]  }
 0x125   :  { %2053 = vmatpush1.bf16.msra.mxu1 %v6167_v52  ;;  %2308 = vmatprep.subr.bf16.mxu0 %v6256_v4  ;;  %v6332_v52 = vld [vmem:[#allocation8 + $0xa8] ss:$12 sps:$4 sm:$0xff]  }
 0x126   :  { %2054 = vmatprep.subr.bf16.mxu1 %v6175_v53  ;;  %v6340_v53 = vld [vmem:[#allocation8 + $0xc4] ss:$12 sps:$4 sm:$0xff]   ;;  %v6356_v4 = vld [vmem:[#allocation8 + $0x108] ss:$12 sps:$4 sm:$0xff]  }
 0x128   :  { %2309 = vmatpush1.bf16.msra.mxu0 %v6254_v7  ;;  %v7124_v7 = vld [vmem:[#allocation2] ss:$12 sps:$4 sm:$0xff]  }
 0x129   :  { %2055 = vmatpush1.bf16.msra.mxu1 %v6173_v57  ;;  %2310 = vmatprep.subr.bf16.mxu0 %v6262_v8  ;;  %v6338_v57 = vld [vmem:[#allocation8 + $0xc0] ss:$12 sps:$4 sm:$0xff]  }
 0x12a   :  { %2056 = vmatprep.subr.bf16.mxu1 %v6181_v58  ;;  %v6346_v58 = vld [vmem:[#allocation8 + $0xdc] ss:$12 sps:$4 sm:$0xff]  }
 0x12b   :  { %v6281_v8 = vld [vmem:[#allocation5 + $0x678] ss:$48 sps:$4 sm:$0xff]  }
 0x12c   :  { %2311 = vmatpush1.bf16.msra.mxu0 %v6260_v12  ;;  %v6284_v12 = vld [vmem:[#allocation5 + $0x6d8] ss:$48 sps:$4 sm:$0xff]  }
 0x12d   :  { %2057 = vmatpush1.bf16.msra.mxu1 %v6179_v61  ;;  %2312 = vmatprep.subr.bf16.mxu0 %v6268_v13  ;;  %v6344_v61 = vld [vmem:[#allocation8 + $0xd8] ss:$12 sps:$4 sm:$0xff]   ;;  %v6289_v13 = vld [vmem:[#allocation5 + $0x73c] ss:$48 sps:$4 sm:$0xff]  }
 0x12e   :  { %2171 = vmatprep.subr.bf16.mxu1 %v6187_v62  ;;  %v6352_v62 = vld [vmem:[#allocation8 + $0xf4] ss:$12 sps:$4 sm:$0xff]  }
 0x130   :  { %2075 = vmatmul.mubr.bf16.vlgmr.msra.gmra.mrb[4].mxu1 %v7109_v25  ;;  %2313 = vmatpush1.bf16.msra.mxu0 %v6266_v15  ;;  %v6376_v15 = vld [vmem:[#allocation8 + $0x154] ss:$12 sps:$4 sm:$0xff]  }
 0x131   :  { %2172 = vmatpush1.bf16.msra.mxu1 %v6185_v1  ;;  %2203 = vmatprep.mubr.bf16.mxu1 %v7120_v5  ;;  %v6280_v1 = vld [vmem:[#allocation5 + $0x61c] ss:$48 sps:$4 sm:$0xff]  }
 0x132   :  { %2173 = vmatprep.subr.bf16.mxu1 %v6193_v16  ;;  %2314 = vmatprep.subr.bf16.mxu0 %v6274_v17  ;;  %v6358_v16 = vld [vmem:[#allocation8 + $0x10c] ss:$12 sps:$4 sm:$0xff]  }
 0x133   :  { %v6287_v17 = vld [vmem:[#allocation5 + $0x738] ss:$48 sps:$4 sm:$0xff]  }
 0x134   :  { %2315 = vmatpush1.bf16.msra.mxu0 %v6272_v20  ;;  %v6382_v20 = vld [vmem:[#allocation8 + $0x16c] ss:$12 sps:$4 sm:$0xff]  }
 0x135   :  { %2174 = vmatpush1.bf16.msra.mxu1 %v6191_v3  ;;  %4481 = vmatprep.subr.bf16.mxu0 %v6292_v21  ;;  %v6278_v3 = vld [vmem:[#allocation5 + $0x618] ss:$48 sps:$4 sm:$0xff]  }
 0x136   :  { %2175 = vmatprep.subr.bf16.mxu1 %v6199_v6  ;;  %v6364_v6 = vld [vmem:[#allocation8 + $0x124] ss:$12 sps:$4 sm:$0xff]   ;;  %v6293_v21 = vld [vmem:[#allocation5 + $0x798] ss:$48 sps:$4 sm:$0xff]  }
 0x137   :  { %2333 = vmatmul.mubr.bf16.vlgmr.msra.gmra.mrb[4].mxu0 %v7109_v25  ;;  %v6247_v25 = vld [vmem:[#allocation5 + $0x3dc] ss:$48 sps:$4 sm:$0xff]  }
 0x138   :  { %4482 = vmatpush1.bf16.msra.mxu0 %v6290_v24  ;;  %v6412_v24 = vld [vmem:[#allocation8 + $0x184] ss:$12 sps:$4 sm:$0xff]  }
 0x139   :  { %2176 = vmatpush1.bf16.msra.mxu1 %v6197_v9  ;;  %4483 = vmatprep.subr.bf16.mxu0 %v6298_v26  ;;  %v6286_v9 = vld [vmem:[#allocation5 + $0x6dc] ss:$48 sps:$4 sm:$0xff]   ;;  %v6299_v26 = vld [vmem:[#allocation5 + $0x7f8] ss:$48 sps:$4 sm:$0xff]  }
 0x13a   :  { %2177 = vmatprep.subr.bf16.mxu1 %v6205_v10  ;;  %v6362_v10 = vld [vmem:[#allocation8 + $0x120] ss:$12 sps:$4 sm:$0xff]  }
 0x13c   :  { %4484 = vmatpush1.bf16.msra.mxu0 %v6296_v29  ;;  %v6313_v29 = vld [vmem:[#allocation5 + $0x8bc] ss:$48 sps:$4 sm:$0xff]  }
 0x13d   :  { %2178 = vmatpush1.bf16.msra.mxu1 %v6203_v11  ;;  %4485 = vmatprep.subr.bf16.mxu0 %v6304_v30  ;;  %v6370_v11 = vld [vmem:[#allocation8 + $0x13c] ss:$12 sps:$4 sm:$0xff]  }
 0x13e   :  { %2179 = vmatprep.subr.bf16.mxu1 %v6211_v14  ;;  %v6368_v14 = vld [vmem:[#allocation8 + $0x138] ss:$12 sps:$4 sm:$0xff]   ;;  %v6311_v30 = vld [vmem:[#allocation5 + $0x8b8] ss:$48 sps:$4 sm:$0xff]  }
 0x140   :  { %4486 = vmatpush1.bf16.msra.mxu0 %v6302_v33  ;;  %v6325_v33 = vld [vmem:[#allocation5 + $0x8c] ss:$48 sps:$4 sm:$0xff]  }
 0x141   :  { %2180 = vmatpush1.bf16.msra.mxu1 %v6209_v18  ;;  %4487 = vmatprep.subr.bf16.mxu0 %v6310_v34  ;;  %v6295_v18 = vld [vmem:[#allocation5 + $0x79c] ss:$48 sps:$4 sm:$0xff]   ;;  %v6323_v34 = vld [vmem:[#allocation5 + $0x88] ss:$48 sps:$4 sm:$0xff]  }
 0x142   :  { %2181 = vmatprep.subr.bf16.mxu1 %v6217_v19  ;;  %v6374_v19 = vld [vmem:[#allocation8 + $0x150] ss:$12 sps:$4 sm:$0xff]  }
 0x144   :  { %4488 = vmatpush1.bf16.msra.mxu0 %v6308_v37  ;;  %v6329_v37 = vld [vmem:[#allocation5 + $0xe8] ss:$48 sps:$4 sm:$0xff]  }
 0x145   :  { %2182 = vmatpush1.bf16.msra.mxu1 %v6215_v22  ;;  %4489 = vmatprep.subr.bf16.mxu0 %v6316_v38  ;;  %v6301_v22 = vld [vmem:[#allocation5 + $0x7fc] ss:$48 sps:$4 sm:$0xff]   ;;  %v397_v38 = vlaneseq }
 0x146   :  { %2183 = vmatprep.subr.bf16.mxu1 %v6223_v23  ;;  %v6380_v23 = vld [vmem:[#allocation8 + $0x168] ss:$12 sps:$4 sm:$0xff]  }
 0x148   :  { %4490 = vmatpush1.bf16.msra.mxu0 %v6314_v40  ;;  %v7132_v40 = vshrl.u32 %v397_v38, 7  ;;  %v6410_v38 = vld [vmem:[#allocation8 + $0x180] ss:$12 sps:$4 sm:$0xff]  }
 0x149   :  { %2184 = vmatpush1.bf16.msra.mxu1 %v6221_v27  ;;  %4491 = vmatprep.subr.bf16.mxu0 %v6322_v41  ;;  %v6307_v27 = vld [vmem:[#allocation5 + $0x85c] ss:$48 sps:$4 sm:$0xff]  }
 0x14a   :  { %2185 = vmatprep.subr.bf16.mxu1 %v6229_v28  ;;  %v6305_v28 = vld [vmem:[#allocation5 + $0x858] ss:$48 sps:$4 sm:$0xff]   ;;  %v6343_v41 = vld [vmem:[#allocation5 + $0x1ac] ss:$48 sps:$4 sm:$0xff]  }
 0x14c   :  { %4492 = vmatpush1.bf16.msra.mxu0 %v6320_v44  ;;  %v7137_v44 = vsub.s32 0, %v7132_v40 }
 0x14d   :  { %2186 = vmatpush1.bf16.msra.mxu1 %v6227_v31  ;;  %4493 = vmatprep.subr.bf16.mxu0 %v6328_v45  ;;  %v6319_v31 = vld [vmem:[#allocation5 + $0x2c] ss:$48 sps:$4 sm:$0xff]  }
 0x14e   :  { %2187 = vmatprep.subr.bf16.mxu1 %v6235_v32  ;;  %v6317_v32 = vld [vmem:[#allocation5 + $0x28] ss:$48 sps:$4 sm:$0xff]   ;;  %v6349_v45 = vld [vmem:[#allocation5 + $0x20c] ss:$48 sps:$4 sm:$0xff]  }
 0x150   :  { %4494 = vmatpush1.bf16.msra.mxu0 %v6326_v48 }
 0x151   :  { %2188 = vmatpush1.bf16.msra.mxu1 %v6233_v35  ;;  %4495 = vmatprep.subr.bf16.mxu0 %v6334_v49  ;;  %v7128_v35 = vld [vmem:[#allocation2 + $0x8] ss:$12 sps:$4 sm:$0xff]  }
 0x152   :  { %2189 = vmatprep.subr.bf16.mxu1 %v6241_v36  ;;  %v6331_v36 = vld [vmem:[#allocation5 + $0xec] ss:$48 sps:$4 sm:$0xff]  }
 0x153   :  { %v6355_v49 = vld [vmem:[#allocation5 + $0x26c] ss:$48 sps:$4 sm:$0xff]  }
 0x154   :  { %4496 = vmatpush1.bf16.msra.mxu0 %v6332_v52 }
 0x155   :  { %2190 = vmatpush1.bf16.msra.mxu1 %v6239_v39  ;;  %4497 = vmatprep.subr.bf16.mxu0 %v6340_v53  ;;  %v6337_v39 = vld [vmem:[#allocation5 + $0x14c] ss:$48 sps:$4 sm:$0xff]   ;;  %v6353_v53 = vld [vmem:[#allocation5 + $0x268] ss:$48 sps:$4 sm:$0xff]  }
 0x156   :  { %2191 = vmatprep.subr.bf16.mxu1 %v6247_v25  ;;  %v6335_v25 = vld [vmem:[#allocation5 + $0x148] ss:$48 sps:$4 sm:$0xff]  }
 0x158   :  { %4498 = vmatpush1.bf16.msra.mxu0 %v6338_v57 }
 0x159   :  { %2192 = vmatpush1.bf16.msra.mxu1 %v6245_v42  ;;  %4499 = vmatprep.subr.bf16.mxu0 %v6346_v58  ;;  %v6341_v42 = vld [vmem:[#allocation5 + $0x1a8] ss:$48 sps:$4 sm:$0xff]  }
 0x15a   :  { %2193 = vmatprep.subr.bf16.mxu1 %v6253_v43  ;;  %v7134_v43 = vld [vmem:[#allocation7] sm:$0xff] }
 0x15c   :  { %4500 = vmatpush1.bf16.msra.mxu0 %v6344_v61 }
 0x15d   :  { %2194 = vmatpush1.bf16.msra.mxu1 %v6251_v46  ;;  %4501 = vmatprep.subr.bf16.mxu0 %v6352_v62  ;;  %v400_v46 = vrot.slane %v7134_v43, %v7137_v44 }
 0x15e   :  { %2195 = vmatprep.subr.bf16.mxu1 %v6259_v47  ;;  %v6347_v47 = vld [vmem:[#allocation5 + $0x208] ss:$48 sps:$4 sm:$0xff]  }
 0x160   :  { %4502 = vmatpush1.bf16.msra.mxu0 %v6350_v2  ;;  %v6359_v2 = vld [vmem:[#allocation5 + $0x2c8] ss:$48 sps:$4 sm:$0xff]  }
 0x161   :  { %2196 = vmatpush1.bf16.msra.mxu1 %v6257_v50  ;;  %4503 = vmatprep.subr.bf16.mxu0 %v6358_v16  ;;  %v6367_v16 = vld [vmem:[#allocation5 + $0x32c] ss:$48 sps:$4 sm:$0xff]  }
 0x162   :  { %2197 = vmatprep.subr.bf16.mxu1 %v6265_v51 }
 0x164   :  { %4504 = vmatpush1.bf16.msra.mxu0 %v6356_v4  ;;  %v6371_v4 = vld [vmem:[#allocation5 + $0x388] ss:$48 sps:$4 sm:$0xff]  }
 0x165   :  { %2198 = vmatpush1.bf16.msra.mxu1 %v6263_v54  ;;  %4505 = vmatprep.subr.bf16.mxu0 %v6364_v6 }
 0x166   :  { %2199 = vmatprep.subr.bf16.mxu1 %v6271_v56 }
 0x168   :  { %4506 = vmatpush1.bf16.msra.mxu0 %v6362_v10 }
 0x169   :  { %2200 = vmatpush1.bf16.msra.mxu1 %v6269_v59  ;;  %4507 = vmatprep.subr.bf16.mxu0 %v6370_v11 }
 0x16a   :  { %2201 = vmatprep.subr.bf16.mxu1 %v6277_v60  ;;  %v6361_v60 = vld [vmem:[#allocation5 + $0x2cc] ss:$48 sps:$4 sm:$0xff]  }
 0x16c   :  { %4508 = vmatpush1.bf16.msra.mxu0 %v6368_v14 }
 0x16d   :  { %2202 = vmatpush1.bf16.msra.mxu1 %v6275_v0  ;;  %4509 = vmatprep.subr.bf16.mxu0 %v6376_v15 }
 0x16e   :  { %2214 = vmatprep.subr.bf16.mxu1 %v6280_v1 }
 0x170   :  { %2204 = vmatmul.mubr.bf16.vlgmr.msra.gmra.mrb[8].mxu1 %v7124_v7  ;;  %4510 = vmatpush1.bf16.msra.mxu0 %v6374_v19 }
 0x171   :  { %2215 = vmatpush1.bf16.msra.mxu1 %v6278_v3  ;;  %2246 = vmatprep.mubr.bf16.mxu1 %v6988_v63  ;;  %v6365_v3 = vld [vmem:[#allocation5 + $0x328] ss:$48 sps:$4 sm:$0xff]  }
 0x172   :  { %2216 = vmatprep.subr.bf16.mxu1 %v6283_v55  ;;  %4511 = vmatprep.subr.bf16.mxu0 %v6382_v20  ;;  %v6373_v55 = vld [vmem:[#allocation5 + $0x38c] ss:$48 sps:$4 sm:$0xff]  }
 0x174   :  { %4512 = vmatpush1.bf16.msra.mxu0 %v6380_v23 }
 0x175   :  { %2217 = vmatpush1.bf16.msra.mxu1 %v6281_v8  ;;  %4524 = vmatprep.subr.bf16.mxu0 %v6412_v24  ;;  %v6379_v8 = vld [vmem:[#allocation5 + $0x3ec] ss:$48 sps:$4 sm:$0xff]  }
 0x176   :  { %2218 = vmatprep.subr.bf16.mxu1 %v6286_v9  ;;  %v415_v9 = vsub.s32 4, %v7132_v40  ;;  %v6385_v24 = vld [vmem:[#allocation5 + $0x44c] ss:$48 sps:$4 sm:$0xff]  }
 0x179   :  { %2219 = vmatpush1.bf16.msra.mxu1 %v6284_v12  ;;  %v6377_v12 = vld [vmem:[#allocation5 + $0x3e8] ss:$48 sps:$4 sm:$0xff]  }
 0x17a   :  { %2220 = vmatprep.subr.bf16.mxu1 %v6289_v13  ;;  %v419_v13 = vsub.s32 5, %v7132_v40 }
 0x17d   :  { %2221 = vmatpush1.bf16.msra.mxu1 %v6287_v17 }
 0x17e   :  { %2222 = vmatprep.subr.bf16.mxu1 %v6295_v18 }
 0x181   :  { %2223 = vmatpush1.bf16.msra.mxu1 %v6293_v21 }
 0x182   :  { %2224 = vmatprep.subr.bf16.mxu1 %v6301_v22 }
 0x185   :  { %2225 = vmatpush1.bf16.msra.mxu1 %v6299_v26  ;;  %v416_v26 = vrot.slane %v7134_v43, %v415_v9 }
 0x186   :  { %2226 = vmatprep.subr.bf16.mxu1 %v6307_v27 }
 0x189   :  { %2227 = vmatpush1.bf16.msra.mxu1 %v6305_v28 }
 0x18a   :  { %2228 = vmatprep.subr.bf16.mxu1 %v6313_v29  ;;  %v420_v29 = vrot.slane %v7134_v43, %v419_v13 }
 0x18d   :  { %2229 = vmatpush1.bf16.msra.mxu1 %v6311_v30 }
 0x18e   :  { %2343 = vmatprep.subr.bf16.mxu1 %v6319_v31 }
 0x190   :  { %2247 = vmatmul.mubr.bf16.vlgmr.msra.gmra.mrb[8].mxu1 %v7128_v35 }
 0x191   :  { %2344 = vmatpush1.bf16.msra.mxu1 %v6317_v32  ;;  %2375 = vmatprep.mubr.bf16.mxu1 %v7120_v5  ;;  %v7140_v5 = vsub.s32 1, %v7132_v40  ;;  %v6383_v32 = vld [vmem:[#allocation5 + $0x448] ss:$48 sps:$4 sm:$0xff]  }
 0x192   :  { %2345 = vmatprep.subr.bf16.mxu1 %v6325_v33 }
 0x193   :  { %v404_v48 = vrot.slane %v7134_v43, %v7140_v5 }
 0x195   :  { %2346 = vmatpush1.bf16.msra.mxu1 %v6323_v34 }
 0x196   :  { %2347 = vmatprep.subr.bf16.mxu1 %v6331_v36 }
 0x199   :  { %2348 = vmatpush1.bf16.msra.mxu1 %v6329_v37  ;;  %v6388_v37 = vld [vmem:[#allocation5 + $0x4ac] ss:$48 sps:$4 sm:$0xff]  }
 0x19a   :  { %2349 = vmatprep.subr.bf16.mxu1 %v6337_v39 }
 0x19d   :  { %2350 = vmatpush1.bf16.msra.mxu1 %v6335_v25 }
 0x19e   :  { %2351 = vmatprep.subr.bf16.mxu1 %v6343_v41  ;;  %v6386_v41 = vld [vmem:[#allocation5 + $0x4a8] ss:$48 sps:$4 sm:$0xff]  }
 0x1a1   :  { %2352 = vmatpush1.bf16.msra.mxu1 %v6341_v42  ;;  %v6418_v42 = vld [vmem:[#allocation8 + $0x19c] ss:$12 sps:$4 sm:$0xff]  }
 0x1a2   :  { %2353 = vmatprep.subr.bf16.mxu1 %v6349_v45 }
 0x1a3   :  { %v1990_v50 = vpop.f32.mrb[0].mxu1 }
 0x1a4   :  { %v5856_v51 = vadd.f32 %v1990_v50, %v400_v46  ;;  %v1992_v52 = vpop.f32.mrb[1].mxu1 }
 0x1a5   :  { %v5857_v54 = vadd.f32 %v1992_v52, %v404_v48  ;;  %v1994_v56 = vpop.f32.mrb[2].mxu1  ;;  %2354 = vmatpush1.bf16.msra.mxu1 %v6347_v47  ;;  %v6391_v47 = vld [vmem:[#allocation5 + $0x50c] ss:$48 sps:$4 sm:$0xff]  }
 0x1a6   :  { %v2453_v57 = vmul.f32 0.70710677, %v5856_v51  ;;  %v5858_v58 = vadd.f32 %v1994_v56, %v400_v46  ;;  %v1996_v59 = vpop.f32.mrb[3].mxu1  ;;  %2355 = vmatprep.subr.bf16.mxu1 %v6355_v49  ;;  %v2429_v15 = vmul.f32 0.5, %v5856_v51 }
 0x1a7   :  { %v2454_v61 = vmul.f32 0.70710677, %v5857_v54  ;;  %v5859_v62 = vadd.f32 %v1996_v59, %v404_v48  ;;  %v2430_v21 = vmul.f32 0.5, %v5857_v54  ;;  %v6394_v59 = vld [vmem:[#allocation5 + $0x56c] ss:$48 sps:$4 sm:$0xff]  }
 0x1a8   :  { %6758 = verf.f32 %v2453_v57  ;;  %v2465_v0 = vmul.f32 0.70710677, %v5858_v58  ;;  %v2441_v18 = vmul.f32 0.5, %v5858_v58  ;;  %v6424_v57 = vld [vmem:[#allocation8 + $0x1b4] ss:$12 sps:$4 sm:$0xff]  }
 0x1a9   :  { %6760 = verf.f32 %v2454_v61  ;;  %v2466_v1 = vmul.f32 0.70710677, %v5859_v62  ;;  %2356 = vmatpush1.bf16.msra.mxu1 %v6353_v53  ;;  %v2442_v22 = vmul.f32 0.5, %v5859_v62  ;;  %v6416_v53 = vld [vmem:[#allocation8 + $0x198] ss:$12 sps:$4 sm:$0xff]  }
 0x1aa   :  { %6762 = verf.f32 %v2465_v0  ;;  %2357 = vmatprep.subr.bf16.mxu1 %v6361_v60  ;;  %v2162_v34 = vpop.f32.mrb[0].mxu0  ;;  %v6389_v58 = vld [vmem:[#allocation5 + $0x508] ss:$48 sps:$4 sm:$0xff]   ;;  %v6397_v0 = vld [vmem:[#allocation5 + $0x5cc] ss:$48 sps:$4 sm:$0xff]  }
 0x1ab   :  { %6764 = verf.f32 %v2466_v1  ;;  %v5864_v39 = vadd.f32 %v2162_v34, %v416_v26  ;;  %v2164_v25 = vpop.f32.mrb[1].mxu0  ;;  %v6422_v60 = vld [vmem:[#allocation8 + $0x1b0] ss:$12 sps:$4 sm:$0xff]   ;;  %v6430_v62 = vld [vmem:[#allocation8 + $0x1cc] ss:$12 sps:$4 sm:$0xff]  }
 0x1ac   :  { %v5865_v45 = vadd.f32 %v2164_v25, %v420_v29  ;;  %v2166_v46 = vpop.f32.mrb[2].mxu0  ;;  %v6392_v61 = vld [vmem:[#allocation5 + $0x568] ss:$48 sps:$4 sm:$0xff]   ;;  %v6428_v1 = vld [vmem:[#allocation8 + $0x1c8] ss:$12 sps:$4 sm:$0xff]  }
 0x1ad   :  { %2358 = vmatpush1.bf16.msra.mxu1 %v6359_v2  ;;  %v2457_v48 = vmul.f32 0.70710677, %v5864_v39  ;;  %v5866_v49 = vadd.f32 %v2166_v46, %v416_v26  ;;  %v2168_v50 = vpop.f32.mrb[3].mxu0  ;;  %v6436_v2 = vld [vmem:[#allocation8 + $0x1e4] ss:$12 sps:$4 sm:$0xff]  }
 0x1ae   :  { %2359 = vmatprep.subr.bf16.mxu1 %v6367_v16  ;;  %v2458_v51 = vmul.f32 0.70710677, %v5865_v45  ;;  %v5867_v52 = vadd.f32 %v2168_v50, %v420_v29  ;;  %v6395_v16 = vld [vmem:[#allocation5 + $0x5c8] ss:$48 sps:$4 sm:$0xff]   ;;  %v6447_v25 = vld [vmem:[#allocation8 + $0x228] ss:$12 sps:$4 sm:$0xff]  }
 0x1af   :  { %6766 = verf.f32 %v2457_v48  ;;  %v2469_v54 = vmul.f32 0.70710677, %v5866_v49  ;;  %v6401_v29 = vld [vmem:[#allocation5 + $0x688] ss:$48 sps:$4 sm:$0xff]   ;;  %v6457_v48 = vld [vmem:[#allocation8 + $0x258] ss:$12 sps:$4 sm:$0xff]  }
 0x1b0   :  { %6768 = verf.f32 %v2458_v51  ;;  %v2470_v56 = vmul.f32 0.70710677, %v5867_v52  ;;  %v2446_v13 = vmul.f32 0.5, %v5867_v52  ;;  %v6442_v34 = vld [vmem:[#allocation8 + $0x210] ss:$12 sps:$4 sm:$0xff]  }
 0x1b1   :  { %2360 = vmatpush1.bf16.msra.mxu1 %v6365_v3  ;;  %6770 = verf.f32 %v2469_v54  ;;  %v2433_v3 = vmul.f32 0.5, %v5864_v39  ;;  %v6409_v39 = vld [vmem:[#allocation5 + $0x74c] ss:$48 sps:$4 sm:$0xff]   ;;  %v6413_v46 = vld [vmem:[#allocation5 + $0x7a8] ss:$48 sps:$4 sm:$0xff]  }
 0x1b2   :  { %v6759_v6 = vpop.eup %6758  ;;  %2361 = vmatprep.subr.bf16.mxu1 %v6373_v55  ;;  %6772 = verf.f32 %v2470_v56  ;;  %v6464_v50 = vld [vmem:[#allocation8 + $0x274] ss:$12 sps:$4 sm:$0xff]   ;;  %v6462_v52 = vld [vmem:[#allocation8 + $0x270] ss:$12 sps:$4 sm:$0xff]   ;;  %v6469_v54 = vld [vmem:[#allocation8 + $0x28c] ss:$12 sps:$4 sm:$0xff]  }
 0x1b3   :  { %v6761_v10 = vpop.eup %6760  ;;  %v2501_v11 = vadd.f32 1.0, %v6759_v6  ;;  %v2434_v6 = vmul.f32 0.5, %v5865_v45  ;;  %v6452_v45 = vld [vmem:[#allocation8 + $0x240] ss:$12 sps:$4 sm:$0xff]  }
 0x1b4   :  { %v6763_v14 = vpop.eup %6762  ;;  %v2502_v17 = vadd.f32 1.0, %v6761_v10  ;;  %v6427_v51 = vld [vmem:[#allocation5 + $0x86c] ss:$48 sps:$4 sm:$0xff]  }
 0x1b5   :  { %v6765_v19 = vpop.eup %6764  ;;  %v2513_v20 = vadd.f32 1.0, %v6763_v14  ;;  %2362 = vmatpush1.bf16.msra.mxu1 %v6371_v4  ;;  %v2525_v27 = vmul.f32 %v2501_v11, %v2429_v15  ;;  %v6400_v4 = vld [vmem:[#allocation5 + $0x62c] ss:$48 sps:$4 sm:$0xff]  }
 0x1b6   :  { %v2514_v23 = vadd.f32 1.0, %v6765_v19  ;;  %2363 = vmatprep.subr.bf16.mxu1 %v6379_v8  ;;  %v2526_v30 = vmul.f32 %v2502_v17, %v2430_v21  ;;  %v2445_v8 = vmul.f32 0.5, %v5866_v49  ;;  %v6434_v14 = vld [vmem:[#allocation8 + $0x1e0] ss:$12 sps:$4 sm:$0xff]  }
 0x1b7   :  { %v2537_v28 = vmul.f32 %v2513_v20, %v2441_v18  ;;  %v6398_v17 = vld [vmem:[#allocation5 + $0x628] ss:$48 sps:$4 sm:$0xff]   ;;  %v6403_v21 = vld [vmem:[#allocation5 + $0x68c] ss:$48 sps:$4 sm:$0xff]  }
 0x1b8   :  { %v2538_v31 = vmul.f32 %v2514_v23, %v2442_v22  ;;  %v6439_v20 = vld [vmem:[#allocation8 + $0x1fc] ss:$12 sps:$4 sm:$0xff]   ;;  %v6433_v56 = vld [vmem:[#allocation5 + $0x8cc] ss:$48 sps:$4 sm:$0xff]  }
 0x1b9   :  { %v7150_v33 = vpack.c.bf16 %v2537_v28, %v2525_v27  ;;  %2364 = vmatpush1.bf16.msra.mxu1 %v6377_v12  ;;  %v6767_v55 = vpop.eup %6766  ;;  %v6437_v27 = vld [vmem:[#allocation8 + $0x1f8] ss:$12 sps:$4 sm:$0xff]   ;;  %v6444_v28 = vld [vmem:[#allocation8 + $0x214] ss:$12 sps:$4 sm:$0xff]   ;;  %v6419_v49 = vld [vmem:[#allocation5 + $0x808] ss:$48 sps:$4 sm:$0xff]  }
 0x1ba   :  { %2365 = vmatprep.subr.bf16.mxu1 %v6385_v24  ;;  %v7152_v36 = vpack.c.bf16 %v2538_v31, %v2526_v30  ;;  %v6769_v9 = vpop.eup %6768  ;;  %v2505_v10 = vadd.f32 1.0, %v6767_v55  ;;  %v6406_v31 = vld [vmem:[#allocation5 + $0x6ec] ss:$48 sps:$4 sm:$0xff]   ;;  %v6450_v55 = vld [vmem:[#allocation8 + $0xf8] ss:$12 sps:$4 sm:$0xff]  }
 0x1bb   :  { %v6771_v11 = vpop.eup %6770  ;;  %v2506_v12 = vadd.f32 1.0, %v6769_v9  ;;  %v6455_v9 = vld [vmem:[#allocation8 + $0x110] ss:$12 sps:$4 sm:$0xff]  }
 0x1bc   :  { %4513 = vmatprep.mubr.bf16.mxu0 %v7152_v36  ;;  %v6773_v15 = vpop.eup %6772  ;;  %v2529_v18 = vmul.f32 %v2505_v10, %v2433_v3  ;;  %v2517_v19 = vadd.f32 1.0, %v6771_v11  ;;  %v6446_v3 = vld [vmem:[#allocation8 + $0x20] ss:$12 sps:$4 sm:$0xff]   ;;  %v6487_v10 = vld [vmem:[#allocation8 + $0x2e8] ss:$12 sps:$4 sm:$0xff]  }
 0x1bd   :  { %2366 = vmatpush1.bf16.msra.mxu1 %v6383_v32  ;;  %4514 = vmatmul.mubr.bf16.vlgmr.msra.gmra.mrb[8].mxu0 %v7150_v33  ;;  %v2530_v22 = vmul.f32 %v2506_v12, %v2434_v6  ;;  %v2518_v23 = vadd.f32 1.0, %v6773_v15  ;;  %v6489_v6 = vld [vmem:[#allocation8 + $0x2ec] ss:$12 sps:$4 sm:$0xff]   ;;  %v6494_v11 = vld [vmem:[#allocation8 + $0x304] ss:$12 sps:$4 sm:$0xff]  }
 0x1be   :  { %2367 = vmatprep.subr.bf16.mxu1 %v6388_v37  ;;  %4525 = vmatpush1.bf16.msra.mxu0 %v6410_v38  ;;  %v2541_v24 = vmul.f32 %v2517_v19, %v2445_v8  ;;  %v6449_v37 = vld [vmem:[#allocation8 + $0x22c] ss:$12 sps:$4 sm:$0xff]   ;;  %v6460_v12 = vld [vmem:[#allocation8 + $0x128] ss:$12 sps:$4 sm:$0xff]  }
 0x1bf   :  { %4526 = vmatprep.subr.bf16.mxu0 %v6418_v42  ;;  %v2542_v26 = vmul.f32 %v2518_v23, %v2446_v13  ;;  %v6404_v38 = vld [vmem:[#allocation5 + $0x6e8] ss:$48 sps:$4 sm:$0xff]   ;;  %v6451_v8 = vld [vmem:[#allocation8 + $0x38] ss:$12 sps:$4 sm:$0xff]   ;;  %v6461_v13 = vld [vmem:[#allocation8 + $0x68] ss:$12 sps:$4 sm:$0xff]  }
 0x1c0   :  { %v7156_v30 = vpack.c.bf16 %v2541_v24, %v2529_v18  ;;  %v6407_v42 = vld [vmem:[#allocation5 + $0x748] ss:$48 sps:$4 sm:$0xff]  }
 0x1c1   :  { %2368 = vmatpush1.bf16.msra.mxu1 %v6386_v41  ;;  %v7159_v32 = vpack.c.bf16 %v2542_v26, %v2530_v22  ;;  %v6454_v41 = vld [vmem:[#allocation8 + $0x244] ss:$12 sps:$4 sm:$0xff]   ;;  %v6465_v15 = vld [vmem:[#allocation8 + $0x140] ss:$12 sps:$4 sm:$0xff]  }
 0x1c2   :  { %2369 = vmatprep.subr.bf16.mxu1 %v6391_v47  ;;  %4527 = vmatpush1.bf16.msra.mxu0 %v6416_v53  ;;  %v6421_v47 = vld [vmem:[#allocation5 + $0x80c] ss:$48 sps:$4 sm:$0xff]   ;;  %v6425_v53 = vld [vmem:[#allocation5 + $0x868] ss:$48 sps:$4 sm:$0xff]  }
 0x1c3   :  { %4528 = vmatprep.subr.bf16.mxu0 %v6424_v57  ;;  %v6467_v57 = vld [vmem:[#allocation8 + $0x288] ss:$12 sps:$4 sm:$0xff]   ;;  %v6466_v19 = vld [vmem:[#allocation8 + $0x80] ss:$12 sps:$4 sm:$0xff]  }
 0x1c5   :  { %2370 = vmatpush1.bf16.msra.mxu1 %v6389_v58  ;;  %v6474_v58 = vld [vmem:[#allocation8 + $0x2a4] ss:$12 sps:$4 sm:$0xff]  }
 0x1c6   :  { %2371 = vmatprep.subr.bf16.mxu1 %v6394_v59  ;;  %4529 = vmatpush1.bf16.msra.mxu0 %v6422_v60  ;;  %v6431_v59 = vld [vmem:[#allocation5 + $0x8c8] ss:$48 sps:$4 sm:$0xff]   ;;  %v6440_v60 = vld [vmem:[#allocation8 + $0xc8] ss:$12 sps:$4 sm:$0xff]  }
 0x1c7   :  { %4530 = vmatprep.subr.bf16.mxu0 %v6430_v62  ;;  %v6479_v62 = vld [vmem:[#allocation8 + $0x2bc] ss:$12 sps:$4 sm:$0xff]  }
 0x1c9   :  { %2372 = vmatpush1.bf16.msra.mxu1 %v6392_v61  ;;  %v6472_v61 = vld [vmem:[#allocation8 + $0x2a0] ss:$12 sps:$4 sm:$0xff]  }
 0x1ca   :  { %2373 = vmatprep.subr.bf16.mxu1 %v6397_v0  ;;  %4531 = vmatpush1.bf16.msra.mxu0 %v6428_v1  ;;  %v6441_v0 = vld [vmem:[#allocation8 + $0x8] ss:$12 sps:$4 sm:$0xff]   ;;  %v6445_v1 = vld [vmem:[#allocation8 + $0xe0] ss:$12 sps:$4 sm:$0xff]  }
 0x1cb   :  { %4532 = vmatprep.subr.bf16.mxu0 %v6436_v2  ;;  %v6477_v2 = vld [vmem:[#allocation8 + $0x2b8] ss:$12 sps:$4 sm:$0xff]  }
 0x1cd   :  { %2374 = vmatpush1.bf16.msra.mxu1 %v6395_v16  ;;  %v6484_v16 = vld [vmem:[#allocation8 + $0x2d4] ss:$12 sps:$4 sm:$0xff]  }
 0x1ce   :  { %2386 = vmatprep.subr.bf16.mxu1 %v6400_v4  ;;  %4533 = vmatpush1.bf16.msra.mxu0 %v6434_v14  ;;  %v6482_v4 = vld [vmem:[#allocation8 + $0x2d0] ss:$12 sps:$4 sm:$0xff]   ;;  %v411_v14 = vsub.s32 3, %v7132_v40 }
 0x1cf   :  { %4534 = vmatprep.subr.bf16.mxu0 %v6439_v20  ;;  %v6470_v20 = vld [vmem:[#allocation8 + $0x158] ss:$12 sps:$4 sm:$0xff]  }
 0x1d0   :  { %2376 = vmatmul.mubr.bf16.vlgmr.msra.gmra.mrb[12].mxu1 %v7124_v7  ;;  %v6415_v7 = vld [vmem:[#allocation5 + $0x7ac] ss:$48 sps:$4 sm:$0xff]   ;;  %v412_v18 = vrot.slane %v7134_v43, %v411_v14 }
 0x1d1   :  { %2387 = vmatpush1.bf16.msra.mxu1 %v6398_v17  ;;  %2418 = vmatprep.mubr.bf16.mxu1 %v6988_v63  ;;  %v6459_v63 = vld [vmem:[#allocation8 + $0x25c] ss:$12 sps:$4 sm:$0xff]  }
 0x1d2   :  { %2388 = vmatprep.subr.bf16.mxu1 %v6403_v21  ;;  %4535 = vmatpush1.bf16.msra.mxu0 %v6437_v27  ;;  %v6471_v27 = vld [vmem:[#allocation8 + $0x98] ss:$12 sps:$4 sm:$0xff]  }
 0x1d3   :  { %4536 = vmatprep.subr.bf16.mxu0 %v6444_v28 }
 0x1d5   :  { %2389 = vmatpush1.bf16.msra.mxu1 %v6401_v29 }
 0x1d6   :  { %2390 = vmatprep.subr.bf16.mxu1 %v6406_v31  ;;  %4537 = vmatpush1.bf16.msra.mxu0 %v6442_v34  ;;  %v6475_v34 = vld [vmem:[#allocation8 + $0x170] ss:$12 sps:$4 sm:$0xff]  }
 0x1d7   :  { %4538 = vmatprep.subr.bf16.mxu0 %v6449_v37 }
 0x1d9   :  { %2391 = vmatpush1.bf16.msra.mxu1 %v6404_v38 }
 0x1da   :  { %2392 = vmatprep.subr.bf16.mxu1 %v6409_v39  ;;  %4539 = vmatpush1.bf16.msra.mxu0 %v6447_v25  ;;  %v6476_v25 = vld [vmem:[#allocation8 + $0xb0] ss:$12 sps:$4 sm:$0xff]  }
 0x1db   :  { %4540 = vmatprep.subr.bf16.mxu0 %v6454_v41  ;;  %v6480_v41 = vld [vmem:[#allocation8 + $0x248] ss:$12 sps:$4 sm:$0xff]  }
 0x1dd   :  { %2393 = vmatpush1.bf16.msra.mxu1 %v6407_v42  ;;  %v6481_v42 = vld [vmem:[#allocation8 + $0x188] ss:$12 sps:$4 sm:$0xff]  }
 0x1de   :  { %2394 = vmatprep.subr.bf16.mxu1 %v6415_v7  ;;  %4541 = vmatpush1.bf16.msra.mxu0 %v6452_v45  ;;  %v6485_v7 = vld [vmem:[#allocation8 + $0x260] ss:$12 sps:$4 sm:$0xff]  }
 0x1df   :  { %4542 = vmatprep.subr.bf16.mxu0 %v6459_v63  ;;  %v6486_v45 = vld [vmem:[#allocation8 + $0x1a0] ss:$12 sps:$4 sm:$0xff]  }
 0x1e1   :  { %2395 = vmatpush1.bf16.msra.mxu1 %v6413_v46  ;;  %v6490_v46 = vld [vmem:[#allocation8 + $0x278] ss:$12 sps:$4 sm:$0xff]  }
 0x1e2   :  { %2396 = vmatprep.subr.bf16.mxu1 %v6421_v47  ;;  %4543 = vmatpush1.bf16.msra.mxu0 %v6457_v48 }
 0x1e3   :  { %4544 = vmatprep.subr.bf16.mxu0 %v6464_v50 }
 0x1e5   :  { %2397 = vmatpush1.bf16.msra.mxu1 %v6419_v49  ;;  %v7174_v49 = vld [vmem:[#allocation7 + $0x8] sm:$0xf] }
 0x1e6   :  { %2398 = vmatprep.subr.bf16.mxu1 %v6427_v51  ;;  %4545 = vmatpush1.bf16.msra.mxu0 %v6462_v52 }
 0x1e7   :  { %4546 = vmatprep.subr.bf16.mxu0 %v6469_v54 }
 0x1e9   :  { %2399 = vmatpush1.bf16.msra.mxu1 %v6425_v53 }
 0x1ea   :  { %2400 = vmatprep.subr.bf16.mxu1 %v6433_v56  ;;  %4547 = vmatpush1.bf16.msra.mxu0 %v6467_v57  ;;  %v6491_v57 = vld [vmem:[#allocation8 + $0x1b8] ss:$12 sps:$4 sm:$0xff]  }
 0x1eb   :  { %4548 = vmatprep.subr.bf16.mxu0 %v6474_v58 }
 0x1ed   :  { %2401 = vmatpush1.bf16.msra.mxu1 %v6431_v59 }
 0x1ee   :  { %5724 = vmatprep.subr.bf16.mxu1 %v6440_v60  ;;  %4549 = vmatpush1.bf16.msra.mxu0 %v6472_v61  ;;  %v6495_v60 = vld [vmem:[#allocation8 + $0x290] ss:$12 sps:$4 sm:$0xff]   ;;  %v432_v61 = vrot.slane %v7174_v49, %v7137_v44 }
 0x1ef   :  { %4550 = vmatprep.subr.bf16.mxu0 %v6479_v62 }
 0x1f0   :  { %2419 = vmatmul.mubr.bf16.vlgmr.msra.gmra.mrb[12].mxu1 %v7128_v35  ;;  %v6456_v35 = vld [vmem:[#allocation8 + $0x50] ss:$12 sps:$4 sm:$0xff]  }
 0x1f1   :  { %5725 = vmatpush3.bf16.msra.mxu1 %v6441_v0  ;;  %4771 = vmatprep.mubr.bf16.mxu1 %v7152_v36  ;;  %v7165_v36 = vsub.s32 2, %v7132_v40 }
 0x1f2   :  { %5726 = vmatprep.subr.bf16.mxu1 %v6445_v1  ;;  %4551 = vmatpush1.bf16.msra.mxu0 %v6477_v2  ;;  %v436_v1 = vrot.slane %v7174_v49, %v7140_v5 }
 0x1f3   :  { %4552 = vmatprep.subr.bf16.mxu0 %v6484_v16  ;;  %v408_v17 = vrot.slane %v7134_v43, %v7165_v36 }
 0x1f5   :  { %5727 = vmatpush3.bf16.msra.mxu1 %v6446_v3 }
 0x1f6   :  { %5728 = vmatprep.subr.bf16.mxu1 %v6450_v55  ;;  %4553 = vmatpush1.bf16.msra.mxu0 %v6482_v4  ;;  %v6496_v55 = vld [vmem:[#allocation8 + $0x1d0] ss:$12 sps:$4 sm:$0xff]  }
 0x1f7   :  { %4554 = vmatprep.subr.bf16.mxu0 %v6489_v6 }
 0x1f9   :  { %5729 = vmatpush3.bf16.msra.mxu1 %v6451_v8  ;;  %v6492_v8 = vld [vmem:[#allocation8 + $0x300] ss:$12 sps:$4 sm:$0xff]  }
 0x1fa   :  { %5730 = vmatprep.subr.bf16.mxu1 %v6455_v9  ;;  %4555 = vmatpush1.bf16.msra.mxu0 %v6487_v10 }
 0x1fb   :  { %4567 = vmatprep.subr.bf16.mxu0 %v6494_v11  ;;  %v6499_v11 = vld [vmem:[#allocation8 + $0x31c] ss:$12 sps:$4 sm:$0xff]  }
 0x1fd   :  { %5731 = vmatpush3.bf16.msra.mxu1 %v6456_v35  ;;  %v6500_v35 = vld [vmem:[#allocation8 + $0x2a8] ss:$12 sps:$4 sm:$0xff]  }
 0x1fe   :  { %5732 = vmatprep.subr.bf16.mxu1 %v6460_v12 }
 0x201   :  { %5733 = vmatpush3.bf16.msra.mxu1 %v6461_v13 }
 0x202   :  { %5734 = vmatprep.subr.bf16.mxu1 %v6465_v15 }
 0x203   :  { %v2076_v21 = vpop.f32.mrb[4].mxu1 }
 0x204   :  { %v5860_v22 = vadd.f32 %v2076_v21, %v408_v17  ;;  %v2078_v23 = vpop.f32.mrb[5].mxu1 }
 0x205   :  { %v5861_v24 = vadd.f32 %v2078_v23, %v412_v18  ;;  %v2080_v26 = vpop.f32.mrb[6].mxu1  ;;  %5735 = vmatpush3.bf16.msra.mxu1 %v6466_v19  ;;  %v6501_v19 = vld [vmem:[#allocation8 + $0x1e8] ss:$12 sps:$4 sm:$0xff]   ;;  %v6505_v23 = vld [vmem:[#allocation8 + $0x2c0] ss:$12 sps:$4 sm:$0xff]  }
 0x206   :  { %v2455_v28 = vmul.f32 0.70710677, %v5860_v22  ;;  %v5862_v29 = vadd.f32 %v2080_v26, %v408_v17  ;;  %v2082_v31 = vpop.f32.mrb[7].mxu1  ;;  %5736 = vmatprep.subr.bf16.mxu1 %v6470_v20  ;;  %v2431_v53 = vmul.f32 0.5, %v5860_v22  ;;  %v6497_v22 = vld [vmem:[#allocation8 + $0x318] ss:$12 sps:$4 sm:$0xff]  }
 0x207   :  { %v2456_v37 = vmul.f32 0.70710677, %v5861_v24  ;;  %v5863_v38 = vadd.f32 %v2082_v31, %v412_v18  ;;  %v2432_v58 = vmul.f32 0.5, %v5861_v24  ;;  %v6504_v26 = vld [vmem:[#allocation8 + $0x334] ss:$12 sps:$4 sm:$0xff]  }
 0x208   :  { %6774 = verf.f32 %v2455_v28  ;;  %v2467_v39 = vmul.f32 0.70710677, %v5862_v29  ;;  %v2443_v54 = vmul.f32 0.5, %v5862_v29  ;;  %v6506_v28 = vld [vmem:[#allocation8 + $0x200] ss:$12 sps:$4 sm:$0xff]  }
 0x209   :  { %6776 = verf.f32 %v2456_v37  ;;  %v2468_v43 = vmul.f32 0.70710677, %v5863_v38  ;;  %5737 = vmatpush3.bf16.msra.mxu1 %v6471_v27  ;;  %v2444_v59 = vmul.f32 0.5, %v5863_v38  ;;  %v6502_v29 = vld [vmem:[#allocation8 + $0x330] ss:$12 sps:$4 sm:$0xff]  }
 0x20a   :  { %6778 = verf.f32 %v2467_v39  ;;  %5738 = vmatprep.subr.bf16.mxu1 %v6475_v34  ;;  %v2334_v4 = vpop.f32.mrb[4].mxu0  ;;  %v6510_v31 = vld [vmem:[#allocation8 + $0x2d8] ss:$12 sps:$4 sm:$0xff]   ;;  %v6507_v38 = vld [vmem:[#allocation8 + $0x348] ss:$12 sps:$4 sm:$0xff]  }
 0x20b   :  { %6780 = verf.f32 %v2468_v43  ;;  %v5872_v9 = vadd.f32 %v2334_v4, %v432_v61  ;;  %v2336_v10 = vpop.f32.mrb[5].mxu0  ;;  %v6509_v34 = vld [vmem:[#allocation8 + $0x34c] ss:$12 sps:$4 sm:$0xff]   ;;  %v6515_v39 = vld [vmem:[#allocation8 + $0x2f0] ss:$12 sps:$4 sm:$0xff]  }
 0x20c   :  { %v5873_v12 = vadd.f32 %v2336_v10, %v436_v1  ;;  %v2338_v13 = vpop.f32.mrb[6].mxu0  ;;  %v6511_v37 = vld [vmem:[#allocation8 + $0x218] ss:$12 sps:$4 sm:$0xff]   ;;  %v6522_v4 = vld [vmem:[#allocation8 + $0x390] ss:$12 sps:$4 sm:$0xff]  }
 0x20d   :  { %5739 = vmatpush3.bf16.msra.mxu1 %v6476_v25  ;;  %v2461_v15 = vmul.f32 0.70710677, %v5872_v9  ;;  %v5874_v17 = vadd.f32 %v2338_v13, %v432_v61  ;;  %v2340_v18 = vpop.f32.mrb[7].mxu0  ;;  %v6514_v43 = vld [vmem:[#allocation8 + $0x364] ss:$12 sps:$4 sm:$0xff]   ;;  %v2437_v25 = vmul.f32 0.5, %v5872_v9 }
 0x20e   :  { %5746 = vmatprep.subr.bf16.mxu1 %v6480_v41  ;;  %v2462_v20 = vmul.f32 0.70710677, %v5873_v12  ;;  %v5875_v21 = vadd.f32 %v2340_v18, %v436_v1  ;;  %v6517_v61 = vld [vmem:[#allocation8 + $0x378] ss:$12 sps:$4 sm:$0xff]   ;;  %v6524_v1 = vld [vmem:[#allocation8 + $0x394] ss:$12 sps:$4 sm:$0xff]  }
 0x20f   :  { %6782 = verf.f32 %v2461_v15  ;;  %v2473_v24 = vmul.f32 0.70710677, %v5874_v17  ;;  %v6531_v9 = vld [vmem:[#allocation8 + $0x338] ss:$12 sps:$4 sm:$0xff]   ;;  %v6527_v10 = vld [vmem:[#allocation8 + $0x3a8] ss:$12 sps:$4 sm:$0xff]  }
 0x210   :  { %4772 = vmatmul.mubr.bf16.vlgmr.msra.gmra.mrb[16].mxu1 %v7150_v33  ;;  %6784 = verf.f32 %v2462_v20  ;;  %v2474_v27 = vmul.f32 0.70710677, %v5875_v21  ;;  %v6539_v13 = vld [vmem:[#allocation8 + $0x3dc] ss:$12 sps:$4 sm:$0xff]   ;;  %v6545_v18 = vld [vmem:[#allocation8 + $0x440] ss:$12 sps:$4 sm:$0xff]  }
 0x211   :  { %5747 = vmatpush3.bf16.msra.mxu1 %v6481_v42  ;;  %6786 = verf.f32 %v2473_v24  ;;  %v2438_v42 = vmul.f32 0.5, %v5873_v12  ;;  %v6532_v12 = vld [vmem:[#allocation8 + $0x3c0] ss:$12 sps:$4 sm:$0xff]   ;;  %v6541_v15 = vld [vmem:[#allocation8 + $0x368] ss:$12 sps:$4 sm:$0xff]  }
 0x212   :  { %v6775_v63 = vpop.eup %6774  ;;  %5748 = vmatprep.subr.bf16.mxu1 %v6485_v7  ;;  %6788 = verf.f32 %v2474_v27  ;;  %v6546_v20 = vld [vmem:[#allocation8 + $0x380] ss:$12 sps:$4 sm:$0xff]   ;;  %v6551_v24 = vld [vmem:[#allocation8 + $0x398] ss:$12 sps:$4 sm:$0xff]   ;;  %v6555_v27 = vld [vmem:[#allocation8 + $0x470] ss:$12 sps:$4 sm:$0xff]  }
 0x213   :  { %v6777_v47 = vpop.eup %6776  ;;  %v2503_v48 = vadd.f32 1.0, %v6775_v63 }
 0x214   :  { %v6779_v50 = vpop.eup %6778  ;;  %v2504_v51 = vadd.f32 1.0, %v6777_v47 }
 0x215   :  { %v6781_v52 = vpop.eup %6780  ;;  %v2515_v56 = vadd.f32 1.0, %v6779_v50  ;;  %5749 = vmatpush3.bf16.msra.mxu1 %v6486_v45  ;;  %v2527_v62 = vmul.f32 %v2503_v48, %v2431_v53  ;;  %v6516_v45 = vld [vmem:[#allocation8 + $0x230] ss:$12 sps:$4 sm:$0xff]   ;;  %v6512_v48 = vld [vmem:[#allocation8 + $0x360] ss:$12 sps:$4 sm:$0xff]  }
 0x216   :  { %v2516_v33 = vadd.f32 1.0, %v6781_v52  ;;  %5750 = vmatprep.subr.bf16.mxu1 %v6490_v46  ;;  %v2528_v2 = vmul.f32 %v2504_v51, %v2432_v58  ;;  %v2449_v46 = vmul.f32 0.5, %v5874_v17  ;;  %v6520_v50 = vld [vmem:[#allocation8 + $0x3c8] ss:$12 sps:$4 sm:$0xff]   ;;  %v2450_v52 = vmul.f32 0.5, %v5875_v21 }
 0x217   :  { %v2539_v0 = vmul.f32 %v2515_v56, %v2443_v54  ;;  %v6519_v54 = vld [vmem:[#allocation8 + $0x37c] ss:$12 sps:$4 sm:$0xff]   ;;  %v6537_v17 = vld [vmem:[#allocation8 + $0x3d8] ss:$12 sps:$4 sm:$0xff]  }
 0x218   :  { %v2540_v16 = vmul.f32 %v2516_v33, %v2444_v59  ;;  %v6521_v33 = vld [vmem:[#allocation8 + $0x308] ss:$12 sps:$4 sm:$0xff]   ;;  %v6542_v21 = vld [vmem:[#allocation8 + $0x3f0] ss:$12 sps:$4 sm:$0xff]  }
 0x219   :  { %v7180_v3 = vpack.c.bf16 %v2539_v0, %v2527_v62  ;;  %5751 = vmatpush3.bf16.msra.mxu1 %v6491_v57  ;;  %v6783_v41 = vpop.eup %6782  ;;  %v6525_v62 = vld [vmem:[#allocation8 + $0x3e0] ss:$12 sps:$4 sm:$0xff]  }
 0x21a   :  { %v2552_v6 = vpack.c.bf16 %v2540_v16, %v2528_v2  ;;  %5752 = vmatprep.subr.bf16.mxu1 %v6495_v60  ;;  %v6785_v7 = vpop.eup %6784  ;;  %v2509_v63 = vadd.f32 1.0, %v6783_v41  ;;  %v6575_v41 = vld [vmem:[#allocation8 + $0x4a0] ss:$12 sps:$4 sm:$0xff]  }
 0x21b   :  { %v6787_v47 = vpop.eup %6786  ;;  %v2510_v51 = vadd.f32 1.0, %v6785_v7  ;;  %v6579_v7 = vld [vmem:[#allocation8 + $0x578] ss:$12 sps:$4 sm:$0xff]  }
 0x21c   :  { %4556 = vmatprep.mubr.bf16.mxu0 %v2552_v6  ;;  %4812 = vmatprep.mubr.bf16.mxu1 %v2552_v6  ;;  %v6789_v53 = vpop.eup %6788  ;;  %v2533_v56 = vmul.f32 %v2509_v63, %v2437_v25  ;;  %v2521_v57 = vadd.f32 1.0, %v6787_v47  ;;  %v6530_v6 = vld [vmem:[#allocation8 + $0x3f8] ss:$12 sps:$4 sm:$0xff]   ;;  %v6562_v25 = vld [vmem:[#allocation8 + $0x454] ss:$12 sps:$4 sm:$0xff]  }
 0x21d   :  { %4557 = vmatmul.mubr.bf16.vlgmr.msra.gmra.mrb[8].mxu0 %v7180_v3  ;;  %5753 = vmatpush3.bf16.msra.mxu1 %v6496_v55  ;;  %v2534_v58 = vmul.f32 %v2510_v51, %v2438_v42  ;;  %v2522_v59 = vadd.f32 1.0, %v6789_v53  ;;  %v6526_v55 = vld [vmem:[#allocation8 + $0x320] ss:$12 sps:$4 sm:$0xff]   ;;  %v6560_v42 = vld [vmem:[#allocation8 + $0x450] ss:$12 sps:$4 sm:$0xff]  }
 0x21e   :  { %4568 = vmatpush1.bf16.msra.mxu0 %v6492_v8  ;;  %4599 = vmatprep.mubr.bf16.mxu0 %v7159_v32  ;;  %v2545_v60 = vmul.f32 %v2521_v57, %v2449_v46  ;;  %v6529_v8 = vld [vmem:[#allocation8 + $0x3ac] ss:$12 sps:$4 sm:$0xff]   ;;  %v6563_v46 = vld [vmem:[#allocation8 + $0x468] ss:$12 sps:$4 sm:$0xff]   ;;  %v6584_v47 = vld [vmem:[#allocation8 + $0x590] ss:$12 sps:$4 sm:$0xff]  }
 0x21f   :  { %4569 = vmatprep.subr.bf16.mxu0 %v6499_v11  ;;  %5754 = vmatprep.subr.bf16.mxu1 %v6500_v35  ;;  %v2546_v0 = vmul.f32 %v2522_v59, %v2450_v52  ;;  %v6535_v11 = vld [vmem:[#allocation8 + $0x410] ss:$12 sps:$4 sm:$0xff]   ;;  %v6580_v63 = vld [vmem:[#allocation8 + $0x4b8] ss:$12 sps:$4 sm:$0xff]   ;;  %v6566_v51 = vld [vmem:[#allocation8 + $0x480] ss:$12 sps:$4 sm:$0xff]  }
 0x220   :  { %v7184_v2 = vpack.c.bf16 %v2545_v60, %v2533_v56  ;;  %v6536_v35 = vld [vmem:[#allocation8 + $0x350] ss:$12 sps:$4 sm:$0xff]   ;;  %v6589_v52 = vld [vmem:[#allocation8 + $0x5a8] ss:$12 sps:$4 sm:$0xff]   ;;  %v427_v56 = vsub.s32 7, %v7132_v40 }
 0x221   :  { %5755 = vmatpush3.bf16.msra.mxu1 %v6501_v19  ;;  %v7187_v16 = vpack.c.bf16 %v2546_v0, %v2534_v58  ;;  %v6544_v19 = vld [vmem:[#allocation8 + $0x3f4] ss:$12 sps:$4 sm:$0xff]   ;;  %v6573_v53 = vld [vmem:[#allocation8 + $0x49c] ss:$12 sps:$4 sm:$0xff]   ;;  %v6571_v58 = vld [vmem:[#allocation8 + $0x498] ss:$12 sps:$4 sm:$0xff]  }
 0x222   :  { %4570 = vmatpush1.bf16.msra.mxu0 %v6497_v22  ;;  %5756 = vmatprep.subr.bf16.mxu1 %v6505_v23  ;;  %v6550_v22 = vld [vmem:[#allocation8 + $0x458] ss:$12 sps:$4 sm:$0xff]   ;;  %v6590_v57 = vld [vmem:[#allocation8 + $0x4e8] ss:$12 sps:$4 sm:$0xff]   ;;  %v6594_v59 = vld [vmem:[#allocation8 + $0x5c0] ss:$12 sps:$4 sm:$0xff]  }
 0x223   :  { %4571 = vmatprep.subr.bf16.mxu0 %v6504_v26  ;;  %v6549_v23 = vld [vmem:[#allocation8 + $0x40c] ss:$12 sps:$4 sm:$0xff]   ;;  %v6547_v26 = vld [vmem:[#allocation8 + $0x408] ss:$12 sps:$4 sm:$0xff]  }
 0x224   :  { %v6813_v60 = vld [vmem:[#allocation7] sm:$0xff]  ;;  %v6595_v0 = vld [vmem:[#allocation8 + $0x500] ss:$12 sps:$4 sm:$0xff]  }
 0x225   :  { %5757 = vmatpush3.bf16.msra.mxu1 %v6506_v28  ;;  %v6554_v28 = vld [vmem:[#allocation8 + $0x424] ss:$12 sps:$4 sm:$0xff]  }
 0x226   :  { %4572 = vmatpush1.bf16.msra.mxu0 %v6502_v29  ;;  %5758 = vmatprep.subr.bf16.mxu1 %v6510_v31  ;;  %v6556_v29 = vld [vmem:[#allocation8 + $0x3b0] ss:$12 sps:$4 sm:$0xff]   ;;  %v6552_v31 = vld [vmem:[#allocation8 + $0x420] ss:$12 sps:$4 sm:$0xff]  }
 0x227   :  { %4573 = vmatprep.subr.bf16.mxu0 %v6509_v34  ;;  %v6569_v34 = vld [vmem:[#allocation8 + $0x548] ss:$12 sps:$4 sm:$0xff]  }
 0x229   :  { %5759 = vmatpush3.bf16.msra.mxu1 %v6511_v37  ;;  %v6559_v37 = vld [vmem:[#allocation8 + $0x43c] ss:$12 sps:$4 sm:$0xff]  }
 0x22a   :  { %4574 = vmatpush1.bf16.msra.mxu0 %v6507_v38  ;;  %5760 = vmatprep.subr.bf16.mxu1 %v6515_v39  ;;  %v6570_v38 = vld [vmem:[#allocation8 + $0x488] ss:$12 sps:$4 sm:$0xff]   ;;  %v6557_v39 = vld [vmem:[#allocation8 + $0x438] ss:$12 sps:$4 sm:$0xff]  }
 0x22b   :  { %4575 = vmatprep.subr.bf16.mxu0 %v6514_v43  ;;  %v6574_v43 = vld [vmem:[#allocation8 + $0x560] ss:$12 sps:$4 sm:$0xff]  }
 0x22d   :  { %5761 = vmatpush3.bf16.msra.mxu1 %v6516_v45  ;;  %v6565_v45 = vld [vmem:[#allocation8 + $0x46c] ss:$12 sps:$4 sm:$0xff]  }
 0x22e   :  { %4576 = vmatpush1.bf16.msra.mxu0 %v6512_v48  ;;  %5768 = vmatprep.subr.bf16.mxu1 %v6520_v50  ;;  %v6568_v48 = vld [vmem:[#allocation8 + $0x484] ss:$12 sps:$4 sm:$0xff]  }
 0x22f   :  { %4577 = vmatprep.subr.bf16.mxu0 %v6519_v54  ;;  %v6585_v50 = vld [vmem:[#allocation8 + $0x4d0] ss:$12 sps:$4 sm:$0xff]   ;;  %v423_v54 = vsub.s32 6, %v7132_v40 }
 0x230   :  { %4813 = vmatmul.mubr.bf16.vlgmr.msra.gmra.mrb[20].mxu1 %v7180_v3  ;;  %v6534_v3 = vld [vmem:[#allocation8 + $0x3c4] ss:$12 sps:$4 sm:$0xff]  }
 0x231   :  { %5769 = vmatpush3.bf16.msra.mxu1 %v6521_v33  ;;  %4853 = vmatprep.mubr.bf16.mxu1 %v7159_v32  ;;  %v6540_v32 = vld [vmem:[#allocation8 + $0x428] ss:$12 sps:$4 sm:$0xff]   ;;  %v6692_v40 = vld [vmem:[#allocation8 + $0x724] ss:$12 sps:$4 sm:$0xff]  }
 0x232   :  { %4578 = vmatpush1.bf16.msra.mxu0 %v6517_v61  ;;  %5770 = vmatprep.subr.bf16.mxu1 %v6525_v62  ;;  %v6578_v33 = vld [vmem:[#allocation8 + $0x4b4] ss:$12 sps:$4 sm:$0xff]   ;;  %v424_v61 = vrot.slane %v6813_v60, %v423_v54  ;;  %v428_v62 = vrot.slane %v6813_v60, %v427_v56 }
 0x233   :  { %4579 = vmatprep.subr.bf16.mxu0 %v6524_v1  ;;  %v6576_v1 = vld [vmem:[#allocation8 + $0x4b0] ss:$12 sps:$4 sm:$0xff]   ;;  %v6606_v54 = vld [vmem:[#allocation8 + $0x540] ss:$12 sps:$4 sm:$0xff]  }
 0x234   :  { %v6615_v60 = vld [vmem:[#allocation8 + $0x620] ss:$12 sps:$4 sm:$0xff]  }
 0x235   :  { %5771 = vmatpush3.bf16.msra.mxu1 %v6526_v55  ;;  %v6599_v55 = vld [vmem:[#allocation8 + $0x5d8] ss:$12 sps:$4 sm:$0xff]  }
 0x236   :  { %4580 = vmatpush1.bf16.msra.mxu0 %v6522_v4  ;;  %5772 = vmatprep.subr.bf16.mxu1 %v6530_v6  ;;  %v6583_v4 = vld [vmem:[#allocation8 + $0x4cc] ss:$12 sps:$4 sm:$0xff]  }
 0x237   :  { %4581 = vmatprep.subr.bf16.mxu0 %v6529_v8 }
 0x239   :  { %5773 = vmatpush3.bf16.msra.mxu1 %v6531_v9 }
 0x23a   :  { %4582 = vmatpush1.bf16.msra.mxu0 %v6527_v10  ;;  %5774 = vmatprep.subr.bf16.mxu1 %v6535_v11  ;;  %v6581_v11 = vld [vmem:[#allocation8 + $0x4c8] ss:$12 sps:$4 sm:$0xff]  }
 0x23b   :  { %4583 = vmatprep.subr.bf16.mxu0 %v6534_v3  ;;  %v6600_v3 = vld [vmem:[#allocation8 + $0x518] ss:$12 sps:$4 sm:$0xff]  }
 0x23d   :  { %5775 = vmatpush3.bf16.msra.mxu1 %v6536_v35 }
 0x23e   :  { %4584 = vmatpush1.bf16.msra.mxu0 %v6532_v12  ;;  %5776 = vmatprep.subr.bf16.mxu1 %v6540_v32 }
 0x23f   :  { %4585 = vmatprep.subr.bf16.mxu0 %v6539_v13  ;;  %v6604_v13 = vld [vmem:[#allocation8 + $0x5f0] ss:$12 sps:$4 sm:$0xff]  }
 0x241   :  { %5777 = vmatpush3.bf16.msra.mxu1 %v6541_v15 }
 0x242   :  { %4586 = vmatpush1.bf16.msra.mxu0 %v6537_v17  ;;  %5778 = vmatprep.subr.bf16.mxu1 %v6545_v18  ;;  %v6588_v18 = vld [vmem:[#allocation8 + $0x4e4] ss:$12 sps:$4 sm:$0xff]  }
 0x243   :  { %4587 = vmatprep.subr.bf16.mxu0 %v6544_v19 }
 0x245   :  { %5779 = vmatpush3.bf16.msra.mxu1 %v6546_v20 }
 0x246   :  { %4588 = vmatpush1.bf16.msra.mxu0 %v6542_v21  ;;  %5780 = vmatprep.subr.bf16.mxu1 %v6550_v22  ;;  %v6605_v21 = vld [vmem:[#allocation8 + $0x530] ss:$12 sps:$4 sm:$0xff]   ;;  %v6586_v22 = vld [vmem:[#allocation8 + $0x4e0] ss:$12 sps:$4 sm:$0xff]  }
 0x247   :  { %4589 = vmatprep.subr.bf16.mxu0 %v6549_v23  ;;  %v6609_v23 = vld [vmem:[#allocation8 + $0x6c8] ss:$12 sps:$4 sm:$0xff]  }
 0x249   :  { %5781 = vmatpush3.bf16.msra.mxu1 %v6551_v24  ;;  %v6593_v24 = vld [vmem:[#allocation8 + $0x4fc] ss:$12 sps:$4 sm:$0xff]  }
 0x24a   :  { %4590 = vmatpush1.bf16.msra.mxu0 %v6547_v26  ;;  %5782 = vmatprep.subr.bf16.mxu1 %v6555_v27  ;;  %v6591_v26 = vld [vmem:[#allocation8 + $0x4f8] ss:$12 sps:$4 sm:$0xff]   ;;  %v6598_v27 = vld [vmem:[#allocation8 + $0x514] ss:$12 sps:$4 sm:$0xff]  }
 0x24b   :  { %4591 = vmatprep.subr.bf16.mxu0 %v6554_v28 }
 0x24d   :  { %5783 = vmatpush3.bf16.msra.mxu1 %v6556_v29  ;;  %v6596_v29 = vld [vmem:[#allocation8 + $0x510] ss:$12 sps:$4 sm:$0xff]  }
 0x24e   :  { %4592 = vmatpush1.bf16.msra.mxu0 %v6552_v31  ;;  %5790 = vmatprep.subr.bf16.mxu1 %v6569_v34 }
 0x24f   :  { %4593 = vmatprep.subr.bf16.mxu0 %v6559_v37  ;;  %v6603_v37 = vld [vmem:[#allocation8 + $0x52c] ss:$12 sps:$4 sm:$0xff]  }
 0x250   :  { %4854 = vmatmul.mubr.bf16.vlgmr.msra.gmra.mrb[24].mxu1 %v7156_v30 }
 0x251   :  { %5791 = vmatpush3.bf16.msra.mxu1 %v6570_v38 }
 0x252   :  { %4594 = vmatpush1.bf16.msra.mxu0 %v6557_v39  ;;  %5792 = vmatprep.subr.bf16.mxu1 %v6574_v43 }
 0x253   :  { %4595 = vmatprep.subr.bf16.mxu0 %v6562_v25 }
 0x255   :  { %5793 = vmatpush3.bf16.msra.mxu1 %v6575_v41 }
 0x256   :  { %4596 = vmatpush1.bf16.msra.mxu0 %v6560_v42  ;;  %5794 = vmatprep.subr.bf16.mxu1 %v6579_v7 }
 0x257   :  { %4597 = vmatprep.subr.bf16.mxu0 %v6565_v45 }
 0x259   :  { %5795 = vmatpush3.bf16.msra.mxu1 %v6580_v63 }
 0x25a   :  { %4598 = vmatpush1.bf16.msra.mxu0 %v6563_v46  ;;  %5796 = vmatprep.subr.bf16.mxu1 %v6584_v47  ;;  %v6601_v46 = vld [vmem:[#allocation8 + $0x528] ss:$12 sps:$4 sm:$0xff]  }
 0x25b   :  { %4610 = vmatprep.subr.bf16.mxu0 %v6568_v48 }
 0x25d   :  { %4600 = vmatmul.mubr.bf16.vlgmr.msra.gmra.mrb[8].mxu0 %v7156_v30  ;;  %5797 = vmatpush3.bf16.msra.mxu1 %v6585_v50  ;;  %v6608_v50 = vld [vmem:[#allocation8 + $0x544] ss:$12 sps:$4 sm:$0xff]  }
 0x25e   :  { %4611 = vmatpush1.bf16.msra.mxu0 %v6566_v51  ;;  %5798 = vmatprep.subr.bf16.mxu1 %v6589_v52 }
 0x25f   :  { %4612 = vmatprep.subr.bf16.mxu0 %v6573_v53 }
 0x261   :  { %5799 = vmatpush3.bf16.msra.mxu1 %v6590_v57  ;;  %v6610_v57 = vld [vmem:[#allocation8 + $0x608] ss:$12 sps:$4 sm:$0xff]  }
 0x262   :  { %4613 = vmatpush1.bf16.msra.mxu0 %v6571_v58  ;;  %5800 = vmatprep.subr.bf16.mxu1 %v6594_v59  ;;  %v6613_v58 = vld [vmem:[#allocation8 + $0x55c] ss:$12 sps:$4 sm:$0xff]   ;;  %v6614_v59 = vld [vmem:[#allocation8 + $0x6e0] ss:$12 sps:$4 sm:$0xff]  }
 0x263   :  { %v2248_v30 = vpop.f32.mrb[8].mxu1  ;;  %4614 = vmatprep.subr.bf16.mxu0 %v6578_v33  ;;  %v6611_v33 = vld [vmem:[#allocation8 + $0x558] ss:$12 sps:$4 sm:$0xff]  }
 0x264   :  { %v5868_v6 = vadd.f32 %v2248_v30, %v424_v61  ;;  %v2250_v8 = vpop.f32.mrb[9].mxu1  ;;  %v6624_v30 = vld [vmem:[#allocation8 + $0x710] ss:$12 sps:$4 sm:$0xff]  }
 0x265   :  { %v5869_v9 = vadd.f32 %v2250_v8, %v428_v62  ;;  %v2252_v10 = vpop.f32.mrb[10].mxu1  ;;  %5801 = vmatpush3.bf16.msra.mxu1 %v6595_v0  ;;  %v6616_v0 = vld [vmem:[#allocation8 + $0x570] ss:$12 sps:$4 sm:$0xff]  }
 0x266   :  { %v2459_v35 = vmul.f32 0.70710677, %v5868_v6  ;;  %v5870_v12 = vadd.f32 %v2252_v10, %v424_v61  ;;  %4615 = vmatpush1.bf16.msra.mxu0 %v6576_v1  ;;  %v2254_v32 = vpop.f32.mrb[11].mxu1  ;;  %5802 = vmatprep.subr.bf16.mxu1 %v6599_v55  ;;  %v2435_v25 = vmul.f32 0.5, %v5868_v6  ;;  %v6618_v61 = vld [vmem:[#allocation8 + $0x574] ss:$12 sps:$4 sm:$0xff]  }
 0x267   :  { %v2460_v15 = vmul.f32 0.70710677, %v5869_v9  ;;  %v5871_v17 = vadd.f32 %v2254_v32, %v428_v62  ;;  %4616 = vmatprep.subr.bf16.mxu0 %v6583_v4  ;;  %v2436_v7 = vmul.f32 0.5, %v5869_v9  ;;  %v6619_v62 = vld [vmem:[#allocation8 + $0x6f8] ss:$12 sps:$4 sm:$0xff]  }
 0x268   :  { %6790 = verf.f32 %v2459_v35  ;;  %v2471_v19 = vmul.f32 0.70710677, %v5870_v12  ;;  %v2447_v41 = vmul.f32 0.5, %v5870_v12  ;;  %v6620_v1 = vld [vmem:[#allocation8 + $0x638] ss:$12 sps:$4 sm:$0xff]  }
 0x269   :  { %6792 = verf.f32 %v2460_v15  ;;  %v2472_v20 = vmul.f32 0.70710677, %v5871_v17  ;;  %5803 = vmatpush3.bf16.msra.mxu1 %v6600_v3  ;;  %v2448_v45 = vmul.f32 0.5, %v5871_v17  ;;  %v6623_v55 = vld [vmem:[#allocation8 + $0x58c] ss:$12 sps:$4 sm:$0xff]  }
 0x26a   :  { %6794 = verf.f32 %v2471_v19  ;;  %4617 = vmatpush1.bf16.msra.mxu0 %v6581_v11  ;;  %5804 = vmatprep.subr.bf16.mxu1 %v6604_v13  ;;  %v6621_v4 = vld [vmem:[#allocation8 + $0x588] ss:$12 sps:$4 sm:$0xff]   ;;  %v6625_v6 = vld [vmem:[#allocation8 + $0x650] ss:$12 sps:$4 sm:$0xff]   ;;  %v6626_v10 = vld [vmem:[#allocation8 + $0x5a0] ss:$12 sps:$4 sm:$0xff]  }
 0x26b   :  { %6796 = verf.f32 %v2472_v20  ;;  %4618 = vmatprep.subr.bf16.mxu0 %v6588_v18  ;;  %v6628_v8 = vld [vmem:[#allocation8 + $0x5a4] ss:$12 sps:$4 sm:$0xff]   ;;  %v6629_v9 = vld [vmem:[#allocation8 + $0x728] ss:$12 sps:$4 sm:$0xff]   ;;  %v6634_v35 = vld [vmem:[#allocation8 + $0x740] ss:$12 sps:$4 sm:$0xff]  }
 0x26c   :  { %v6630_v11 = vld [vmem:[#allocation8 + $0x668] ss:$12 sps:$4 sm:$0xff]   ;;  %v6631_v12 = vld [vmem:[#allocation8 + $0x5b8] ss:$12 sps:$4 sm:$0xff]   ;;  %v6635_v32 = vld [vmem:[#allocation8 + $0x680] ss:$12 sps:$4 sm:$0xff]  }
 0x26d   :  { %5805 = vmatpush3.bf16.msra.mxu1 %v6605_v21  ;;  %v6633_v3 = vld [vmem:[#allocation8 + $0x5bc] ss:$12 sps:$4 sm:$0xff]   ;;  %v6638_v13 = vld [vmem:[#allocation8 + $0x5d4] ss:$12 sps:$4 sm:$0xff]   ;;  %v6639_v15 = vld [vmem:[#allocation8 + $0x758] ss:$12 sps:$4 sm:$0xff]  }
 0x26e   :  { %4619 = vmatpush1.bf16.msra.mxu0 %v6586_v22  ;;  %5812 = vmatprep.subr.bf16.mxu1 %v6609_v23  ;;  %v6636_v17 = vld [vmem:[#allocation8 + $0x5d0] ss:$12 sps:$4 sm:$0xff]   ;;  %v6640_v18 = vld [vmem:[#allocation8 + $0x698] ss:$12 sps:$4 sm:$0xff]   ;;  %v6641_v21 = vld [vmem:[#allocation8 + $0x5e8] ss:$12 sps:$4 sm:$0xff]  }
 0x26f   :  { %4620 = vmatprep.subr.bf16.mxu0 %v6593_v24  ;;  %v6643_v19 = vld [vmem:[#allocation8 + $0x5ec] ss:$12 sps:$4 sm:$0xff]   ;;  %v6644_v20 = vld [vmem:[#allocation8 + $0x770] ss:$12 sps:$4 sm:$0xff]   ;;  %v6673_v24 = vld [vmem:[#allocation8 + $0x848] ss:$12 sps:$4 sm:$0xff]  }
 0x270   :  { %v6645_v22 = vld [vmem:[#allocation8 + $0x6b0] ss:$12 sps:$4 sm:$0xff]  }
 0x271   :  { %v6648_v23 = vld [vmem:[#allocation8 + $0x604] ss:$12 sps:$4 sm:$0xff]  }
 0x272   :  { %v6791_v28 = vpop.eup %6790  ;;  %4621 = vmatpush1.bf16.msra.mxu0 %v6591_v26  ;;  %v6646_v26 = vld [vmem:[#allocation8 + $0x600] ss:$12 sps:$4 sm:$0xff]  }
 0x273   :  { %v6793_v31 = vpop.eup %6792  ;;  %v2507_v34 = vadd.f32 1.0, %v6791_v28  ;;  %4622 = vmatprep.subr.bf16.mxu0 %v6598_v27  ;;  %v6651_v27 = vld [vmem:[#allocation8 + $0x61c] ss:$12 sps:$4 sm:$0xff]  }
 0x274   :  { %v6795_v38 = vpop.eup %6794  ;;  %v2508_v39 = vadd.f32 1.0, %v6793_v31  ;;  %v6674_v28 = vld [vmem:[#allocation8 + $0x788] ss:$12 sps:$4 sm:$0xff]   ;;  %v6649_v31 = vld [vmem:[#allocation8 + $0x618] ss:$12 sps:$4 sm:$0xff]  }
 0x275   :  { %v6797_v43 = vpop.eup %6796  ;;  %v2519_v42 = vadd.f32 1.0, %v6795_v38  ;;  %v2531_v47 = vmul.f32 %v2507_v34, %v2435_v25  ;;  %v6654_v34 = vld [vmem:[#allocation8 + $0x634] ss:$12 sps:$4 sm:$0xff]   ;;  %v6683_v38 = vld [vmem:[#allocation8 + $0x878] ss:$12 sps:$4 sm:$0xff]  }
 0x276   :  { %v2520_v63 = vadd.f32 1.0, %v6797_v43  ;;  %4623 = vmatpush1.bf16.msra.mxu0 %v6596_v29  ;;  %v2532_v51 = vmul.f32 %v2508_v39, %v2436_v7  ;;  %v6678_v29 = vld [vmem:[#allocation8 + $0x860] ss:$12 sps:$4 sm:$0xff]   ;;  %v6652_v39 = vld [vmem:[#allocation8 + $0x630] ss:$12 sps:$4 sm:$0xff]  }
 0x277   :  { %v2543_v48 = vmul.f32 %v2519_v42, %v2447_v41  ;;  %4624 = vmatprep.subr.bf16.mxu0 %v6603_v37  ;;  %v6679_v37 = vld [vmem:[#allocation8 + $0x7a0] ss:$12 sps:$4 sm:$0xff]   ;;  %v6684_v25 = vld [vmem:[#allocation8 + $0x7b8] ss:$12 sps:$4 sm:$0xff]   ;;  %v6688_v41 = vld [vmem:[#allocation8 + $0x890] ss:$12 sps:$4 sm:$0xff]  }
 0x278   :  { %v2544_v52 = vmul.f32 %v2520_v63, %v2448_v45  ;;  %v6657_v43 = vld [vmem:[#allocation8 + $0x64c] ss:$12 sps:$4 sm:$0xff]   ;;  %v6655_v42 = vld [vmem:[#allocation8 + $0x648] ss:$12 sps:$4 sm:$0xff]   ;;  %v6660_v7 = vld [vmem:[#allocation8 + $0x664] ss:$12 sps:$4 sm:$0xff]  }
 0x279   :  { %v7194_v53 = vpack.c.bf16 %v2543_v48, %v2531_v47  ;;  %v6693_v45 = vld [vmem:[#allocation8 + $0x8a8] ss:$12 sps:$4 sm:$0xff]   ;;  %v6658_v63 = vld [vmem:[#allocation8 + $0x660] ss:$12 sps:$4 sm:$0xff]  }
 0x27a   :  { %4625 = vmatpush1.bf16.msra.mxu0 %v6601_v46  ;;  %v2556_v56 = vpack.c.bf16 %v2544_v52, %v2532_v51  ;;  %v6663_v46 = vld [vmem:[#allocation8 + $0x67c] ss:$12 sps:$4 sm:$0xff]   ;;  %v6698_v48 = vld [vmem:[#allocation8 + $0x8c0] ss:$12 sps:$4 sm:$0xff]  }
 0x27b   :  { %4626 = vmatprep.subr.bf16.mxu0 %v6608_v50  ;;  %v6694_v47 = vld [vmem:[#allocation8 + $0x7e8] ss:$12 sps:$4 sm:$0xff]   ;;  %v6661_v50 = vld [vmem:[#allocation8 + $0x678] ss:$12 sps:$4 sm:$0xff]   ;;  %v6699_v52 = vld [vmem:[#allocation8 + $0x800] ss:$12 sps:$4 sm:$0xff]  }
 0x27c   :  { %4642 = vmatprep.mubr.bf16.mxu0 %v2556_v56  ;;  %4894 = vmatprep.mubr.bf16.mxu1 %v2556_v56  ;;  %v6666_v51 = vld [vmem:[#allocation8 + $0x694] ss:$12 sps:$4 sm:$0xff]   ;;  %v6669_v56 = vld [vmem:[#allocation8 + $0x6ac] ss:$12 sps:$4 sm:$0xff]  }
 0x27d   :  { %4895 = vmatmul.mubr.bf16.vlgmr.msra.gmra.mrb[28].mxu1 %v7194_v53 }
 0x27e   :  { %4627 = vmatpush1.bf16.msra.mxu0 %v6606_v54  ;;  %5813 = vmatpush3.bf16.msra.mxu1 %v6610_v57  ;;  %v6664_v54 = vld [vmem:[#allocation8 + $0x690] ss:$12 sps:$4 sm:$0xff]   ;;  %v6704_v57 = vld [vmem:[#allocation8 + $0x818] ss:$12 sps:$4 sm:$0xff]  }
 0x27f   :  { %4935 = vmatprep.mubr.bf16.mxu1 %v7187_v16  ;;  %4628 = vmatprep.subr.bf16.mxu0 %v6613_v58  ;;  %v6708_v58 = vld [vmem:[#allocation8 + $0x8f0] ss:$12 sps:$4 sm:$0xff]  }
 0x280   :  { %5814 = vmatprep.subr.bf16.mxu1 %v6614_v59  ;;  %v6667_v59 = vld [vmem:[#allocation8 + $0x6a8] ss:$12 sps:$4 sm:$0xff]  }
 0x282   :  { %4629 = vmatpush1.bf16.msra.mxu0 %v6611_v33  ;;  %5815 = vmatpush3.bf16.msra.mxu1 %v6615_v60  ;;  %v6672_v33 = vld [vmem:[#allocation8 + $0x6c4] ss:$12 sps:$4 sm:$0xff]  }
 0x283   :  { %4630 = vmatprep.subr.bf16.mxu0 %v6618_v61  ;;  %5816 = vmatprep.subr.bf16.mxu1 %v6619_v62  ;;  %v6709_v60 = vld [vmem:[#allocation8 + $0x830] ss:$12 sps:$4 sm:$0xff]   ;;  %v6670_v61 = vld [vmem:[#allocation8 + $0x6c0] ss:$12 sps:$4 sm:$0xff]  }
 0x284   :  { %v6677_v62 = vld [vmem:[#allocation8 + $0x6dc] ss:$12 sps:$4 sm:$0xff]  }
 0x286   :  { %4631 = vmatpush1.bf16.msra.mxu0 %v6616_v0  ;;  %5817 = vmatpush3.bf16.msra.mxu1 %v6620_v1  ;;  %v6675_v0 = vld [vmem:[#allocation8 + $0x6d8] ss:$12 sps:$4 sm:$0xff]   ;;  %v6682_v1 = vld [vmem:[#allocation8 + $0x6f4] ss:$12 sps:$4 sm:$0xff]  }
 0x287   :  { %4632 = vmatprep.subr.bf16.mxu0 %v6623_v55  ;;  %5818 = vmatprep.subr.bf16.mxu1 %v6624_v30  ;;  %v440_v55 = vrot.slane %v7174_v49, %v7165_v36  ;;  %v444_v30 = vrot.slane %v7174_v49, %v411_v14 }
 0x28a   :  { %4633 = vmatpush1.bf16.msra.mxu0 %v6621_v4  ;;  %5819 = vmatpush3.bf16.msra.mxu1 %v6625_v6  ;;  %v6680_v4 = vld [vmem:[#allocation8 + $0x6f0] ss:$12 sps:$4 sm:$0xff]  }
 0x28b   :  { %4634 = vmatprep.subr.bf16.mxu0 %v6628_v8  ;;  %5820 = vmatprep.subr.bf16.mxu1 %v6629_v9  ;;  %v6687_v8 = vld [vmem:[#allocation8 + $0x70c] ss:$12 sps:$4 sm:$0xff]  }
 0x28e   :  { %4635 = vmatpush1.bf16.msra.mxu0 %v6626_v10  ;;  %5821 = vmatpush3.bf16.msra.mxu1 %v6630_v11 }
 0x28f   :  { %4636 = vmatprep.subr.bf16.mxu0 %v6633_v3  ;;  %5822 = vmatprep.subr.bf16.mxu1 %v6634_v35 }
 0x292   :  { %4637 = vmatpush1.bf16.msra.mxu0 %v6631_v12  ;;  %5823 = vmatpush3.bf16.msra.mxu1 %v6635_v32 }
 0x293   :  { %4638 = vmatprep.subr.bf16.mxu0 %v6638_v13  ;;  %5824 = vmatprep.subr.bf16.mxu1 %v6639_v15  ;;  %v6685_v13 = vld [vmem:[#allocation8 + $0x708] ss:$12 sps:$4 sm:$0xff]  }
 0x296   :  { %4639 = vmatpush1.bf16.msra.mxu0 %v6636_v17  ;;  %5825 = vmatpush3.bf16.msra.mxu1 %v6640_v18  ;;  %v6690_v18 = vld [vmem:[#allocation8 + $0x720] ss:$12 sps:$4 sm:$0xff]  }
 0x297   :  { %4640 = vmatprep.subr.bf16.mxu0 %v6643_v19  ;;  %5826 = vmatprep.subr.bf16.mxu1 %v6644_v20  ;;  %v6697_v19 = vld [vmem:[#allocation8 + $0x73c] ss:$12 sps:$4 sm:$0xff]   ;;  %v6695_v20 = vld [vmem:[#allocation8 + $0x738] ss:$12 sps:$4 sm:$0xff]  }
 0x29a   :  { %4641 = vmatpush1.bf16.msra.mxu0 %v6641_v21  ;;  %5827 = vmatpush3.bf16.msra.mxu1 %v6645_v22  ;;  %v6702_v21 = vld [vmem:[#allocation8 + $0x754] ss:$12 sps:$4 sm:$0xff]  }
 0x29b   :  { %4653 = vmatprep.subr.bf16.mxu0 %v6648_v23  ;;  %5834 = vmatprep.subr.bf16.mxu1 %v6673_v24 }
 0x29d   :  { %4643 = vmatmul.mubr.bf16.vlgmr.msra.gmra.mrb[8].mxu0 %v7194_v53  ;;  %4936 = vmatmul.mubr.bf16.vlgmr.msra.gmra.mrb[32].mxu1 %v7184_v2  ;;  %v6703_v53 = vld [vmem:[#allocation8 + $0x8d8] ss:$12 sps:$4 sm:$0xff]  }
 0x29e   :  { %4654 = vmatpush1.bf16.msra.mxu0 %v6646_v26  ;;  %4685 = vmatprep.mubr.bf16.mxu0 %v7187_v16  ;;  %v6689_v16 = vld [vmem:[#allocation8 + $0x7d0] ss:$12 sps:$4 sm:$0xff]  }
 0x29f   :  { %4655 = vmatprep.subr.bf16.mxu0 %v6651_v27  ;;  %5835 = vmatpush3.bf16.msra.mxu1 %v6674_v28  ;;  %v6700_v26 = vld [vmem:[#allocation8 + $0x750] ss:$12 sps:$4 sm:$0xff]  }
 0x2a0   :  { %5836 = vmatprep.subr.bf16.mxu1 %v6678_v29 }
 0x2a2   :  { %4656 = vmatpush1.bf16.msra.mxu0 %v6649_v31  ;;  %v6707_v31 = vld [vmem:[#allocation8 + $0x76c] ss:$12 sps:$4 sm:$0xff]  }
 0x2a3   :  { %4657 = vmatprep.subr.bf16.mxu0 %v6654_v34  ;;  %5837 = vmatpush3.bf16.msra.mxu1 %v6679_v37 }
 0x2a4   :  { %5838 = vmatprep.subr.bf16.mxu1 %v6683_v38 }
 0x2a6   :  { %4658 = vmatpush1.bf16.msra.mxu0 %v6652_v39 }
 0x2a7   :  { %4659 = vmatprep.subr.bf16.mxu0 %v6657_v43  ;;  %5839 = vmatpush3.bf16.msra.mxu1 %v6684_v25 }
 0x2a8   :  { %5840 = vmatprep.subr.bf16.mxu1 %v6688_v41 }
 0x2aa   :  { %4660 = vmatpush1.bf16.msra.mxu0 %v6655_v42 }
 0x2ab   :  { %4661 = vmatprep.subr.bf16.mxu0 %v6660_v7  ;;  %5841 = vmatpush3.bf16.msra.mxu1 %v6689_v16  ;;  %v6705_v7 = vld [vmem:[#allocation8 + $0x768] ss:$12 sps:$4 sm:$0xff]  }
 0x2ac   :  { %5842 = vmatprep.subr.bf16.mxu1 %v6693_v45  ;;  %v6712_v45 = vld [vmem:[#allocation8 + $0x784] ss:$12 sps:$4 sm:$0xff]  }
 0x2ae   :  { %4662 = vmatpush1.bf16.msra.mxu0 %v6658_v63 }
 0x2af   :  { %4663 = vmatprep.subr.bf16.mxu0 %v6663_v46  ;;  %5843 = vmatpush3.bf16.msra.mxu1 %v6694_v47  ;;  %v6710_v47 = vld [vmem:[#allocation8 + $0x780] ss:$12 sps:$4 sm:$0xff]  }
 0x2b0   :  { %5844 = vmatprep.subr.bf16.mxu1 %v6698_v48 }
 0x2b2   :  { %4664 = vmatpush1.bf16.msra.mxu0 %v6661_v50  ;;  %v6715_v50 = vld [vmem:[#allocation8 + $0x79c] ss:$12 sps:$4 sm:$0xff]  }
 0x2b3   :  { %4665 = vmatprep.subr.bf16.mxu0 %v6666_v51  ;;  %5845 = vmatpush3.bf16.msra.mxu1 %v6699_v52  ;;  %v6713_v51 = vld [vmem:[#allocation8 + $0x798] ss:$12 sps:$4 sm:$0xff]   ;;  %v6718_v52 = vld [vmem:[#allocation8 + $0x7b4] ss:$12 sps:$4 sm:$0xff]  }
 0x2b4   :  { %5846 = vmatprep.subr.bf16.mxu1 %v6703_v53  ;;  %v6716_v53 = vld [vmem:[#allocation8 + $0x7b0] ss:$12 sps:$4 sm:$0xff]  }
 0x2b6   :  { %4666 = vmatpush1.bf16.msra.mxu0 %v6664_v54 }
 0x2b7   :  { %4667 = vmatprep.subr.bf16.mxu0 %v6669_v56  ;;  %5847 = vmatpush3.bf16.msra.mxu1 %v6704_v57  ;;  %v6721_v56 = vld [vmem:[#allocation8 + $0x7cc] ss:$12 sps:$4 sm:$0xff]  }
 0x2b8   :  { %5848 = vmatprep.subr.bf16.mxu1 %v6708_v58 }
 0x2ba   :  { %4668 = vmatpush1.bf16.msra.mxu0 %v6667_v59 }
 0x2bb   :  { %4669 = vmatprep.subr.bf16.mxu0 %v6672_v33  ;;  %5849 = vmatpush3.bf16.msra.mxu1 %v6709_v60  ;;  %v6719_v60 = vld [vmem:[#allocation8 + $0x7c8] ss:$12 sps:$4 sm:$0xff]  }
 0x2be   :  { %4670 = vmatpush1.bf16.msra.mxu0 %v6670_v61 }
 0x2bf   :  { %4671 = vmatprep.subr.bf16.mxu0 %v6677_v62  ;;  %v6722_v62 = vld [vmem:[#allocation8 + $0x7e0] ss:$12 sps:$4 sm:$0xff]  }
 0x2c2   :  { %4672 = vmatpush1.bf16.msra.mxu0 %v6675_v0  ;;  %v6727_v0 = vld [vmem:[#allocation8 + $0x7fc] ss:$12 sps:$4 sm:$0xff]  }
 0x2c3   :  { %v2420_v6 = vpop.f32.mrb[12].mxu1  ;;  %4673 = vmatprep.subr.bf16.mxu0 %v6682_v1  ;;  %v6725_v1 = vld [vmem:[#allocation8 + $0x7f8] ss:$12 sps:$4 sm:$0xff]  }
 0x2c4   :  { %v5876_v9 = vadd.f32 %v2420_v6, %v440_v55  ;;  %v2422_v10 = vpop.f32.mrb[13].mxu1  ;;  %v6731_v6 = vld [vmem:[#allocation8 + $0x828] ss:$12 sps:$4 sm:$0xff]  }
 0x2c5   :  { %v5877_v11 = vadd.f32 %v2422_v10, %v444_v30  ;;  %v2424_v3 = vpop.f32.mrb[14].mxu1  ;;  %v6739_v10 = vld [vmem:[#allocation8 + $0x85c] ss:$12 sps:$4 sm:$0xff]  }
 0x2c6   :  { %v2463_v35 = vmul.f32 0.70710677, %v5876_v9  ;;  %v5878_v12 = vadd.f32 %v2424_v3, %v440_v55  ;;  %4674 = vmatpush1.bf16.msra.mxu0 %v6680_v4  ;;  %v2426_v32 = vpop.f32.mrb[15].mxu1  ;;  %v2439_v22 = vmul.f32 0.5, %v5876_v9  ;;  %v6730_v55 = vld [vmem:[#allocation8 + $0x814] ss:$12 sps:$4 sm:$0xff]  }
 0x2c7   :  { %v2464_v15 = vmul.f32 0.70710677, %v5877_v11  ;;  %v5879_v17 = vadd.f32 %v2426_v32, %v444_v30  ;;  %4675 = vmatprep.subr.bf16.mxu0 %v6687_v8  ;;  %v2440_v24 = vmul.f32 0.5, %v5877_v11  ;;  %v6728_v30 = vld [vmem:[#allocation8 + $0x810] ss:$12 sps:$4 sm:$0xff]  }
 0x2c8   :  { %6798 = verf.f32 %v2463_v35  ;;  %v2475_v14 = vmul.f32 0.70710677, %v5878_v12  ;;  %v2451_v29 = vmul.f32 0.5, %v5878_v12  ;;  %v6733_v4 = vld [vmem:[#allocation8 + $0x82c] ss:$12 sps:$4 sm:$0xff]  }
 0x2c9   :  { %6800 = verf.f32 %v2464_v15  ;;  %v2476_v49 = vmul.f32 0.70710677, %v5879_v17  ;;  %v2452_v38 = vmul.f32 0.5, %v5879_v17  ;;  %v6736_v8 = vld [vmem:[#allocation8 + $0x844] ss:$12 sps:$4 sm:$0xff]  }
 0x2ca   :  { %6802 = verf.f32 %v2475_v14  ;;  %4676 = vmatpush1.bf16.msra.mxu0 %v6685_v13  ;;  %v6734_v9 = vld [vmem:[#allocation8 + $0x840] ss:$12 sps:$4 sm:$0xff]   ;;  %v6737_v11 = vld [vmem:[#allocation8 + $0x858] ss:$12 sps:$4 sm:$0xff]   ;;  %v6740_v35 = vld [vmem:[#allocation8 + $0x870] ss:$12 sps:$4 sm:$0xff]  }
 0x2cb   :  { %6804 = verf.f32 %v2476_v49  ;;  %4677 = vmatprep.subr.bf16.mxu0 %v6692_v40  ;;  %v6742_v3 = vld [vmem:[#allocation8 + $0x874] ss:$12 sps:$4 sm:$0xff]   ;;  %v6745_v32 = vld [vmem:[#allocation8 + $0x88c] ss:$12 sps:$4 sm:$0xff]  }
 0x2cc   :  { %v6743_v14 = vld [vmem:[#allocation8 + $0x888] ss:$12 sps:$4 sm:$0xff]  }
 0x2ce   :  { %4678 = vmatpush1.bf16.msra.mxu0 %v6690_v18 }
 0x2cf   :  { %4679 = vmatprep.subr.bf16.mxu0 %v6697_v19  ;;  %v6748_v19 = vld [vmem:[#allocation8 + $0x8a4] ss:$12 sps:$4 sm:$0xff]  }
 0x2d2   :  { %v6799_v23 = vpop.eup %6798  ;;  %4680 = vmatpush1.bf16.msra.mxu0 %v6695_v20 }
 0x2d3   :  { %v6801_v27 = vpop.eup %6800  ;;  %v2511_v28 = vadd.f32 1.0, %v6799_v23  ;;  %4681 = vmatprep.subr.bf16.mxu0 %v6702_v21  ;;  %v6746_v21 = vld [vmem:[#allocation8 + $0x8a0] ss:$12 sps:$4 sm:$0xff]   ;;  %v6749_v23 = vld [vmem:[#allocation8 + $0x8b8] ss:$12 sps:$4 sm:$0xff]  }
 0x2d4   :  { %v6803_v34 = vpop.eup %6802  ;;  %v2512_v37 = vadd.f32 1.0, %v6801_v27  ;;  %v6757_v27 = vld [vmem:[#allocation8 + $0x8ec] ss:$12 sps:$4 sm:$0xff]  }
 0x2d5   :  { %v6805_v39 = vpop.eup %6804  ;;  %v2535_v43 = vmul.f32 %v2511_v28, %v2439_v22  ;;  %v2523_v25 = vadd.f32 1.0, %v6803_v34  ;;  %v6751_v22 = vld [vmem:[#allocation8 + $0x8bc] ss:$12 sps:$4 sm:$0xff]  }
 0x2d6   :  { %v2536_v41 = vmul.f32 %v2512_v37, %v2440_v24  ;;  %v2524_v42 = vadd.f32 1.0, %v6805_v39  ;;  %4682 = vmatpush1.bf16.msra.mxu0 %v6700_v26  ;;  %v6754_v24 = vld [vmem:[#allocation8 + $0x8d4] ss:$12 sps:$4 sm:$0xff]   ;;  %v6752_v26 = vld [vmem:[#allocation8 + $0x8d0] ss:$12 sps:$4 sm:$0xff]  }
 0x2d7   :  { %v2547_v16 = vmul.f32 %v2523_v25, %v2451_v29  ;;  %4683 = vmatprep.subr.bf16.mxu0 %v6707_v31  ;;  %v6755_v28 = vld [vmem:[#allocation8 + $0x8e8] ss:$12 sps:$4 sm:$0xff]  }
 0x2d8   :  { %v2548_v63 = vmul.f32 %v2524_v42, %v2452_v38 }
 0x2d9   :  { %v7206_v46 = vpack.c.bf16 %v2547_v16, %v2535_v43 }
 0x2da   :  { %4684 = vmatpush1.bf16.msra.mxu0 %v6705_v7  ;;  %v2560_v48 = vpack.c.bf16 %v2548_v63, %v2536_v41 }
 0x2db   :  { %4696 = vmatprep.subr.bf16.mxu0 %v6712_v45 }
 0x2dc   :  { %4976 = vmatprep.mubr.bf16.mxu1 %v2560_v48 }
 0x2dd   :  { %4686 = vmatmul.mubr.bf16.vlgmr.msra.gmra.mrb[8].mxu0 %v7184_v2  ;;  %4977 = vmatmul.mubr.bf16.vlgmr.msra.gmra.mrb[36].mxu1 %v7206_v46  ;;  %v6724_v2 = vld [vmem:[#allocation8 + $0x7e4] ss:$12 sps:$4 sm:$0xff]  }
 0x2de   :  { %4697 = vmatpush1.bf16.msra.mxu0 %v6710_v47  ;;  %4728 = vmatprep.mubr.bf16.mxu0 %v2560_v48 }
 0x2df   :  { %4698 = vmatprep.subr.bf16.mxu0 %v6715_v50 }
 0x2e2   :  { %4699 = vmatpush1.bf16.msra.mxu0 %v6713_v51 }
 0x2e3   :  { %v5740_v54 = vpop.f32.mrb[16].mxu1  ;;  %4700 = vmatprep.subr.bf16.mxu0 %v6718_v52 }
 0x2e4   :  { %v5741_v57 = vpop.f32.mrb[17].mxu1 }
 0x2e5   :  { %v5742_v58 = vadd.f32 %v5741_v57, %v5740_v54  ;;  %v5743_v59 = vpop.f32.mrb[18].mxu1 }
 0x2e6   :  { %4701 = vmatpush1.bf16.msra.mxu0 %v6716_v53  ;;  %v5744_v33 = vpop.f32.mrb[19].mxu1 }
 0x2e7   :  { %v5745_v61 = vadd.f32 %v5744_v33, %v5743_v59  ;;  %4702 = vmatprep.subr.bf16.mxu0 %v6721_v56 }
 0x2ea   :  { %4703 = vmatpush1.bf16.msra.mxu0 %v6719_v60 }
 0x2eb   :  { %4704 = vmatprep.subr.bf16.mxu0 %v6724_v2 }
 0x2ee   :  { %4705 = vmatpush1.bf16.msra.mxu0 %v6722_v62 }
 0x2ef   :  { %4706 = vmatprep.subr.bf16.mxu0 %v6727_v0 }
 0x2f2   :  { %4707 = vmatpush1.bf16.msra.mxu0 %v6725_v1  ;;  %v5026_v1 = vld [vmem:[#allocation10] sm:$0x7] }
 0x2f3   :  { %4708 = vmatprep.subr.bf16.mxu0 %v6730_v55  ;;  %v5031_v55 = vrot.slane %v5026_v1, %v7137_v44 }
 0x2f6   :  { %4709 = vmatpush1.bf16.msra.mxu0 %v6728_v30  ;;  %v5039_v30 = vrot.slane %v5026_v1, %v7165_v36 }
 0x2f7   :  { %4710 = vmatprep.subr.bf16.mxu0 %v6733_v4  ;;  %v5035_v4 = vrot.slane %v5026_v1, %v7140_v5 }
 0x2fa   :  { %4711 = vmatpush1.bf16.msra.mxu0 %v6731_v6 }
 0x2fb   :  { %4712 = vmatprep.subr.bf16.mxu0 %v6736_v8 }
 0x2fe   :  { %4713 = vmatpush1.bf16.msra.mxu0 %v6734_v9 }
 0x2ff   :  { %4714 = vmatprep.subr.bf16.mxu0 %v6739_v10 }
 0x302   :  { %4715 = vmatpush1.bf16.msra.mxu0 %v6737_v11 }
 0x303   :  { %v5762_v12 = vpop.f32.mrb[20].mxu1  ;;  %4716 = vmatprep.subr.bf16.mxu0 %v6742_v3 }
 0x304   :  { %v5763_v13 = vpop.f32.mrb[21].mxu1 }
 0x305   :  { %v5764_v15 = vadd.f32 %v5763_v13, %v5762_v12  ;;  %v5765_v17 = vpop.f32.mrb[22].mxu1 }
 0x306   :  { %4717 = vmatpush1.bf16.msra.mxu0 %v6740_v35  ;;  %v5766_v40 = vpop.f32.mrb[23].mxu1 }
 0x307   :  { %v4815_v49 = vadd.f32 %v5764_v15, %v5742_v58  ;;  %v5767_v18 = vadd.f32 %v5766_v40, %v5765_v17  ;;  %4718 = vmatprep.subr.bf16.mxu0 %v6745_v32 }
 0x309   :  { %v4818_v20 = vadd.f32 %v5767_v18, %v5745_v61 }
 0x30a   :  { %4719 = vmatpush1.bf16.msra.mxu0 %v6743_v14 }
 0x30b   :  { %4720 = vmatprep.subr.bf16.mxu0 %v6748_v19 }
 0x30e   :  { %4721 = vmatpush1.bf16.msra.mxu0 %v6746_v21 }
 0x30f   :  { %4722 = vmatprep.subr.bf16.mxu0 %v6751_v22 }
 0x312   :  { %4723 = vmatpush1.bf16.msra.mxu0 %v6749_v23 }
 0x313   :  { %4724 = vmatprep.subr.bf16.mxu0 %v6754_v24 }
 0x316   :  { %4725 = vmatpush1.bf16.msra.mxu0 %v6752_v26 }
 0x317   :  { %4726 = vmatprep.subr.bf16.mxu0 %v6757_v27 }
 0x31a   :  { %4727 = vmatpush1.bf16.msra.mxu0 %v6755_v28 }
 0x31d   :  { %4729 = vmatmul.mubr.bf16.vlgmr.msra.gmra.mrb[8].mxu0 %v7206_v46 }
 0x323   :  { %v5784_v29 = vpop.f32.mrb[24].mxu1 }
 0x324   :  { %v5785_v31 = vpop.f32.mrb[25].mxu1 }
 0x325   :  { %v5786_v34 = vadd.f32 %v5785_v31, %v5784_v29  ;;  %v5787_v37 = vpop.f32.mrb[26].mxu1 }
 0x326   :  { %v5788_v38 = vpop.f32.mrb[27].mxu1 }
 0x327   :  { %v4856_v39 = vadd.f32 %v5786_v34, %v4815_v49  ;;  %v5789_v43 = vadd.f32 %v5788_v38, %v5787_v37 }
 0x329   :  { %v4859_v25 = vadd.f32 %v5789_v43, %v4818_v20 }
 0x350   :  { %v5806_v41 = vpop.f32.mrb[28].mxu1 }
 0x351   :  { %v5807_v42 = vpop.f32.mrb[29].mxu1 }
 0x352   :  { %v5808_v7 = vadd.f32 %v5807_v42, %v5806_v41  ;;  %v5809_v16 = vpop.f32.mrb[30].mxu1 }
 0x353   :  { %v5810_v45 = vpop.f32.mrb[31].mxu1 }
 0x354   :  { %v4897_v63 = vadd.f32 %v5808_v7, %v4856_v39  ;;  %v5811_v47 = vadd.f32 %v5810_v45, %v5809_v16 }
 0x356   :  { %v4900_v48 = vadd.f32 %v5811_v47, %v4859_v25 }
 0x370   :  { %v5828_v50 = vpop.f32.mrb[32].mxu1 }
 0x371   :  { %v5829_v51 = vpop.f32.mrb[33].mxu1 }
 0x372   :  { %v5830_v52 = vadd.f32 %v5829_v51, %v5828_v50  ;;  %v5831_v46 = vpop.f32.mrb[34].mxu1 }
 0x373   :  { %v5832_v53 = vpop.f32.mrb[35].mxu1 }
 0x374   :  { %v4938_v54 = vadd.f32 %v5830_v52, %v4897_v63  ;;  %v5833_v56 = vadd.f32 %v5832_v53, %v5831_v46  ;;  %v5096_v63 = vld [vmem:[#allocation11] sm:$0x7] }
 0x375   :  { %v5101_v47 = vrot.slane %v5096_v63, %v7137_v44  ;;  %v5109_v50 = vrot.slane %v5096_v63, %v7165_v36 }
 0x376   :  { %v4941_v57 = vadd.f32 %v5833_v56, %v4900_v48  ;;  %v5105_v48 = vrot.slane %v5096_v63, %v7140_v5 }
 0x3b0   :  { %v5850_v58 = vpop.f32.mrb[36].mxu1 }
 0x3b1   :  { %v5851_v59 = vpop.f32.mrb[37].mxu1 }
 0x3b2   :  { %v5852_v33 = vadd.f32 %v5851_v59, %v5850_v58  ;;  %v5853_v60 = vpop.f32.mrb[38].mxu1 }
 0x3b3   :  { %v5854_v61 = vpop.f32.mrb[39].mxu1 }
 0x3b4   :  { %v4979_v2 = vadd.f32 %v5852_v33, %v4938_v54  ;;  %v5855_v62 = vadd.f32 %v5854_v61, %v5853_v60 }
 0x3b6   :  { %v4982_v0 = vadd.f32 %v5855_v62, %v4941_v57  ;;  %v5045_v10 = vadd.f32 %v5039_v30, %v4979_v2 }
 0x3b8   :  { %v5062_v40 = vmul.f32 %v5045_v10, %v5045_v10  ;;  %v5048_v14 = vadd.f32 %v5039_v30, %v4982_v0 }
 0x3ba   :  { %v5065_v26 = vmul.f32 %v5048_v14, %v5048_v14 }
 0x3f0   :  { %v4730_v6 = vpop.f32.mrb[8].mxu0 }
 0x3f1   :  { %v4732_v8 = vpop.f32.mrb[9].mxu0  ;;  %v5043_v9 = vadd.f32 %v5031_v55, %v4730_v6 }
 0x3f2   :  { %v4734_v11 = vpop.f32.mrb[10].mxu0  ;;  %v5044_v3 = vadd.f32 %v5035_v4, %v4732_v8 }
 0x3f3   :  { %v4736_v35 = vpop.f32.mrb[11].mxu0  ;;  %v5060_v12 = vmul.f32 %v5043_v9, %v5043_v9  ;;  %v5046_v32 = vadd.f32 %v5031_v55, %v4734_v11 }
 0x3f4   :  { %v5049_v13 = vadd.f32 %v5044_v3, %v5043_v9  ;;  %v5061_v15 = vmul.f32 %v5044_v3, %v5044_v3  ;;  %v5047_v17 = vadd.f32 %v5035_v4, %v4736_v35 }
 0x3f5   :  { %v5063_v49 = vmul.f32 %v5046_v32, %v5046_v32 }
 0x3f6   :  { %v5050_v18 = vadd.f32 %v5049_v13, %v5045_v10  ;;  %v5066_v19 = vadd.f32 %v5061_v15, %v5060_v12  ;;  %v5053_v20 = vadd.f32 %v5047_v17, %v5046_v32  ;;  %v5064_v21 = vmul.f32 %v5047_v17, %v5047_v17 }
 0x3f8   :  { %5051 = vadd.xlane.f32.xlu0 %v5050_v18  ;;  %v5067_v22 = vadd.f32 %v5066_v19, %v5062_v40  ;;  %v5070_v23 = vadd.f32 %v5064_v21, %v5063_v49  ;;  %v5054_v24 = vadd.f32 %v5053_v20, %v5048_v14 }
 0x3fa   :  { %5068 = vadd.xlane.f32.xlu1 %v5067_v22  ;;  %v5071_v27 = vadd.f32 %v5070_v23, %v5065_v26 }
 0x3fc   :  { %5055 = vadd.xlane.f32.xlu0 %v5054_v24 }
 0x3fe   :  { %5072 = vadd.xlane.f32.xlu1 %v5071_v27 }
 0x485   :  { %v5052_v28 = vpop.xlane.xlu0 %5051 }
 0x486   :  { %v5058_v29 = vmul.f32 0.0026041667, %v5052_v28 }
 0x487   :  { %v5069_v31 = vpop.xlane.xlu1 %5068 }
 0x488   :  { %v5074_v34 = vmul.f32 0.0026041667, %v5069_v31  ;;  %v5076_v37 = vmul.f32 %v5058_v29, %v5058_v29  ;;  %v5080_v51 = vsub.f32 %v5043_v9, %v5058_v29  ;;  %v5081_v52 = vsub.f32 %v5044_v3, %v5058_v29 }
 0x489   :  { %v5056_v38 = vpop.xlane.xlu0 %5055  ;;  %v5082_v46 = vsub.f32 %v5045_v10, %v5058_v29 }
 0x48a   :  { %v5059_v39 = vmul.f32 0.0026041667, %v5056_v38  ;;  %v5078_v43 = vsub.f32 %v5074_v34, %v5076_v37 }
 0x48b   :  { %v5073_v25 = vpop.xlane.xlu1 %5072 }
 0x48c   :  { %v5075_v41 = vmul.f32 0.0026041667, %v5073_v25  ;;  %v5086_v42 = vadd.f32 1e-05, %v5078_v43  ;;  %v5077_v7 = vmul.f32 %v5059_v39, %v5059_v39  ;;  %v5083_v58 = vsub.f32 %v5046_v32, %v5059_v39 }
 0x48d   :  { %v5084_v59 = vsub.f32 %v5047_v17, %v5059_v39  ;;  %v5085_v2 = vsub.f32 %v5048_v14, %v5059_v39 }
 0x48e   :  { %6806 = vrsqrt.f32 %v5086_v42  ;;  %v5079_v16 = vsub.f32 %v5075_v41, %v5077_v7 }
 0x490   :  { %v5087_v45 = vadd.f32 1e-05, %v5079_v16 }
 0x492   :  { %6808 = vrsqrt.f32 %v5087_v45 }
 0x498   :  { %v6807_v53 = vpop.eup %6806 }
 0x499   :  { %v5090_v54 = vmul.f32 %v6807_v53, %v5080_v51  ;;  %v5091_v56 = vmul.f32 %v6807_v53, %v5081_v52  ;;  %v5092_v57 = vmul.f32 %v6807_v53, %v5082_v46 }
 0x49b   :  { %v5113_v33 = vmul.f32 %v5101_v47, %v5090_v54  ;;  %v5114_v60 = vmul.f32 %v5105_v48, %v5091_v56  ;;  %v5115_v61 = vmul.f32 %v5109_v50, %v5092_v57 }
 0x49c   :  { %v6809_v44 = vpop.eup %6808 }
 0x49d   :  { %5119 = vst [vmem:[#allocation13] sm:$0xff] %v5113_v33  ;;  %5120 = vst [vmem:[#allocation13 + $0x8] sm:$0xff] %v5114_v60  ;;  %v5093_v5 = vmul.f32 %v6809_v44, %v5083_v58  ;;  %v5094_v36 = vmul.f32 %v6809_v44, %v5084_v59  ;;  %v5095_v62 = vmul.f32 %v6809_v44, %v5085_v2 }
 0x49e   :  { %5121 = vst [vmem:[#allocation13 + $0x10] sm:$0xff] %v5115_v61 }
 0x49f   :  { %v5116_v0 = vmul.f32 %v5101_v47, %v5093_v5  ;;  %v5117_v1 = vmul.f32 %v5105_v48, %v5094_v36  ;;  %v5118_v55 = vmul.f32 %v5109_v50, %v5095_v62 }
 0x4a1   :  { %5122 = vst [vmem:[#allocation13 + $0x18] sm:$0xff] %v5116_v0  ;;  %5123 = vst [vmem:[#allocation13 + $0x20] sm:$0xff] %v5117_v1 }
 0x4a2   :  { %5124 = vst [vmem:[#allocation13 + $0x28] sm:$0xff] %v5118_v55 }
 0x4a3   :  { %6957 = shalt.err (!%p6954_p10)
}
 0x4a4   :  { %s6958_s22 = scalar_lea.hbm %s7235_s6, 768 }
 0x4a5   :  { %p6959_p11 = scmp.ne.s32.totalorder %s7235_s6, %s6958_s22  ;;  %p6962_p12 = scmp.lt.u32.totalorder %s6958_s22, %s7235_s6 }
 0x4a7   :  { %p6964_p13 = pnand %p6962_p12, %p6959_p11 }
 0x4a9   :  { %6967 = shalt.err (!%p6964_p13)
}
 0x4aa   :  { %s6990_s27 = smov 384   ;;  %s6991_s28 = smov 24  }
 0x4ab   :  { %5136 = dma.vmem_to_hbm [thread:$0]  %s5131_s21, 768, %s7235_s6, [#allocation4], %s6990_s27, %s6990_s27, %s6991_s28  }
 0x4ac   :  { %6976 = dma.done.wait [#allocation4], 768  }
 0x4ad   :  { %6977 = vsyncadd [#allocation4], 4294966528 }
 0x4ae   :  { %5140 = vsyncpa [#allocation3], 1 }
 0x4af   :  { %5141 = vsyncpa [#allocation6], 1 }
 0x4b0   :  { %5142 = vsyncpa [#allocation9], 1 }
 0x4b1   :  { %5143 = vsyncpa [#allocation12], 1 }
 0x4b2   :  { %5144 = vsyncpa [#allocation4], 1 }

</bundles_post_ra>
